<compile_context>
chip_gen: v5e
topology: v5e:2x2
jax: 0.10.0
libtpu: 0.0.40
codegen_flags: <defaults>
</compile_context>

<pallas_src>
import math
import jax
import jax.numpy as jnp
from jax.experimental import pallas as pl
from jax.experimental.pallas import tpu as pltpu

MUL = 8                     # multiplicity of every node-feature irrep
NF_DIM = 4 * MUL            # 32  lane-dense node feature width [s|vx|vy|vz]
NA_DIM = 4                  # one-hot species
XNA_DIM = NA_DIM * NF_DIM   # 128 = per-species scaled copies of x (fused sc input)
EA_DIM = 4                  # 1x0e + 1x1o
EB_DIM = 8                  # radial basis size
INV_NEURONS = 8             # invariant_neurons
TPW = 4 * MUL               # tp.weight_numel = 32
NPATH = 10                  # real path-slab blocks (1 + 3 + 3 + 3)
SLAB_REAL = NPATH * MUL     # 80
SLAB = 128                  # lane-padded path slab width
INV_SQRT3 = 1.0 / math.sqrt(3.0)
TE_MAX = 512                # max edge tile (sweepable 256-1024)

# path-slab block layout (first 10 blocks; blocks 10..15 are zero padding):
#   b       : 0    1    2    3    4    5    6    7    8    9
#   tp path : 0e0e 1o1o 1o1o 1o1o 0e1o 0e1o 0e1o 1o0e 1o0e 1o0e
_W_PATH  = [0, 3, 3, 3, 1, 1, 1, 2, 2, 2]   # column block of raw fc weights
_FEAT    = [0, 1, 2, 3, 0, 0, 0, 1, 2, 3]   # col-block of y = [s|vx|vy|vz]
_EA_COL  = [0, 1, 2, 3, 1, 2, 3, 0, 0, 0]   # which edge_attr column multiplies
_OUT_BLK = [0, 0, 0, 0, 1, 2, 3, 1, 2, 3]   # output col-block after linear_2
_LIN2    = [0, 1, 1, 1, 2, 2, 2, 3, 3, 3]   # 0:wl2s[:8] 1:wl2s[8:] 2:wl2v[:8] 3:wl2v[8:]


def _round_up(a, b):
    return (a + b - 1) // b * b


def _interaction_kernel(
    x_ref, xna_ref, eb_ref, ea_ref, src_ref, dst_ref,
    wfc1_ref, wfc2_ref, sel_ref, wlin1_ref, wsc_ref, wlin2_ref,
    out_ref, y_ref, acc_ref, sc_ref,
):
    f32 = jnp.float32
    bf16 = jnp.bfloat16
    c = pl.program_id(0)          # edge-half (parallel across TensorCores on v7x)
    e = pl.program_id(1)          # edge tile within the half (reduction)

    @pl.when(e == 0)
    def _init():
        # linear_1 with output columns pre-duplicated into the 128-wide path
        # slab; cast ONCE to bf16 so every edge tile's gather matmul reads bf16.
        y_ref[...] = jnp.dot(x_ref[...], wlin1_ref[...],
                             preferred_element_type=f32).astype(bf16)
        acc_ref[...] = jnp.zeros_like(acc_ref)
        # sc (self-connection) is edge independent: one K=128 MXU pass computed
        # under the first edge tile's DMA; only the c==0 half contributes it.
        sc = jnp.dot(xna_ref[...], wsc_ref[...], preferred_element_type=f32)
        sc_ref[...] = sc * (c == 0).astype(f32)

    # ---- fc : radial MLP -> per-edge tp weights, in the 128-wide path layout ----
    h = jax.nn.silu(jnp.dot(eb_ref[...], wfc1_ref[...], preferred_element_type=f32))
    w128 = jnp.dot(h, wfc2_ref[...], preferred_element_type=f32)            # [TE, 128]
    # ---- edge_attrs broadcast to the path layout (tiny matmul) ------------------
    c128 = jnp.dot(ea_ref[...], sel_ref[...], preferred_element_type=f32)   # [TE, 128]
    # ---- gather x[edge_src] : ONE fused one-hot matmul (bf16 x bf16 -> f32) -----
    g128 = jnp.dot(src_ref[...], y_ref[...], preferred_element_type=f32)    # [TE, 128]
    # ---- 'uvu' tensor product : purely elementwise in the path slab -------------
    slab = (w128 * g128 * c128).astype(bf16)
    # ---- scatter-add over edge_dst : contract over the edge axis of the
    #      UNTRANSPOSED one-hot row tile (dW = x^T g pattern, contiguous DMA) -----
    acc_ref[...] += jax.lax.dot_general(
        dst_ref[...], slab,
        dimension_numbers=(((0,), (0,)), ((), ())),
        preferred_element_type=f32)                                         # [N, 128]

    @pl.when(e == pl.num_programs(1) - 1)
    def _finalize():
        # linear_2 fused into a single [128,32] matmul (path sum + channel mix)
        # plus the (core-0-only) residual self-connection.
        out_ref[0] = (jnp.dot(acc_ref[...], wlin2_ref[...],
                              preferred_element_type=f32)
                      + sc_ref[...]).astype(out_ref.dtype)


def build_fused_params(params):
    """Fold normalization constants and fuse the raw per-irrep weights into the
    wide block/duplicated matrices the kernel consumes (slab width padded to 128)."""
    wfc1, wfc2, wl1s, wl1v, wl2s, wl2v, wscs, wscv = params
    f32 = jnp.float32
    lin1_n = 1.0 / math.sqrt(MUL)
    lin2_n = 1.0 / math.sqrt(2 * MUL)
    sc_n = 1.0 / math.sqrt(MUL * NA_DIM)

    # fc: fold fan-in norms; fold the CG coefficient 1/sqrt(3) into 1o x 1o -> 0e.
    wfc1_f = (wfc1 * (1.0 / math.sqrt(EB_DIM))).astype(f32)
    wfc2_n = (wfc2 * (1.0 / math.sqrt(INV_NEURONS))).astype(f32)
    wpaths = [wfc2_n[:, p * MUL:(p + 1) * MUL] for p in range(4)]
    wpaths[3] = wpaths[3] * INV_SQRT3
    wfc2_s = jnp.concatenate([wpaths[_W_PATH[b]] for b in range(NPATH)], axis=1)
    wfc2_s = jnp.pad(wfc2_s, ((0, 0), (0, SLAB - SLAB_REAL)))               # [8, 128]

    # edge_attr column selector -> [4, 128]
    sel = jnp.zeros((EA_DIM, SLAB), f32)
    for b in range(NPATH):
        sel = sel.at[_EA_COL[b], b * MUL:(b + 1) * MUL].set(1.0)

    # linear_1 with duplicated output blocks -> [32, 128]
    wlin1_s = jnp.zeros((NF_DIM, SLAB), f32)
    for b in range(NPATH):
        f = _FEAT[b]
        wb = (wl1s if f == 0 else wl1v) * lin1_n
        wlin1_s = wlin1_s.at[f * MUL:(f + 1) * MUL, b * MUL:(b + 1) * MUL].set(wb)

    # linear_2 fused over the 10 real path blocks -> [128, 32] (pad rows are zero)
    lin2_rows = [wl2s[:MUL], wl2s[MUL:], wl2v[:MUL], wl2v[MUL:]]
    wlin2_s = jnp.zeros((SLAB, NF_DIM), f32)
    for b in range(NPATH):
        o = _OUT_BLK[b]
        wlin2_s = wlin2_s.at[b * MUL:(b + 1) * MUL, o * MUL:(o + 1) * MUL].set(
            lin2_rows[_LIN2[b]] * lin2_n)

    # sc: per-species block-diagonal [4, 32, 32] stacked along rows -> [128, 32]
    wsc_bd = jnp.zeros((NA_DIM, NF_DIM, NF_DIM), f32)
    for v in range(NA_DIM):
        wsc_bd = wsc_bd.at[v, 0:MUL, 0:MUL].set(wscs[v] * sc_n)
        for m in range(3):
            lo = MUL * (m + 1)
            wsc_bd = wsc_bd.at[v, lo:lo + MUL, lo:lo + MUL].set(wscv[v] * sc_n)
    wsc_flat = wsc_bd.reshape(XNA_DIM, NF_DIM)                              # [128, 32]

    return wfc1_f, wfc2_s, sel, wlin1_s, wsc_flat, wlin2_s


def interaction_block_forward(x, node_attrs, edge_embedding, edge_attrs, edge_index, params):
    """InteractionBlock forward as one edge-tiled Pallas kernel.

    x              : [N, 32]  e3nn layout (8 scalars | 8x1o flattened (u, m))
    node_attrs     : [N, 4]   one-hot species
    edge_embedding : [E, 8]
    edge_attrs     : [E, 4]   (Y0 | Y1x Y1y Y1z)
    edge_index     : [2, E]   int32, row 0 = edge_dst, row 1 = edge_src
    """
    f32 = jnp.float32
    N = x.shape[0]
    E = edge_index.shape[1]
    N_pad = _round_up(max(N, 1), 128)                       # lane/K alignment
    te = max(128, min(TE_MAX, _round_up(-(-E // 2), 128)))  # adaptive edge tile
    E_pad = _round_up(max(E, 1), 2 * te)                    # 2 halves x n_half tiles
    n_tiles = E_pad // te
    n_half = n_tiles // 2

    edge_dst = edge_index[0].astype(jnp.int32)
    edge_src = edge_index[1].astype(jnp.int32)

    # e3nn (u, m) layout -> lane-dense m-major blocks [s | vx | vy | vz]
    x = x.astype(f32)
    x_v = x[:, MUL:].reshape(N, MUL, 3)
    x32 = jnp.concatenate([x[:, :MUL], x_v[:, :, 0], x_v[:, :, 1], x_v[:, :, 2]], axis=-1)
    x32 = jnp.zeros((N_pad, NF_DIM), f32).at[:N].set(x32)
    na = jnp.zeros((N_pad, NA_DIM), f32).at[:N].set(node_attrs.astype(f32))
    # per-species scaled copies of x, lane-concatenated -> single K=128 sc matmul
    xna = jnp.concatenate([x32 * na[:, v:v + 1] for v in range(NA_DIM)], axis=-1)

    eb = jnp.zeros((E_pad, EB_DIM), f32).at[:E].set(edge_embedding.astype(f32))
    ea = jnp.zeros((E_pad, EA_DIM), f32).at[:E].set(edge_attrs.astype(f32))

    # padded edges get out-of-range indices -> all-zero one-hot rows (no-ops).
    # Both one-hots are kept UNTRANSPOSED [E_pad, N_pad] so every grid step DMAs
    # one contiguous row tile; the scatter contracts over the edge axis in-kernel.
    src_pad = jnp.full((E_pad,), N_pad, jnp.int32).at[:E].set(edge_src)
    dst_pad = jnp.full((E_pad,), N_pad, jnp.int32).at[:E].set(edge_dst)
    src_oh = jax.nn.one_hot(src_pad, N_pad, dtype=jnp.bfloat16)   # [E_pad, N_pad]
    dst_oh = jax.nn.one_hot(dst_pad, N_pad, dtype=jnp.bfloat16)   # [E_pad, N_pad]

    fused = build_fused_params(params)

    # VMEM budget: double-buffered edge tiles + resident node slabs / weights /
    # output + scratch; 25% headroom, capped at the v7x 64 MiB physical ceiling.
    bf, f4 = 2, 4
    budget = (2 * (2 * te * N_pad * bf + te * (EB_DIM + EA_DIM) * f4)
              + 2 * N_pad * (NF_DIM + XNA_DIM) * f4
              + 2 * f4 * (EB_DIM * INV_NEURONS + (INV_NEURONS + EA_DIM + NF_DIM) * SLAB
                          + XNA_DIM * NF_DIM + SLAB * NF_DIM)
              + 2 * N_pad * NF_DIM * f4
              + N_pad * (SLAB * (bf + f4) + NF_DIM * f4))
    vmem_limit = int(min(64 << 20, max(32 << 20, 1.25 * budget)))

    partial = pl.pallas_call(
        _interaction_kernel,
        out_shape=jax.ShapeDtypeStruct((2, N_pad, NF_DIM), f32),
        grid_spec=pltpu.PrefetchScalarGridSpec(
            num_scalar_prefetch=0,
            grid=(2, n_half),
            in_specs=[
                pl.BlockSpec((N_pad, NF_DIM), lambda c, e: (0, 0)),           # x32
                pl.BlockSpec((N_pad, XNA_DIM), lambda c, e: (0, 0)),          # xna (sc input)
                pl.BlockSpec((te, EB_DIM), lambda c, e: (c * n_half + e, 0)), # edge_embedding
                pl.BlockSpec((te, EA_DIM), lambda c, e: (c * n_half + e, 0)), # edge_attrs
                pl.BlockSpec((te, N_pad), lambda c, e: (c * n_half + e, 0)),  # gather one-hot
                pl.BlockSpec((te, N_pad), lambda c, e: (c * n_half + e, 0)),  # scatter one-hot
                pl.BlockSpec((EB_DIM, INV_NEURONS), lambda c, e: (0, 0)),
                pl.BlockSpec((INV_NEURONS, SLAB), lambda c, e: (0, 0)),
                pl.BlockSpec((EA_DIM, SLAB), lambda c, e: (0, 0)),
                pl.BlockSpec((NF_DIM, SLAB), lambda c, e: (0, 0)),
                pl.BlockSpec((XNA_DIM, NF_DIM), lambda c, e: (0, 0)),
                pl.BlockSpec((SLAB, NF_DIM), lambda c, e: (0, 0)),
            ],
            out_specs=pl.BlockSpec((1, N_pad, NF_DIM), lambda c, e: (c, 0, 0)),
            scratch_shapes=[pltpu.VMEM((N_pad, SLAB), jnp.bfloat16),   # linear_1 slab (bf16)
                            pltpu.VMEM((N_pad, SLAB), f32),            # scatter accumulator
                            pltpu.VMEM((N_pad, NF_DIM), f32)],         # self-connection
        ),
        compiler_params=pltpu.CompilerParams(
            dimension_semantics=("parallel", "arbitrary"),   # edge halves || , tiles = reduction
            vmem_limit_bytes=vmem_limit),
    )(x32, xna, eb, ea, src_oh, dst_oh, *fused)

    # combine the two edge-half partials, back to e3nn layout [N, 32]
    out32 = (partial[0] + partial[1])[:N]
    out_v = out32[:, MUL:].reshape(N, 3, MUL).transpose(0, 2, 1).reshape(N, 3 * MUL)
    return jnp.concatenate([out32[:, :MUL], out_v], axis=-1)


if __name__ == "__main__":
    key = jax.random.PRNGKey(0)
    kx, ka, ki, kv, kb, kp = jax.random.split(key, 6)
    N, E = 64, 2000   # E pads to 2048 -> 4 edge tiles of 512, 2 per edge-half

    x = jax.random.normal(kx, (N, NF_DIM), jnp.float32)
    species = jax.random.randint(ka, (N,), 0, NA_DIM)
    node_attrs = jax.nn.one_hot(species, NA_DIM, dtype=jnp.float32)
    edge_index = jax.random.randint(ki, (2, E), 0, N)
    # edge_attrs: component-normalized real SH (l=0,1) of random edge vectors
    vec = jax.random.normal(kv, (E, 3), jnp.float32)
    unit = vec / jnp.linalg.norm(vec, axis=-1, keepdims=True)
    edge_attrs = jnp.concatenate([jnp.ones((E, 1), jnp.float32), math.sqrt(3.0) * unit], axis=-1)
    edge_embedding = jax.random.normal(kb, (E, EB_DIM), jnp.float32)

    pkeys = jax.random.split(kp, 8)
    params = (
        jax.random.normal(pkeys[0], (EB_DIM, INV_NEURONS), jnp.float32),  # fc layer 1
        jax.random.normal(pkeys[1], (INV_NEURONS, TPW), jnp.float32),     # fc layer 2 (-> tp weights)
        jax.random.normal(pkeys[2], (MUL, MUL), jnp.float32),             # linear_1 0e block
        jax.random.normal(pkeys[3], (MUL, MUL), jnp.float32),             # linear_1 1o block
        jax.random.normal(pkeys[4], (2 * MUL, MUL), jnp.float32),         # linear_2 0e block (16->8)
        jax.random.normal(pkeys[5], (2 * MUL, MUL), jnp.float32),         # linear_2 1o block (16->8)
        jax.random.normal(pkeys[6], (NA_DIM, MUL, MUL), jnp.float32),     # sc 0e paths
        jax.random.normal(pkeys[7], (NA_DIM, MUL, MUL), jnp.float32),     # sc 1o paths
    )

    out = interaction_block_forward(x, node_attrs, edge_embedding, edge_attrs, edge_index, params)
    out = jax.block_until_ready(out)
    assert out.shape == (N, NF_DIM)
    assert bool(jnp.all(jnp.isfinite(out)))
    print("KERNEL_OK")
</pallas_src>

<mosaic_0001>
module attributes {stable_mosaic.version = 11 : i64} {
  func.func @_interaction_kernel(%arg0: i32, %arg1: i32, %arg2: memref<128x32xf32, #tpu.memory_space<vmem>>, %arg3: memref<128x128xf32, #tpu.memory_space<vmem>>, %arg4: memref<512x8xf32, #tpu.memory_space<vmem>>, %arg5: memref<512x4xf32, #tpu.memory_space<vmem>>, %arg6: memref<512x128xbf16, #tpu.memory_space<vmem>>, %arg7: memref<512x128xbf16, #tpu.memory_space<vmem>>, %arg8: memref<8x8xf32, #tpu.memory_space<vmem>>, %arg9: memref<8x128xf32, #tpu.memory_space<vmem>>, %arg10: memref<4x128xf32, #tpu.memory_space<vmem>>, %arg11: memref<32x128xf32, #tpu.memory_space<vmem>>, %arg12: memref<128x32xf32, #tpu.memory_space<vmem>>, %arg13: memref<128x32xf32, #tpu.memory_space<vmem>>, %arg14: memref<1x128x32xf32, #tpu.memory_space<vmem>>, %arg15: memref<128x128xbf16, #tpu.memory_space<vmem>>, %arg16: memref<128x128xf32, #tpu.memory_space<vmem>>, %arg17: memref<128x32xf32, #tpu.memory_space<vmem>>) attributes {dimension_semantics = [#tpu.dimension_semantics<parallel>, #tpu.dimension_semantics<arbitrary>], iteration_bounds = array<i64: 2, 2>, scalar_prefetch = 0 : i64, scratch_operands = 3 : i64, tpu.core_type = #tpu.core_type<tc>, window_params = [{pipeline_mode = #tpu.pipeline_mode<synchronous>, transform_indices = @transform_0, window_bounds = array<i64: 128, 32>}, {pipeline_mode = #tpu.pipeline_mode<synchronous>, transform_indices = @transform_1, window_bounds = array<i64: 128, 128>}, {transform_indices = @transform_2, window_bounds = array<i64: 512, 8>}, {transform_indices = @transform_3, window_bounds = array<i64: 512, 4>}, {transform_indices = @transform_4, window_bounds = array<i64: 512, 128>}, {transform_indices = @transform_5, window_bounds = array<i64: 512, 128>}, {pipeline_mode = #tpu.pipeline_mode<synchronous>, transform_indices = @transform_6, window_bounds = array<i64: 8, 8>}, {pipeline_mode = #tpu.pipeline_mode<synchronous>, transform_indices = @transform_7, window_bounds = array<i64: 8, 128>}, {pipeline_mode = #tpu.pipeline_mode<synchronous>, transform_indices = @transform_8, window_bounds = array<i64: 4, 128>}, {pipeline_mode = #tpu.pipeline_mode<synchronous>, transform_indices = @transform_9, window_bounds = array<i64: 32, 128>}, {pipeline_mode = #tpu.pipeline_mode<synchronous>, transform_indices = @transform_10, window_bounds = array<i64: 128, 32>}, {pipeline_mode = #tpu.pipeline_mode<synchronous>, transform_indices = @transform_11, window_bounds = array<i64: 128, 32>}, {transform_indices = @transform_12, window_bounds = array<i64: 1, 128, 32>}]} {
    %c0_i32 = arith.constant 0 : i32
    %0 = arith.cmpi eq, %arg1, %c0_i32 : i32
    %1 = arith.extui %0 : i1 to i32
    %c0_i32_0 = arith.constant 0 : i32
    %2 = arith.cmpi ne, %1, %c0_i32_0 : i32
    scf.if %2 {
      %c0_26 = arith.constant 0 : index
      %c0_27 = arith.constant 0 : index
      %31 = vector.load %arg2[%c0_26, %c0_27] : memref<128x32xf32, #tpu.memory_space<vmem>>, vector<128x32xf32>
      %c0_28 = arith.constant 0 : index
      %c0_29 = arith.constant 0 : index
      %32 = vector.load %arg11[%c0_28, %c0_29] : memref<32x128xf32, #tpu.memory_space<vmem>>, vector<32x128xf32>
      %cst_30 = arith.constant dense<0.000000e+00> : vector<128x128xf32>
      %33 = tpu.matmul %31, %32, %cst_30 {dimension_numbers = #tpu.dot_dimension_numbers<[1], [0], [0], [1], [0, 0, 1, 1], [], []>} : vector<128x32xf32>, vector<32x128xf32>, vector<128x128xf32> -> vector<128x128xf32>
      %34 = arith.truncf %33 : vector<128x128xf32> to vector<128x128xbf16>
      %c0_31 = arith.constant 0 : index
      %c0_32 = arith.constant 0 : index
      %35 = vector.load %arg15[%c0_31, %c0_32] : memref<128x128xbf16, #tpu.memory_space<vmem>>, vector<128x128xbf16>
      tpu.vector_store %arg15[%c0_31, %c0_32], %34 {strides = array<i32>} : memref<128x128xbf16, #tpu.memory_space<vmem>>, vector<128x128xbf16>,
      %cst_33 = arith.constant 0.000000e+00 : f32
      %36 = vector.broadcast %cst_33 : f32 to vector<128x128xf32>
      %c0_34 = arith.constant 0 : index
      %c0_35 = arith.constant 0 : index
      %37 = vector.load %arg16[%c0_34, %c0_35] : memref<128x128xf32, #tpu.memory_space<vmem>>, vector<128x128xf32>
      tpu.vector_store %arg16[%c0_34, %c0_35], %36 {strides = array<i32>} : memref<128x128xf32, #tpu.memory_space<vmem>>, vector<128x128xf32>,
      %c0_36 = arith.constant 0 : index
      %c0_37 = arith.constant 0 : index
      %38 = vector.load %arg3[%c0_36, %c0_37] : memref<128x128xf32, #tpu.memory_space<vmem>>, vector<128x128xf32>
      %c0_38 = arith.constant 0 : index
      %c0_39 = arith.constant 0 : index
      %39 = vector.load %arg12[%c0_38, %c0_39] : memref<128x32xf32, #tpu.memory_space<vmem>>, vector<128x32xf32>
      %cst_40 = arith.constant dense<0.000000e+00> : vector<128x32xf32>
      %40 = tpu.matmul %38, %39, %cst_40 {dimension_numbers = #tpu.dot_dimension_numbers<[1], [0], [0], [1], [0, 0, 1, 1], [], []>} : vector<128x128xf32>, vector<128x32xf32>, vector<128x32xf32> -> vector<128x32xf32>
      %c0_i32_41 = arith.constant 0 : i32
      %41 = arith.cmpi eq, %arg0, %c0_i32_41 : i32
      %42 = arith.extui %41 : i1 to i32
      %43 = arith.sitofp %42 : i32 to f32
      %44 = vector.broadcast %43 : f32 to vector<128x32xf32>
      %45 = arith.mulf %40, %44 : vector<128x32xf32>
      %c0_42 = arith.constant 0 : index
      %c0_43 = arith.constant 0 : index
      %46 = vector.load %arg17[%c0_42, %c0_43] : memref<128x32xf32, #tpu.memory_space<vmem>>, vector<128x32xf32>
      tpu.vector_store %arg17[%c0_42, %c0_43], %45 {strides = array<i32>} : memref<128x32xf32, #tpu.memory_space<vmem>>, vector<128x32xf32>,
    } else {
    }
    %c0 = arith.constant 0 : index
    %c0_1 = arith.constant 0 : index
    %3 = vector.load %arg4[%c0, %c0_1] : memref<512x8xf32, #tpu.memory_space<vmem>>, vector<512x8xf32>
    %c0_2 = arith.constant 0 : index
    %c0_3 = arith.constant 0 : index
    %4 = vector.load %arg8[%c0_2, %c0_3] : memref<8x8xf32, #tpu.memory_space<vmem>>, vector<8x8xf32>
    %cst = arith.constant dense<0.000000e+00> : vector<512x8xf32>
    %5 = tpu.matmul %3, %4, %cst {dimension_numbers = #tpu.dot_dimension_numbers<[1], [0], [0], [1], [0, 0, 1, 1], [], []>} : vector<512x8xf32>, vector<8x8xf32>, vector<512x8xf32> -> vector<512x8xf32>
    %6 = arith.negf %5 : vector<512x8xf32>
    %7 = math.exp %6 : vector<512x8xf32>
    %cst_4 = arith.constant 1.000000e+00 : f32
    %8 = vector.broadcast %cst_4 : f32 to vector<512x8xf32>
    %9 = arith.addf %8, %7 : vector<512x8xf32>
    %10 = arith.divf %8, %9 : vector<512x8xf32>
    %11 = arith.mulf %5, %10 : vector<512x8xf32>
    %c0_5 = arith.constant 0 : index
    %c0_6 = arith.constant 0 : index
    %12 = vector.load %arg9[%c0_5, %c0_6] : memref<8x128xf32, #tpu.memory_space<vmem>>, vector<8x128xf32>
    %cst_7 = arith.constant dense<0.000000e+00> : vector<512x128xf32>
    %13 = tpu.matmul %11, %12, %cst_7 {dimension_numbers = #tpu.dot_dimension_numbers<[1], [0], [0], [1], [0, 0, 1, 1], [], []>} : vector<512x8xf32>, vector<8x128xf32>, vector<512x128xf32> -> vector<512x128xf32>
    %c0_8 = arith.constant 0 : index
    %c0_9 = arith.constant 0 : index
    %14 = vector.load %arg5[%c0_8, %c0_9] : memref<512x4xf32, #tpu.memory_space<vmem>>, vector<512x4xf32>
    %c0_10 = arith.constant 0 : index
    %c0_11 = arith.constant 0 : index
    %15 = vector.load %arg10[%c0_10, %c0_11] : memref<4x128xf32, #tpu.memory_space<vmem>>, vector<4x128xf32>
    %cst_12 = arith.constant dense<0.000000e+00> : vector<512x128xf32>
    %16 = tpu.matmul %14, %15, %cst_12 {dimension_numbers = #tpu.dot_dimension_numbers<[1], [0], [0], [1], [0, 0, 1, 1], [], []>} : vector<512x4xf32>, vector<4x128xf32>, vector<512x128xf32> -> vector<512x128xf32>
    %c0_13 = arith.constant 0 : index
    %c0_14 = arith.constant 0 : index
    %17 = vector.load %arg6[%c0_13, %c0_14] : memref<512x128xbf16, #tpu.memory_space<vmem>>, vector<512x128xbf16>
    %c0_15 = arith.constant 0 : index
    %c0_16 = arith.constant 0 : index
    %18 = vector.load %arg15[%c0_15, %c0_16] : memref<128x128xbf16, #tpu.memory_space<vmem>>, vector<128x128xbf16>
    %cst_17 = arith.constant dense<0.000000e+00> : vector<512x128xf32>
    %19 = tpu.matmul %17, %18, %cst_17 {dimension_numbers = #tpu.dot_dimension_numbers<[1], [0], [0], [1], [0, 0, 1, 1], [], []>} : vector<512x128xbf16>, vector<128x128xbf16>, vector<512x128xf32> -> vector<512x128xf32>
    %20 = arith.mulf %13, %19 : vector<512x128xf32>
    %21 = arith.mulf %20, %16 : vector<512x128xf32>
    %22 = arith.truncf %21 : vector<512x128xf32> to vector<512x128xbf16>
    %c0_18 = arith.constant 0 : index
    %c0_19 = arith.constant 0 : index
    %23 = vector.load %arg16[%c0_18, %c0_19] : memref<128x128xf32, #tpu.memory_space<vmem>>, vector<128x128xf32>
    %c0_20 = arith.constant 0 : index
    %c0_21 = arith.constant 0 : index
    %24 = vector.load %arg7[%c0_20, %c0_21] : memref<512x128xbf16, #tpu.memory_space<vmem>>, vector<512x128xbf16>
    %cst_22 = arith.constant dense<0.000000e+00> : vector<128x128xf32>
    %25 = tpu.matmul %24, %22, %cst_22 {dimension_numbers = #tpu.dot_dimension_numbers<[0], [0], [1], [1], [0, 1, 1, 1], [], []>} : vector<512x128xbf16>, vector<512x128xbf16>, vector<128x128xf32> -> vector<128x128xf32>
    %26 = arith.addf %23, %25 : vector<128x128xf32>
    %c0_23 = arith.constant 0 : index
    %c0_24 = arith.constant 0 : index
    %27 = vector.load %arg16[%c0_23, %c0_24] : memref<128x128xf32, #tpu.memory_space<vmem>>, vector<128x128xf32>
    tpu.vector_store %arg16[%c0_23, %c0_24], %26 {strides = array<i32>} : memref<128x128xf32, #tpu.memory_space<vmem>>, vector<128x128xf32>,
    %c1_i32 = arith.constant 1 : i32
    %28 = arith.cmpi eq, %arg1, %c1_i32 : i32
    %29 = arith.extui %28 : i1 to i32
    %c0_i32_25 = arith.constant 0 : i32
    %30 = arith.cmpi ne, %29, %c0_i32_25 : i32
    scf.if %30 {
      %c0_26 = arith.constant 0 : index
      %c0_27 = arith.constant 0 : index
      %31 = vector.load %arg16[%c0_26, %c0_27] : memref<128x128xf32, #tpu.memory_space<vmem>>, vector<128x128xf32>
      %c0_28 = arith.constant 0 : index
      %c0_29 = arith.constant 0 : index
      %32 = vector.load %arg13[%c0_28, %c0_29] : memref<128x32xf32, #tpu.memory_space<vmem>>, vector<128x32xf32>
      %cst_30 = arith.constant dense<0.000000e+00> : vector<128x32xf32>
      %33 = tpu.matmul %31, %32, %cst_30 {dimension_numbers = #tpu.dot_dimension_numbers<[1], [0], [0], [1], [0, 0, 1, 1], [], []>} : vector<128x128xf32>, vector<128x32xf32>, vector<128x32xf32> -> vector<128x32xf32>
      %c0_31 = arith.constant 0 : index
      %c0_32 = arith.constant 0 : index
      %34 = vector.load %arg17[%c0_31, %c0_32] : memref<128x32xf32, #tpu.memory_space<vmem>>, vector<128x32xf32>
      %35 = arith.addf %33, %34 : vector<128x32xf32>
      %c0_33 = arith.constant 0 : index
      %c0_34 = arith.constant 0 : index
      %c0_35 = arith.constant 0 : index
      %36 = vector.load %arg14[%c0_33, %c0_34, %c0_35] : memref<1x128x32xf32, #tpu.memory_space<vmem>>, vector<1x128x32xf32>
      %37 = vector.shape_cast %36 : vector<1x128x32xf32> to vector<128x32xf32>
      %38 = vector.shape_cast %35 : vector<128x32xf32> to vector<1x128x32xf32>
      tpu.vector_store %arg14[%c0_33, %c0_34, %c0_35], %38 {strides = array<i32>} : memref<1x128x32xf32, #tpu.memory_space<vmem>>, vector<1x128x32xf32>,
    } else {
    }
    return
  }
  func.func @transform_0(%arg0: i32, %arg1: i32) -> (i32, i32) {
    %c0_i32 = arith.constant 0 : i32
    %c0_i32_0 = arith.constant 0 : i32
    %c0_i32_1 = arith.constant 0 : i32
    return %c0_i32, %c0_i32_0 : i32, i32
  }
  func.func @transform_1(%arg0: i32, %arg1: i32) -> (i32, i32) {
    %c0_i32 = arith.constant 0 : i32
    %c0_i32_0 = arith.constant 0 : i32
    %c0_i32_1 = arith.constant 0 : i32
    return %c0_i32, %c0_i32_0 : i32, i32
  }
  func.func @transform_2(%arg0: i32, %arg1: i32) -> (i32, i32) {
    %c2_i32 = arith.constant 2 : i32
    %0 = arith.muli %arg0, %c2_i32 : i32
    %1 = arith.addi %0, %arg1 : i32
    %c0_i32 = arith.constant 0 : i32
    %c0_i32_0 = arith.constant 0 : i32
    return %1, %c0_i32 : i32, i32
  }
  func.func @transform_3(%arg0: i32, %arg1: i32) -> (i32, i32) {
    %c2_i32 = arith.constant 2 : i32
    %0 = arith.muli %arg0, %c2_i32 : i32
    %1 = arith.addi %0, %arg1 : i32
    %c0_i32 = arith.constant 0 : i32
    %c0_i32_0 = arith.constant 0 : i32
    return %1, %c0_i32 : i32, i32
  }
  func.func @transform_4(%arg0: i32, %arg1: i32) -> (i32, i32) {
    %c2_i32 = arith.constant 2 : i32
    %0 = arith.muli %arg0, %c2_i32 : i32
    %1 = arith.addi %0, %arg1 : i32
    %c0_i32 = arith.constant 0 : i32
    %c0_i32_0 = arith.constant 0 : i32
    return %1, %c0_i32 : i32, i32
  }
  func.func @transform_5(%arg0: i32, %arg1: i32) -> (i32, i32) {
    %c2_i32 = arith.constant 2 : i32
    %0 = arith.muli %arg0, %c2_i32 : i32
    %1 = arith.addi %0, %arg1 : i32
    %c0_i32 = arith.constant 0 : i32
    %c0_i32_0 = arith.constant 0 : i32
    return %1, %c0_i32 : i32, i32
  }
  func.func @transform_6(%arg0: i32, %arg1: i32) -> (i32, i32) {
    %c0_i32 = arith.constant 0 : i32
    %c0_i32_0 = arith.constant 0 : i32
    %c0_i32_1 = arith.constant 0 : i32
    return %c0_i32, %c0_i32_0 : i32, i32
  }
  func.func @transform_7(%arg0: i32, %arg1: i32) -> (i32, i32) {
    %c0_i32 = arith.constant 0 : i32
    %c0_i32_0 = arith.constant 0 : i32
    %c0_i32_1 = arith.constant 0 : i32
    return %c0_i32, %c0_i32_0 : i32, i32
  }
  func.func @transform_8(%arg0: i32, %arg1: i32) -> (i32, i32) {
    %c0_i32 = arith.constant 0 : i32
    %c0_i32_0 = arith.constant 0 : i32
    %c0_i32_1 = arith.constant 0 : i32
    return %c0_i32, %c0_i32_0 : i32, i32
  }
  func.func @transform_9(%arg0: i32, %arg1: i32) -> (i32, i32) {
    %c0_i32 = arith.constant 0 : i32
    %c0_i32_0 = arith.constant 0 : i32
    %c0_i32_1 = arith.constant 0 : i32
    return %c0_i32, %c0_i32_0 : i32, i32
  }
  func.func @transform_10(%arg0: i32, %arg1: i32) -> (i32, i32) {
    %c0_i32 = arith.constant 0 : i32
    %c0_i32_0 = arith.constant 0 : i32
    %c0_i32_1 = arith.constant 0 : i32
    return %c0_i32, %c0_i32_0 : i32, i32
  }
  func.func @transform_11(%arg0: i32, %arg1: i32) -> (i32, i32) {
    %c0_i32 = arith.constant 0 : i32
    %c0_i32_0 = arith.constant 0 : i32
    %c0_i32_1 = arith.constant 0 : i32
    return %c0_i32, %c0_i32_0 : i32, i32
  }
  func.func @transform_12(%arg0: i32, %arg1: i32) -> (i32, i32, i32) {
    %c0_i32 = arith.constant 0 : i32
    %c0_i32_0 = arith.constant 0 : i32
    %c0_i32_1 = arith.constant 0 : i32
    return %arg0, %c0_i32, %c0_i32_0 : i32, i32, i32
  }
}

</mosaic_0001>

<bundles_post_ra>
// kernel: tpu_custom_call.1
= control target key start
LH: loop header
LB: loop body
LE: loop exit
PB: predicated region body
PF: predicated region fallthrough
CT: control target
= control target key end

     0   :  { %s6233_s21 = smov 0   ;;  %s6235_s22 = smov 0   ;;  %s8090_s0 = inlined_call_operand.vmem [shape: f32[128,32], index: 0, kind: input, shape index: {}]   ;;  %s8091_s1 = inlined_call_operand.vmem [shape: f32[128,128], index: 1, kind: input, shape index: {}]   ;;  %s8092_s2 = inlined_call_operand.vmem [shape: f32[2048,8], index: 2, kind: input, shape index: {}]   ;;  %s8093_s3 = inlined_call_operand.vmem [shape: f32[2048,4], index: 3, kind: input, shape index: {}]   ;;  %s8094_s4 = inlined_call_operand.vmem [shape: bf16[2048,128], index: 4, kind: input, shape index: {}]   ;;  %s8095_s5 = inlined_call_operand.vmem [shape: bf16[2048,128], index: 5, kind: input, shape index: {}]   ;;  %s8096_s6 = inlined_call_operand.vmem [shape: f32[8,8], index: 6, kind: input, shape index: {}]   ;;  %s8097_s7 = inlined_call_operand.vmem [shape: f32[8,128], index: 7, kind: input, shape index: {}]   ;;  %s8098_s8 = inlined_call_operand.vmem [shape: f32[4,128], index: 8, kind: input, shape index: {}]   ;;  %s8099_s9 = inlined_call_operand.vmem [shape: f32[32,128], index: 9, kind: input, shape index: {}]   ;;  %s8100_s10 = inlined_call_operand.vmem [shape: f32[128,32], index: 10, kind: input, shape index: {}]   ;;  %s8101_s11 = inlined_call_operand.vmem [shape: f32[128,32], index: 11, kind: input, shape index: {}]   ;;  %s8102_s12 = inlined_call_operand.vmem [shape: f32[2,128,32], index: 12, kind: output, shape index: {}]  }
   0x1   :  { %8107 = sst [smem:[#allocation10_spill]] %s8101_s11  ;;  %s6237_s23 = smov 0  }
   0x2   :  { %s6239_s24 = smov 0   ;;  %s6241_s25 = smov 0  }
   0x3 LB: > { %8108 = sst [smem:[#allocation5_spill]] %s6154_s23  ;;  %s31_s26 = sadd.s32 1, %s6154_s23  ;;  %s6162_s25 = sphi %s6241_s25, %s22_s25   ;;  %s6158_s24 = sphi %s6239_s24, %s8118_s24   ;;  %s6154_s23 = sphi %s6237_s23, %s8117_s23   ;;  %s6150_s22 = sphi %s6235_s22, %s8116_s22   ;;  %s6146_s21 = sphi %s6233_s21, %s8115_s21  }
   0x4   : > { %8109 = sst [smem:[#allocation6_spill]] %s6158_s24  ;;  %s34_s27 = sadd.s32 1, %s6158_s24 }
   0x5   : > { %8110 = sst [smem:[#allocation7_spill]] %s6162_s25  ;;  %p32_p0 = scmp.ge.s32.totalorder %s31_s26, 2 }
   0x6   : > { %p4950_p1 = scmp.ge.s32.totalorder %s6162_s25, 1  ;;  %p440_p2 = scmp.lt.s32.totalorder %s6162_s25, 5 }
   0x7   : > { %s8120_s26 = smov (%p32_p0, %s31_s26), 0  ;;  %s8122_s27 = smov (!%p32_p0, %s34_s27), %s6158_s24 }
   0x8   : > { %8111 = sst [smem:[#allocation8_spill]] %s8120_s26  ;;  %p441_p3 = pnand %p4950_p1, %p440_p2 }
   0x9   : > { %p36_p4 = scmp.ge.s32.totalorder %s8122_s27, 2  ;;  %s4951_s28 = sshll.u32 (!%p441_p3), %s6150_s22, 1 }
   0xa   : > { %444 = sbr.rel (%p441_p3) target bundleno = 1495 (0x5d7), region = 68  ;;  %p545_p5 = scmp.lt.s32.totalorder (!%p441_p3), %s6150_s22, 1 }
   0xb   : > { %s8124_s27 = smov (%p36_p4, %s8122_s27), 0  ;;  %s506_s29 = sadd.s32 (!%p441_p3), %s6146_s21, %s4951_s28 }
   0xc   : > { %8112 = sst [smem:[#allocation9_spill]] %s8124_s27  ;;  %s4952_s30 = sshll.u32 (!%p441_p3), %s506_s29, 6 }
   0xd   : > { %p508_p6 = scmp.lt.s32.totalorder (!%p441_p3), %s4952_s30, 255  ;;  %p4965_p7 = scmp.ne.s32.totalorder (!%p441_p3), %s6146_s21, 0 }
   0xf   : > { %s546_s13 = scalar_select %p545_p5, %s6150_s22, 1 }
  0x10   : > { %s8126_s30 = smov (!%p508_p6, %s4952_s30), 255  ;;  %553 = sbr.rel (%p4965_p7) target bundleno = 237 (0xed), region = 72 }
  0x11   : > { %s5530_s14 = sshll.u32 %s546_s13, 7  ;;  %s4953_s15 = sshll.u32 %s8126_s30, 3 }
  0x12   : > { %s4959_s16 = sshll.u32 %s8126_s30, 2  ;;  %s6274_s19 = scalar_lea.vmem %s8092_s2, %s4953_s15 }
  0x13   : > { %s6279_s26 = scalar_lea.vmem %s8093_s3, %s4953_s15  ;;  %s6284_s28 = scalar_lea.vmem %s8094_s4, %s4959_s16 }
  0x14   : > { %s6289_s13 = scalar_lea.vmem %s8095_s5, %s4959_s16  ;;  %s6294_s17 = scalar_lea.vmem %s8102_s12, %s5530_s14 }
  0x15   : > { %v573_v0 = vld [vmem:[%s8099_s9 + $0x18] sm:$0xff]  ;;  %v572_v2 = vld [vmem:[%s8099_s9 + $0x10] sm:$0xff]  ;;  %v6164_v4 = vmov 0.0   ;;  %v571_v5 = vld [vmem:[%s8099_s9 + $0x8] sm:$0xff]  ;;  %vm574_vm0 = vcmask 261120   ;;  %p833_p8 = scmp.eq.s32.totalorder %s6150_s22, 0 }
  0x16   : > { %v767_v1 = vld [vmem:[%s8100_s10 + $0x78] sm:$0xff]  ;;  %635 = vmatpush.msra.mxu0 %v573_v0  ;;  %v766_v3 = vld [vmem:[%s8100_s10 + $0x70] sm:$0xff]  ;;  %720 = vst [vmem:[#allocation3] sm:$0xff] %v6164_v4  ;;  %v765_v6 = vld [vmem:[%s8100_s10 + $0x68] sm:$0xff]  ;;  %5650 = vmatpush.msra.mxu3 %v573_v0 }
  0x17   : > { %5654 = vmatpush.msra.mxu2 %v767_v1  ;;  %721 = vst [vmem:[#allocation3 + $0x18] sm:$0xff] %v6164_v4  ;;  %768 = vmatpush.msra.mxu1 %v767_v1  ;;  %v570_v7 = vld [vmem:[%s8099_s9] sm:$0xff]  ;;  %v763_v10 = vld [vmem:[%s8100_s10 + $0x58] sm:$0xff]  ;;  %v564_v11 = vld [vmem:[%s8090_s0 + $0x50] sm:$0xff]  ;;  %s834_s16 = scalar_select %p833_p8, 1, 0 }
  0x18   : > { %636 = vmatpush.msra.mxu0 %v572_v2  ;;  %722 = vst [vmem:[#allocation3 + $0x50] sm:$0xff] %v6164_v4  ;;  %v764_v8 = vld [vmem:[%s8100_s10 + $0x60] sm:$0xff]  ;;  %5651 = vmatpush.msra.mxu3 %v572_v2  ;;  %v762_v12 = vld [vmem:[%s8100_s10 + $0x50] sm:$0xff]  ;;  %v761_v13 = vld [vmem:[%s8100_s10 + $0x48] sm:$0xff] }
  0x19   : > { %5656 = vmatpush.msra.mxu2 %v766_v3  ;;  %723 = vst [vmem:[#allocation3 + $0x60] sm:$0xff] %v6164_v4  ;;  %769 = vmatpush.msra.mxu1 %v766_v3  ;;  %v554_v9 = vld [vmem:[%s8090_s0] sm:$0xff]  ;;  %v555_v15 = vld [vmem:[%s8090_s0 + $0x8] sm:$0xff]  ;;  %v759_v16 = vld [vmem:[%s8100_s10 + $0x38] sm:$0xff]  ;;  %s835_s20 = scvt.s32.f32 %s834_s16 }
  0x1a   : > { %637 = vmatpush.msra.mxu0 %v571_v5  ;;  %724 = vst [vmem:[#allocation3 + $0x68] sm:$0xff] %v6164_v4  ;;  %5652 = vmatpush.msra.mxu3 %v571_v5  ;;  %v760_v14 = vld [vmem:[%s8100_s10 + $0x40] sm:$0xff]  ;;  %v565_v17 = vld [vmem:[%s8090_s0 + $0x58] sm:$0xff]  ;;  %v758_v18 = vld [vmem:[%s8100_s10 + $0x30] sm:$0xff] }
  0x1b   : > { %5658 = vmatpush.msra.mxu2 %v765_v6  ;;  %725 = vst [vmem:[#allocation3 + $0x20] sm:$0xff] %v6164_v4  ;;  %770 = vmatpush.msra.mxu1 %v765_v6  ;;  %v757_v19 = vld [vmem:[%s8100_s10 + $0x28] sm:$0xff]  ;;  %v756_v20 = vld [vmem:[%s8100_s10 + $0x20] sm:$0xff]  ;;  %v556_v21 = vld [vmem:[%s8090_s0 + $0x10] sm:$0xff]  ;;  %v6470_v62 = vstv %s835_s20 }
  0x1c   : > { %638 = vmatpush.msra.mxu0 %v570_v7  ;;  %726 = vst [vmem:[#allocation3 + $0x70] sm:$0xff] %v6164_v4  ;;  %5653 = vmatpush.msra.mxu3 %v570_v7  ;;  %v755_v22 = vld [vmem:[%s8100_s10 + $0x18] sm:$0xff]  ;;  %v566_v23 = vld [vmem:[%s8090_s0 + $0x60] sm:$0xff]  ;;  %v754_v24 = vld [vmem:[%s8100_s10 + $0x10] sm:$0xff] }
  0x1d   : > { %5660 = vmatpush.msra.mxu2 %v764_v8  ;;  %727 = vst [vmem:[#allocation3 + $0x10] sm:$0xff] %v6164_v4  ;;  %4966 = vmatmul.msk.f32.vlgmr.msra.gmra.mxu0 %vm574_vm0, %v554_v9  ;;  %v753_v25 = vld [vmem:[%s8100_s10 + $0x8] sm:$0xff]  ;;  %v752_v26 = vld [vmem:[%s8100_s10] sm:$0xff]  ;;  %v557_v27 = vld [vmem:[%s8090_s0 + $0x18] sm:$0xff] }
  0x1e   : > { %771 = vmatpush.msra.mxu1 %v764_v8  ;;  %728 = vst [vmem:[#allocation3 + $0x28] sm:$0xff] %v6164_v4  ;;  %4976 = vmatmul.msk.f32.vlgmr.msra.gmra.mxu3 %vm574_vm0, %v564_v11  ;;  %v743_v28 = vld [vmem:[%s8091_s1 + $0x38] sm:$0xff]  ;;  %v736_v29 = vld [vmem:[%s8091_s1] sm:$0xff]  ;;  %v567_v30 = vld [vmem:[%s8090_s0 + $0x68] sm:$0xff] }
  0x1f   : > { %5662 = vmatpush.msra.mxu2 %v763_v10  ;;  %729 = vst [vmem:[#allocation3 + $0x40] sm:$0xff] %v6164_v4  ;;  %5655 = vmatpush.msrb.mxu3 %v767_v1  ;;  %v558_v31 = vld [vmem:[%s8090_s0 + $0x20] sm:$0xff]  ;;  %v737_v33 = vld [vmem:[%s8091_s1 + $0x8] sm:$0xff]  ;;  %v568_v34 = vld [vmem:[%s8090_s0 + $0x70] sm:$0xff] }
  0x20   : > { %772 = vmatpush.msra.mxu1 %v763_v10  ;;  %730 = vst [vmem:[#allocation3 + $0x38] sm:$0xff] %v6164_v4  ;;  %v744_v32 = vld [vmem:[%s8091_s1 + $0x40] sm:$0xff]  ;;  %v559_v35 = vld [vmem:[%s8090_s0 + $0x28] sm:$0xff]  ;;  %v738_v37 = vld [vmem:[%s8091_s1 + $0x10] sm:$0xff] }
  0x21   : > { %5664 = vmatpush.msra.mxu2 %v762_v12  ;;  %731 = vst [vmem:[#allocation3 + $0x8] sm:$0xff] %v6164_v4  ;;  %5657 = vmatpush.msrb.mxu3 %v766_v3  ;;  %v745_v36 = vld [vmem:[%s8091_s1 + $0x48] sm:$0xff]  ;;  %v569_v38 = vld [vmem:[%s8090_s0 + $0x78] sm:$0xff]  ;;  %v560_v39 = vld [vmem:[%s8090_s0 + $0x30] sm:$0xff] }
  0x22   : > { %773 = vmatpush.msra.mxu1 %v762_v12  ;;  %732 = vst [vmem:[#allocation3 + $0x58] sm:$0xff] %v6164_v4  ;;  %v746_v40 = vld [vmem:[%s8091_s1 + $0x50] sm:$0xff]  ;;  %v739_v41 = vld [vmem:[%s8091_s1 + $0x18] sm:$0xff]  ;;  %v740_v45 = vld [vmem:[%s8091_s1 + $0x20] sm:$0xff] }
  0x23   : > { %5666 = vmatpush.msra.mxu2 %v761_v13  ;;  %733 = vst [vmem:[#allocation3 + $0x48] sm:$0xff] %v6164_v4  ;;  %5659 = vmatpush.msrb.mxu3 %v765_v6  ;;  %v750_v42 = vld [vmem:[%s8091_s1 + $0x70] sm:$0xff]  ;;  %v561_v43 = vld [vmem:[%s8090_s0 + $0x38] sm:$0xff]  ;;  %v562_v47 = vld [vmem:[%s8090_s0 + $0x40] sm:$0xff] }
  0x24   : > { %774 = vmatpush.msra.mxu1 %v761_v13  ;;  %734 = vst [vmem:[#allocation3 + $0x78] sm:$0xff] %v6164_v4  ;;  %v747_v44 = vld [vmem:[%s8091_s1 + $0x58] sm:$0xff]  ;;  %v748_v48 = vld [vmem:[%s8091_s1 + $0x60] sm:$0xff]  ;;  %v741_v49 = vld [vmem:[%s8091_s1 + $0x28] sm:$0xff] }
  0x25   : > { %5668 = vmatpush.msra.mxu2 %v760_v14  ;;  %735 = vst [vmem:[#allocation3 + $0x30] sm:$0xff] %v6164_v4  ;;  %4967 = vmatmul.msk.f32.gmra.mxu0 %vm574_vm0, %v555_v15  ;;  %v751_v46 = vld [vmem:[%s8091_s1 + $0x78] sm:$0xff]  ;;  %v563_v50 = vld [vmem:[%s8090_s0 + $0x48] sm:$0xff]  ;;  %v742_v52 = vld [vmem:[%s8091_s1 + $0x30] sm:$0xff] }
  0x26   : > { %775 = vmatpush.msra.mxu1 %v760_v14  ;;  %5661 = vmatpush.msrb.mxu3 %v764_v8  ;;  %v749_v51 = vld [vmem:[%s8091_s1 + $0x68] sm:$0xff] }
  0x27   : > { %5670 = vmatpush.msra.mxu2 %v759_v16  ;;  %4977 = vmatmul.msk.f32.gmra.mxu3 %vm574_vm0, %v565_v17 }
  0x28   : > { %776 = vmatpush.msra.mxu1 %v759_v16  ;;  %5663 = vmatpush.msrb.mxu3 %v763_v10 }
  0x29   : > { %5672 = vmatpush.msra.mxu2 %v758_v18 }
  0x2a   : > { %777 = vmatpush.msra.mxu1 %v758_v18  ;;  %5665 = vmatpush.msrb.mxu3 %v762_v12 }
  0x2b   : > { %5674 = vmatpush.msra.mxu2 %v757_v19 }
  0x2c   : > { %778 = vmatpush.msra.mxu1 %v757_v19  ;;  %5667 = vmatpush.msrb.mxu3 %v761_v13 }
  0x2d   : > { %5676 = vmatpush.msra.mxu2 %v756_v20  ;;  %4968 = vmatmul.msk.f32.gmra.mxu0 %vm574_vm0, %v556_v21 }
  0x2e   : > { %779 = vmatpush.msra.mxu1 %v756_v20  ;;  %5669 = vmatpush.msrb.mxu3 %v760_v14 }
  0x2f   : > { %5678 = vmatpush.msra.mxu2 %v755_v22  ;;  %4978 = vmatmul.msk.f32.gmra.mxu3 %vm574_vm0, %v566_v23 }
  0x30   : > { %780 = vmatpush.msra.mxu1 %v755_v22  ;;  %5671 = vmatpush.msrb.mxu3 %v759_v16 }
  0x31   : > { %5680 = vmatpush.msra.mxu2 %v754_v24 }
  0x32   : > { %781 = vmatpush.msra.mxu1 %v754_v24  ;;  %5673 = vmatpush.msrb.mxu3 %v758_v18 }
  0x33   : > { %5682 = vmatpush.msra.mxu2 %v753_v25 }
  0x34   : > { %782 = vmatpush.msra.mxu1 %v753_v25  ;;  %5675 = vmatpush.msrb.mxu3 %v757_v19 }
  0x35   : > { %5684 = vmatpush.msra.mxu2 %v752_v26  ;;  %4969 = vmatmul.msk.f32.gmra.mxu0 %vm574_vm0, %v557_v27 }
  0x36   : > { %805 = vmatmul.f32.vlgmr.msra.gmra.mxu2 %v743_v28  ;;  %783 = vmatpush.msra.mxu1 %v752_v26 }
  0x37   : > { %5677 = vmatpush.msrb.mxu3 %v756_v20  ;;  %784 = vmatmul.f32.vlgmr.msra.gmra.mxu1 %v736_v29 }
  0x38   : > { %4979 = vmatmul.msk.f32.gmra.mxu3 %vm574_vm0, %v567_v30 }
  0x39   : > { %5679 = vmatpush.msrb.mxu3 %v755_v22 }
  0x3b   : > { %5681 = vmatpush.msrb.mxu3 %v754_v24 }
  0x3d   : > { %5683 = vmatpush.msrb.mxu3 %v753_v25  ;;  %4970 = vmatmul.msk.f32.gmra.mxu0 %vm574_vm0, %v558_v31 }
  0x3e   : > { %808 = vmatmul.f32.gmra.mxu2 %v744_v32 }
  0x3f   : > { %5685 = vmatpush.msrb.mxu3 %v752_v26  ;;  %787 = vmatmul.f32.gmra.mxu1 %v737_v33 }
  0x40   : > { %4980 = vmatmul.msk.f32.gmra.mxu3 %vm574_vm0, %v568_v34 }
  0x45   : > { %4971 = vmatmul.msk.f32.gmra.mxu0 %vm574_vm0, %v559_v35 }
  0x46   : > { %811 = vmatmul.f32.gmra.mxu2 %v745_v36 }
  0x47   : > { %790 = vmatmul.f32.gmra.mxu1 %v738_v37 }
  0x48   : > { %4981 = vmatmul.msk.f32.gmra.mxu3 %vm574_vm0, %v569_v38 }
  0x4d   : > { %4972 = vmatmul.msk.f32.gmra.mxu0 %vm574_vm0, %v560_v39 }
  0x4e   : > { %814 = vmatmul.f32.gmra.mxu2 %v746_v40 }
  0x4f   : > { %793 = vmatmul.f32.gmra.mxu1 %v739_v41 }
  0x50   : > { %826 = vmatmul.f32.vlgmr.msrb.gmra.mxu3 %v750_v42 }
  0x55   : > { %4973 = vmatmul.msk.f32.gmra.mxu0 %vm574_vm0, %v561_v43 }
  0x56   : > { %817 = vmatmul.f32.gmra.mxu2 %v747_v44 }
  0x57   : > { %796 = vmatmul.f32.gmra.mxu1 %v740_v45 }
  0x58   : > { %829 = vmatmul.f32.gmra.mxu3 %v751_v46 }
  0x5d   : > { %4974 = vmatmul.msk.f32.gmra.mxu0 %vm574_vm0, %v562_v47 }
  0x5e   : > { %820 = vmatmul.f32.gmra.mxu2 %v748_v48 }
  0x5f   : > { %799 = vmatmul.f32.gmra.mxu1 %v741_v49 }
  0x65   : > { %4975 = vmatmul.msk.f32.gmra.mxu0 %vm574_vm0, %v563_v50 }
  0x66   : > { %823 = vmatmul.f32.gmra.mxu2 %v749_v51 }
  0x67   : > { %802 = vmatmul.f32.gmra.mxu1 %v742_v52 }
  0x9a   : > { %v640_v53 = vpop.f32.mrf.mxu0 }
  0xa1   : > { %v670_v55 = vpop.f32.mrf.mxu3 }
  0xa2   : > { %v643_v54 = vpop.f32.mrf.mxu0 }
  0xa3   : > { %v5606_v56 = vpack.c.bf16 %v643_v54, %v640_v53 }
  0xa5   : > { %5607 = vst [vmem:[#allocation2 + $0x30] sm:$0xff] %v5606_v56  }
  0xaa   : > { %v646_v57 = vpop.f32.mrf.mxu0  ;;  %v673_v58 = vpop.f32.mrf.mxu3 }
  0xab   : > { %v5631_v59 = vpack.c.bf16 %v673_v58, %v670_v55 }
  0xad   : > { %5647 = vst [vmem:[#allocation2 + $0x20] sm:$0xff] %v5631_v59  }
  0xb2   : > { %v649_v60 = vpop.f32.mrf.mxu0  ;;  %v676_v61 = vpop.f32.mrf.mxu3 }
  0xb3   : > { %v5611_v63 = vpack.c.bf16 %v649_v60, %v646_v57 }
  0xb4   : > { %v785_v0 = vpop.f32.mrf.mxu1 }
  0xb5   : > { %5643 = vst [vmem:[#allocation2] sm:$0xff] %v5611_v63   ;;  %v837_v1 = vmul.f32 %v6470_v62, %v785_v0 }
  0xb7   : > { %853 = vst.msk [vmem:[#allocation4] sm:$0xff] %vm574_vm0, %v837_v1 }
  0xb9   : > { %v806_v2 = vpop.f32.mrf.mxu2 }
  0xba   : > { %v844_v3 = vmul.f32 %v6470_v62, %v806_v2  ;;  %v652_v4 = vpop.f32.mrf.mxu0 }
  0xbb   : > { %v679_v5 = vpop.f32.mrf.mxu3 }
  0xbc   : > { %860 = vst.msk [vmem:[#allocation4 + $0x38] sm:$0xff] %vm574_vm0, %v844_v3  ;;  %v5636_v6 = vpack.c.bf16 %v679_v5, %v676_v61  ;;  %v788_v7 = vpop.f32.mrf.mxu1 }
  0xbd   : > { %v838_v8 = vmul.f32 %v6470_v62, %v788_v7 }
  0xbe   : > { %5648 = vst [vmem:[#allocation2 + $0x28] sm:$0xff] %v5636_v6  }
  0xbf   : > { %854 = vst.msk [vmem:[#allocation4 + $0x8] sm:$0xff] %vm574_vm0, %v838_v8 }
  0xc1   : > { %v809_v9 = vpop.f32.mrf.mxu2 }
  0xc2   : > { %v845_v10 = vmul.f32 %v6470_v62, %v809_v9  ;;  %v655_v11 = vpop.f32.mrf.mxu0 }
  0xc3   : > { %v682_v12 = vpop.f32.mrf.mxu3  ;;  %v5616_v13 = vpack.c.bf16 %v655_v11, %v652_v4 }
  0xc4   : > { %861 = vst.msk [vmem:[#allocation4 + $0x40] sm:$0xff] %vm574_vm0, %v845_v10  ;;  %v791_v14 = vpop.f32.mrf.mxu1 }
  0xc5   : > { %5644 = vst [vmem:[#allocation2 + $0x18] sm:$0xff] %v5616_v13   ;;  %v839_v15 = vmul.f32 %v6470_v62, %v791_v14 }
  0xc7   : > { %855 = vst.msk [vmem:[#allocation4 + $0x10] sm:$0xff] %vm574_vm0, %v839_v15 }
  0xc9   : > { %v812_v16 = vpop.f32.mrf.mxu2 }
  0xca   : > { %v846_v17 = vmul.f32 %v6470_v62, %v812_v16  ;;  %v658_v18 = vpop.f32.mrf.mxu0 }
  0xcb   : > { %v685_v19 = vpop.f32.mrf.mxu3 }
  0xcc   : > { %862 = vst.msk [vmem:[#allocation4 + $0x48] sm:$0xff] %vm574_vm0, %v846_v17  ;;  %v5641_v20 = vpack.c.bf16 %v685_v19, %v682_v12  ;;  %v794_v21 = vpop.f32.mrf.mxu1 }
  0xcd   : > { %v840_v22 = vmul.f32 %v6470_v62, %v794_v21 }
  0xce   : > { %5649 = vst [vmem:[#allocation2 + $0x38] sm:$0xff] %v5641_v20  }
  0xcf   : > { %856 = vst.msk [vmem:[#allocation4 + $0x18] sm:$0xff] %vm574_vm0, %v840_v22 }
  0xd1   : > { %v815_v23 = vpop.f32.mrf.mxu2 }
  0xd2   : > { %v847_v24 = vmul.f32 %v6470_v62, %v815_v23  ;;  %v661_v25 = vpop.f32.mrf.mxu0 }
  0xd3   : > { %v827_v26 = vpop.f32.mrf.mxu3  ;;  %v5621_v27 = vpack.c.bf16 %v661_v25, %v658_v18 }
  0xd4   : > { %863 = vst.msk [vmem:[#allocation4 + $0x50] sm:$0xff] %vm574_vm0, %v847_v24  ;;  %v851_v28 = vmul.f32 %v6470_v62, %v827_v26  ;;  %v797_v29 = vpop.f32.mrf.mxu1 }
  0xd5   : > { %5645 = vst [vmem:[#allocation2 + $0x10] sm:$0xff] %v5621_v27   ;;  %v841_v30 = vmul.f32 %v6470_v62, %v797_v29 }
  0xd6   : > { %867 = vst.msk [vmem:[#allocation4 + $0x70] sm:$0xff] %vm574_vm0, %v851_v28 }
  0xd7   : > { %857 = vst.msk [vmem:[#allocation4 + $0x20] sm:$0xff] %vm574_vm0, %v841_v30 }
  0xd9   : > { %v818_v31 = vpop.f32.mrf.mxu2 }
  0xda   : > { %v848_v32 = vmul.f32 %v6470_v62, %v818_v31  ;;  %v664_v33 = vpop.f32.mrf.mxu0 }
  0xdb   : > { %v830_v34 = vpop.f32.mrf.mxu3 }
  0xdc   : > { %864 = vst.msk [vmem:[#allocation4 + $0x58] sm:$0xff] %vm574_vm0, %v848_v32  ;;  %v852_v35 = vmul.f32 %v6470_v62, %v830_v34  ;;  %v800_v36 = vpop.f32.mrf.mxu1 }
  0xdd   : > { %v842_v37 = vmul.f32 %v6470_v62, %v800_v36 }
  0xde   : > { %868 = vst.msk [vmem:[#allocation4 + $0x78] sm:$0xff] %vm574_vm0, %v852_v35 }
  0xdf   : > { %858 = vst.msk [vmem:[#allocation4 + $0x28] sm:$0xff] %vm574_vm0, %v842_v37 }
  0xe1   : > { %v821_v38 = vpop.f32.mrf.mxu2 }
  0xe2   : > { %v849_v39 = vmul.f32 %v6470_v62, %v821_v38  ;;  %v667_v40 = vpop.f32.mrf.mxu0 }
  0xe3   : > { %v5626_v41 = vpack.c.bf16 %v667_v40, %v664_v33 }
  0xe4   : > { %865 = vst.msk [vmem:[#allocation4 + $0x60] sm:$0xff] %vm574_vm0, %v849_v39  ;;  %v803_v42 = vpop.f32.mrf.mxu1 }
  0xe5   : > { %5646 = vst [vmem:[#allocation2 + $0x8] sm:$0xff] %v5626_v41   ;;  %v843_v43 = vmul.f32 %v6470_v62, %v803_v42 }
  0xe7   : > { %859 = vst.msk [vmem:[#allocation4 + $0x30] sm:$0xff] %vm574_vm0, %v843_v43 }
  0xe9   : > { %v824_v44 = vpop.f32.mrf.mxu2 }
  0xea   : > { %v850_v45 = vmul.f32 %v6470_v62, %v824_v44 }
  0xec   : > { %866 = vst.msk [vmem:[#allocation4 + $0x68] sm:$0xff] %vm574_vm0, %v850_v45 }
  0xed PF: > { %v933_v46 = vld [vmem:[%s8096_s6] sm:$0xff]  ;;  %vm934_vm1 = vcmask 64512   ;;  %v870_v48 = vld [vmem:[%s6274_s19 + $0x8] sm:$0xff]  ;;  %v871_v49 = vld [vmem:[%s6274_s19 + $0x10] sm:$0xff]  ;;  %vm3276_vm2 = vcmask 1043456   ;;  %vm3083_vm3 = vcmask 31744  }
  0xee   : > { %v869_v47 = vld [vmem:[%s6274_s19] sm:$0xff]  ;;  %1142 = vmatpush.msra.mxu0 %v933_v46  ;;  %5686 = vmatpush.msra.mxu1 %v933_v46  ;;  %v872_v50 = vld [vmem:[%s6274_s19 + $0x18] sm:$0xff]  ;;  %v874_v52 = vld [vmem:[%s6274_s19 + $0x28] sm:$0xff]  ;;  %p5527_p9 = scmp.ne.s32.totalorder %s6146_s21, 1 }
  0xef   : > { %4982 = vmatmul.msk.f32.vlgmr.msra.gmra.mxu0 %vm934_vm1, %v869_v47  ;;  %v873_v51 = vld [vmem:[%s6274_s19 + $0x20] sm:$0xff]  ;;  %v875_v53 = vld [vmem:[%s6274_s19 + $0x30] sm:$0xff]  ;;  %v876_v54 = vld [vmem:[%s6274_s19 + $0x38] sm:$0xff] }
  0xf0   : > { %v877_v55 = vld [vmem:[%s6274_s19 + $0x40] sm:$0xff]  ;;  %v878_v56 = vld [vmem:[%s6274_s19 + $0x48] sm:$0xff]  ;;  %v5570_v57 = vld [vmem:[#allocation2 + $0x38] sm:$0xff] }
  0xf1   : > { %3809 = vmatpush.bf16.msra.mxu3 %v5570_v57  ;;  %v879_v58 = vld [vmem:[%s6274_s19 + $0x50] sm:$0xff]  ;;  %v5569_v59 = vld [vmem:[#allocation2 + $0x28] sm:$0xff]  ;;  %v5568_v60 = vld [vmem:[#allocation2 + $0x20] sm:$0xff] }
  0xf2   : > { %v880_v61 = vld [vmem:[%s6274_s19 + $0x58] sm:$0xff]  ;;  %v5567_v63 = vld [vmem:[#allocation2 + $0x8] sm:$0xff]  ;;  %v881_v0 = vld [vmem:[%s6274_s19 + $0x60] sm:$0xff] }
  0xf3   : > { %v932_v62 = vld [vmem:[%s6274_s19 + $0x1f8] sm:$0xff]  ;;  %v5566_v1 = vld [vmem:[#allocation2 + $0x10] sm:$0xff]  ;;  %v882_v3 = vld [vmem:[%s6274_s19 + $0x68] sm:$0xff] }
  0xf4   : > { %5045 = vmatmul.msk.f32.vlgmr.msra.gmra.mxu1 %vm934_vm1, %v932_v62  ;;  %v5565_v2 = vld [vmem:[#allocation2 + $0x18] sm:$0xff]  ;;  %v5564_v4 = vld [vmem:[#allocation2] sm:$0xff]  ;;  %v5563_v5 = vld [vmem:[#allocation2 + $0x30] sm:$0xff] }
  0xf5   : > { %3810 = vmatpush.bf16.msra.mxu3 %v5569_v59  ;;  %v883_v6 = vld [vmem:[%s6274_s19 + $0x70] sm:$0xff]  ;;  %v5531_v7 = vld [vmem:[%s6284_s28] sm:$0xff]  ;;  %v884_v8 = vld [vmem:[%s6274_s19 + $0x78] sm:$0xff] }
  0xf6   : > { %v3082_v9 = vld [vmem:[%s8098_s8] sm:$0xf]  ;;  %v5532_v14 = vld [vmem:[%s6284_s28 + $0x8] sm:$0xff]  ;;  %v3020_v22 = vld [vmem:[%s6279_s26 + $0x10] sm:$0xff] }
  0xf7   : > { %4983 = vmatmul.msk.f32.gmra.mxu0 %vm934_vm1, %v870_v48  ;;  %5174 = vmatpush.msk.msra.mxu2 %vm3276_vm2, %v3082_v9  ;;  %v3018_v10 = vld [vmem:[%s6279_s26] sm:$0xff]  ;;  %v3019_v16 = vld [vmem:[%s6279_s26 + $0x8] sm:$0xff]  ;;  %v887_v24 = vld [vmem:[%s6274_s19 + $0x90] sm:$0xff] }
  0xf8   : > { %5175 = vmatmul.msk.f32.vlgmr.msra.gmra.mxu2 %vm3083_vm3, %v3018_v10  ;;  %v2616_v11 = vld [vmem:[%s8097_s7] sm:$0xff]  ;;  %v886_v18 = vld [vmem:[%s6274_s19 + $0x88] sm:$0xff]  ;;  %v5533_v25 = vld [vmem:[%s6284_s28 + $0x10] sm:$0xff] }
  0xf9   : > { %3811 = vmatpush.bf16.msra.mxu3 %v5568_v60  ;;  %2824 = vmatpush.msra.mxu1 %v2616_v11  ;;  %v885_v13 = vld [vmem:[%s6274_s19 + $0x80] sm:$0xff]  ;;  %v3021_v31 = vld [vmem:[%s6279_s26 + $0x18] sm:$0xff] }
  0xfa   : > { %v888_v37 = vld [vmem:[%s6274_s19 + $0x98] sm:$0xff]  ;;  %v3022_v46 = vld [vmem:[%s6279_s26 + $0x20] sm:$0xff] }
  0xfd   : > { %3812 = vmatpush.bf16.msra.mxu3 %v5567_v63 }
  0xff   : > { %4984 = vmatmul.msk.f32.gmra.mxu0 %vm934_vm1, %v871_v49 }
 0x100   : > { %5176 = vmatmul.msk.f32.gmra.mxu2 %vm3083_vm3, %v3019_v16 }
 0x101   : > { %3813 = vmatpush.bf16.msra.mxu3 %v5566_v1 }
 0x105   : > { %3814 = vmatpush.bf16.msra.mxu3 %v5565_v2 }
 0x107   : > { %4985 = vmatmul.msk.f32.gmra.mxu0 %vm934_vm1, %v872_v50 }
 0x108   : > { %5177 = vmatmul.msk.f32.gmra.mxu2 %vm3083_vm3, %v3020_v22 }
 0x109   : > { %3815 = vmatpush.bf16.msra.mxu3 %v5564_v4 }
 0x10d   : > { %3816 = vmatpush.bf16.msra.mxu3 %v5563_v5 }
 0x10f   : > { %4986 = vmatmul.msk.f32.gmra.mxu0 %vm934_vm1, %v873_v51 }
 0x110   : > { %3817 = vmatmul.bf16.vlgmr.msra.gmra.mxu3 %v5531_v7  ;;  %5178 = vmatmul.msk.f32.gmra.mxu2 %vm3083_vm3, %v3021_v31 }
 0x117   : > { %4987 = vmatmul.msk.f32.gmra.mxu0 %vm934_vm1, %v874_v52 }
 0x118   : > { %5179 = vmatmul.msk.f32.gmra.mxu2 %vm3083_vm3, %v3022_v46 }
 0x11f   : > { %4988 = vmatmul.msk.f32.gmra.mxu0 %vm934_vm1, %v875_v53 }
 0x120   : > { %3822 = vmatmul.bf16.gmra.mxu3 %v5532_v14 }
 0x127   : > { %4989 = vmatmul.msk.f32.gmra.mxu0 %vm934_vm1, %v876_v54  ;;  %v889_v54 = vld [vmem:[%s6274_s19 + $0xa0] sm:$0xff] }
 0x12f   : > { %4990 = vmatmul.msk.f32.gmra.mxu0 %vm934_vm1, %v877_v55  ;;  %v5534_v55 = vld [vmem:[%s6284_s28 + $0x18] sm:$0xff] }
 0x130   : > { %3827 = vmatmul.bf16.gmra.mxu3 %v5533_v25 }
 0x137   : > { %4991 = vmatmul.msk.f32.gmra.mxu0 %vm934_vm1, %v878_v56 }
 0x13f   : > { %4992 = vmatmul.msk.f32.gmra.mxu0 %vm934_vm1, %v879_v58 }
 0x140   : > { %3832 = vmatmul.bf16.gmra.mxu3 %v5534_v55 }
 0x147   : > { %4993 = vmatmul.msk.f32.gmra.mxu0 %vm934_vm1, %v880_v61 }
 0x14f   : > { %4994 = vmatmul.msk.f32.gmra.mxu0 %vm934_vm1, %v881_v0  ;;  %v3023_v0 = vld [vmem:[%s6279_s26 + $0x28] sm:$0xff] }
 0x150   : > { %5180 = vmatmul.msk.f32.gmra.mxu2 %vm3083_vm3, %v3023_v0 }
 0x157   : > { %4995 = vmatmul.msk.f32.gmra.mxu0 %vm934_vm1, %v882_v3 }
 0x15f   : > { %4996 = vmatmul.msk.f32.gmra.mxu0 %vm934_vm1, %v883_v6 }
 0x167   : > { %4997 = vmatmul.msk.f32.gmra.mxu0 %vm934_vm1, %v884_v8  ;;  %v890_v8 = vld [vmem:[%s6274_s19 + $0xa8] sm:$0xff] }
 0x16c   : > { %v1144_v12 = vpop.f32.mrf.mxu0 }
 0x16d   : > { %v5046_v15 = vmul.f32 -1.442695, %v1144_v12 }
 0x16f   : > { %5868 = vpow2.f32 %v5046_v15  ;;  %4998 = vmatmul.msk.f32.gmra.mxu0 %vm934_vm1, %v885_v13 }
 0x174   : > { %v6555_v17 = vpop.f32.mrf.mxu0 }
 0x175   : > { %v5869_v19 = vpop.eup %5868  ;;  %v5047_v20 = vmul.f32 -1.442695, %v6555_v17 }
 0x176   : > { %v1528_v21 = vadd.f32 1.0, %v5869_v19 }
 0x177   : > { %5870 = vpow2.f32 %v5047_v20  ;;  %4999 = vmatmul.msk.f32.gmra.mxu0 %vm934_vm1, %v886_v18 }
 0x178   : > { %5872 = vrcp.f32 %v1528_v21  ;;  %v1603_v33 = vand.u32 2147483648, %v1528_v21  ;;  %v1601_v35 = vand.u32 2147483647, %v1528_v21  ;;  %vm1597_vm5 = vweird.f32 %v1528_v21 }
 0x17a   : > { %v1604_v42 = vor.u32 1.1754944e-38, %v1603_v33  ;;  %vm1602_vm7 = vcmp.eq.f32.partialorder %v1601_v35, 8.507059e+37  ;;  %v3025_v35 = vld [vmem:[%s6279_s26 + $0x38] sm:$0xff] }
 0x17c   : > { %v6562_v23 = vpop.f32.mrf.mxu0 }
 0x17d   : > { %v5871_v26 = vpop.eup %5870  ;;  %v5048_v27 = vmul.f32 -1.442695, %v6562_v23 }
 0x17e   : > { %v5873_v28 = vpop.eup %5872  ;;  %v1529_v29 = vadd.f32 1.0, %v5871_v26  ;;  %v891_v26 = vld [vmem:[%s6274_s19 + $0xb0] sm:$0xff] }
 0x17f   : > { %v1593_v30 = vmul.f32 %v5873_v28, %v1528_v21  ;;  %5874 = vpow2.f32 %v5048_v27  ;;  %5000 = vmatmul.msk.f32.gmra.mxu0 %vm934_vm1, %v887_v24  ;;  %vm1598_vm4 = vweird.f32 %v5873_v28  ;;  %v5535_v27 = vld [vmem:[%s6284_s28 + $0x20] sm:$0xff] }
 0x180   : > { %5876 = vrcp.f32 %v1529_v29  ;;  %vm1599_vm6 = vmor %vm1597_vm5, %vm1598_vm4  ;;  %v1618_v50 = vand.u32 2147483648, %v1529_v29  ;;  %v1616_v52 = vand.u32 2147483647, %v1529_v29  ;;  %vm1612_vm9 = vweird.f32 %v1529_v29  ;;  %3837 = vmatmul.bf16.gmra.mxu3 %v5535_v27 }
 0x181   : > { %v1594_v32 = vsub.f32 1.0, %v1593_v30 }
 0x182   : > { %v1619_v60 = vor.u32 1.1754944e-38, %v1618_v50  ;;  %vm1617_vm11 = vcmp.eq.f32.partialorder %v1616_v52, 8.507059e+37  ;;  %v3026_v52 = vld [vmem:[%s6279_s26 + $0x40] sm:$0xff] }
 0x183   : > { %v1595_v34 = vmul.f32 %v5873_v28, %v1594_v32 }
 0x184   : > { %v6570_v36 = vpop.f32.mrf.mxu0 }
 0x185   : > { %v5875_v38 = vpop.eup %5874  ;;  %v1596_v39 = vadd.f32 %v5873_v28, %v1595_v34  ;;  %v5049_v40 = vmul.f32 -1.442695, %v6570_v36 }
 0x186   : > { %v5877_v41 = vpop.eup %5876  ;;  %v1530_v43 = vadd.f32 1.0, %v5875_v38 }
 0x187   : > { %v1600_v44 = vsel %vm1599_vm6, %v5873_v28, %v1596_v39  ;;  %v1608_v45 = vmul.f32 %v5877_v41, %v1529_v29  ;;  %5878 = vpow2.f32 %v5049_v40  ;;  %5001 = vmatmul.msk.f32.gmra.mxu0 %vm934_vm1, %v888_v37  ;;  %vm1613_vm8 = vweird.f32 %v5877_v41 }
 0x188   : > { %v1605_v47 = vsel %vm1602_vm7, %v1604_v42, %v1600_v44  ;;  %5880 = vrcp.f32 %v1530_v43  ;;  %vm1614_vm10 = vmor %vm1612_vm9, %vm1613_vm8  ;;  %v1633_v4 = vand.u32 2147483648, %v1530_v43  ;;  %v1631_v6 = vand.u32 2147483647, %v1530_v43  ;;  %v892_v44 = vld [vmem:[%s6274_s19 + $0xb8] sm:$0xff] }
 0x189   : > { %v2552_v48 = vmul.f32 %v1605_v47, %v1144_v12  ;;  %v1609_v49 = vsub.f32 1.0, %v1608_v45  ;;  %vm1627_vm13 = vweird.f32 %v1530_v43 }
 0x18a   : > { %v1634_v13 = vor.u32 1.1754944e-38, %v1633_v4  ;;  %vm1632_vm15 = vcmp.eq.f32.partialorder %v1631_v6, 8.507059e+37  ;;  %v3027_v6 = vld [vmem:[%s6279_s26 + $0x48] sm:$0xff] }
 0x18b   : > { %v1610_v51 = vmul.f32 %v5877_v41, %v1609_v49  ;;  %5110 = vmatmul.msk.f32.vlgmr.msra.gmra.mxu1 %vm934_vm1, %v2552_v48 }
 0x18c   : > { %v6578_v53 = vpop.f32.mrf.mxu0 }
 0x18d   : > { %v5879_v56 = vpop.eup %5878  ;;  %v1611_v57 = vadd.f32 %v5877_v41, %v1610_v51  ;;  %v5050_v58 = vmul.f32 -1.442695, %v6578_v53 }
 0x18e   : > { %v5881_v59 = vpop.eup %5880  ;;  %v1531_v61 = vadd.f32 1.0, %v5879_v56 }
 0x18f   : > { %v1615_v62 = vsel %vm1614_vm10, %v5877_v41, %v1611_v57  ;;  %v1623_v63 = vmul.f32 %v5881_v59, %v1530_v43  ;;  %5882 = vpow2.f32 %v5050_v58  ;;  %5002 = vmatmul.msk.f32.gmra.mxu0 %vm934_vm1, %v889_v54  ;;  %vm1628_vm12 = vweird.f32 %v5881_v59 }
 0x190   : > { %v1620_v1 = vsel %vm1617_vm11, %v1619_v60, %v1615_v62  ;;  %5884 = vrcp.f32 %v1531_v61  ;;  %vm1629_vm14 = vmor %vm1627_vm13, %vm1628_vm12  ;;  %v1648_v21 = vand.u32 2147483648, %v1531_v61  ;;  %v1646_v24 = vand.u32 2147483647, %v1531_v61  ;;  %v5536_v62 = vld [vmem:[%s6284_s28 + $0x28] sm:$0xff] }
 0x191   : > { %v2553_v2 = vmul.f32 %v1620_v1, %v6555_v17  ;;  %v1624_v3 = vsub.f32 1.0, %v1623_v63  ;;  %v3024_v17 = vld [vmem:[%s6279_s26 + $0x30] sm:$0xff]  ;;  %vm1642_vm2 = vweird.f32 %v1531_v61  ;;  %3842 = vmatmul.bf16.gmra.mxu3 %v5536_v62 }
 0x192   : > { %5181 = vmatmul.msk.f32.gmra.mxu2 %vm3083_vm3, %v3024_v17  ;;  %vm1647_vm5 = vcmp.eq.f32.partialorder %v1646_v24, 8.507059e+37  ;;  %v3028_v24 = vld [vmem:[%s6279_s26 + $0x50] sm:$0xff] }
 0x193   : > { %v1625_v5 = vmul.f32 %v5881_v59, %v1624_v3  ;;  %5111 = vmatmul.msk.f32.gmra.mxu1 %vm934_vm1, %v2553_v2 }
 0x194   : > { %v6588_v7 = vpop.f32.mrf.mxu0 }
 0x195   : > { %v5883_v9 = vpop.eup %5882  ;;  %v1626_v10 = vadd.f32 %v5881_v59, %v1625_v5  ;;  %v5051_v11 = vmul.f32 -1.442695, %v6588_v7 }
 0x196   : > { %v5885_v12 = vpop.eup %5884  ;;  %v1532_v14 = vadd.f32 1.0, %v5883_v9 }
 0x197   : > { %v1630_v15 = vsel %vm1629_vm14, %v5881_v59, %v1626_v10  ;;  %v1638_v16 = vmul.f32 %v5885_v12, %v1531_v61  ;;  %5886 = vpow2.f32 %v5051_v11  ;;  %5003 = vmatmul.msk.f32.gmra.mxu0 %vm934_vm1, %v890_v8  ;;  %vm1643_vm0 = vweird.f32 %v5885_v12  ;;  %v893_v61 = vld [vmem:[%s6274_s19 + $0xc0] sm:$0xff] }
 0x198   : > { %v1635_v18 = vsel %vm1632_vm15, %v1634_v13, %v1630_v15  ;;  %5888 = vrcp.f32 %v1532_v14  ;;  %vm1644_vm4 = vmor %vm1642_vm2, %vm1643_vm0  ;;  %v1663_v40 = vand.u32 2147483648, %v1532_v14  ;;  %v1661_v42 = vand.u32 2147483647, %v1532_v14  ;;  %v894_v15 = vld [vmem:[%s6274_s19 + $0xc8] sm:$0xff] }
 0x199   : > { %v2554_v19 = vmul.f32 %v1635_v18, %v6562_v23  ;;  %v1639_v20 = vsub.f32 1.0, %v1638_v16  ;;  %v1649_v23 = vor.u32 1.1754944e-38, %v1648_v21  ;;  %vm1657_vm7 = vweird.f32 %v1532_v14 }
 0x19a   : > { %5182 = vmatmul.msk.f32.gmra.mxu2 %vm3083_vm3, %v3025_v35  ;;  %v1664_v49 = vor.u32 1.1754944e-38, %v1663_v40  ;;  %vm1662_vm9 = vcmp.eq.f32.partialorder %v1661_v42, 8.507059e+37  ;;  %v3029_v42 = vld [vmem:[%s6279_s26 + $0x58] sm:$0xff] }
 0x19b   : > { %v1640_v22 = vmul.f32 %v5885_v12, %v1639_v20  ;;  %5112 = vmatmul.msk.f32.gmra.mxu1 %vm934_vm1, %v2554_v19 }
 0x19c   : > { %v6597_v25 = vpop.f32.mrf.mxu0 }
 0x19d   : > { %v5887_v28 = vpop.eup %5886  ;;  %v1641_v29 = vadd.f32 %v5885_v12, %v1640_v22  ;;  %v5052_v30 = vmul.f32 -1.442695, %v6597_v25 }
 0x19e   : > { %v5889_v31 = vpop.eup %5888  ;;  %v1533_v32 = vadd.f32 1.0, %v5887_v28 }
 0x19f   : > { %v1645_v33 = vsel %vm1644_vm4, %v5885_v12, %v1641_v29  ;;  %v1653_v34 = vmul.f32 %v5889_v31, %v1532_v14  ;;  %5890 = vpow2.f32 %v5052_v30  ;;  %5004 = vmatmul.msk.f32.gmra.mxu0 %vm934_vm1, %v891_v26  ;;  %vm1658_vm6 = vweird.f32 %v5889_v31 }
 0x1a0   : > { %v1650_v37 = vsel %vm1647_vm5, %v1649_v23, %v1645_v33  ;;  %5892 = vrcp.f32 %v1533_v32  ;;  %vm1659_vm8 = vmor %vm1657_vm7, %vm1658_vm6  ;;  %v1678_v57 = vand.u32 2147483648, %v1533_v32  ;;  %v1676_v59 = vand.u32 2147483647, %v1533_v32  ;;  %v5537_v33 = vld [vmem:[%s6284_s28 + $0x30] sm:$0xff] }
 0x1a1   : > { %v2555_v38 = vmul.f32 %v1650_v37, %v6570_v36  ;;  %v1654_v39 = vsub.f32 1.0, %v1653_v34  ;;  %vm1672_vm11 = vweird.f32 %v1533_v32  ;;  %3847 = vmatmul.bf16.gmra.mxu3 %v5537_v33 }
 0x1a2   : > { %5183 = vmatmul.msk.f32.gmra.mxu2 %vm3083_vm3, %v3026_v52  ;;  %vm1677_vm13 = vcmp.eq.f32.partialorder %v1676_v59, 8.507059e+37  ;;  %v3030_v59 = vld [vmem:[%s6279_s26 + $0x60] sm:$0xff] }
 0x1a3   : > { %v1655_v41 = vmul.f32 %v5889_v31, %v1654_v39  ;;  %5113 = vmatmul.msk.f32.gmra.mxu1 %vm934_vm1, %v2555_v38 }
 0x1a4   : > { %v6607_v43 = vpop.f32.mrf.mxu0 }
 0x1a5   : > { %v5891_v45 = vpop.eup %5890  ;;  %v1656_v46 = vadd.f32 %v5889_v31, %v1655_v41  ;;  %v5053_v47 = vmul.f32 -1.442695, %v6607_v43 }
 0x1a6   : > { %v5893_v48 = vpop.eup %5892  ;;  %v1534_v36 = vadd.f32 1.0, %v5891_v45 }
 0x1a7   : > { %v1660_v50 = vsel %vm1659_vm8, %v5889_v31, %v1656_v46  ;;  %v1668_v51 = vmul.f32 %v5893_v48, %v1533_v32  ;;  %5894 = vpow2.f32 %v5053_v47  ;;  %5005 = vmatmul.msk.f32.gmra.mxu0 %vm934_vm1, %v892_v44  ;;  %vm1673_vm10 = vweird.f32 %v5893_v48  ;;  %v895_v32 = vld [vmem:[%s6274_s19 + $0xd0] sm:$0xff] }
 0x1a8   : > { %v1665_v54 = vsel %vm1662_vm9, %v1664_v49, %v1660_v50  ;;  %5896 = vrcp.f32 %v1534_v36  ;;  %vm1674_vm12 = vmor %vm1672_vm11, %vm1673_vm10  ;;  %v1693_v11 = vand.u32 2147483648, %v1534_v36  ;;  %v1691_v13 = vand.u32 2147483647, %v1534_v36  ;;  %v896_v50 = vld [vmem:[%s6274_s19 + $0xd8] sm:$0xff] }
 0x1a9   : > { %v2556_v55 = vmul.f32 %v1665_v54, %v6578_v53  ;;  %v1669_v56 = vsub.f32 1.0, %v1668_v51  ;;  %v1679_v53 = vor.u32 1.1754944e-38, %v1678_v57  ;;  %vm1687_vm15 = vweird.f32 %v1534_v36 }
 0x1aa   : > { %5184 = vmatmul.msk.f32.gmra.mxu2 %vm3083_vm3, %v3027_v6  ;;  %v1694_v20 = vor.u32 1.1754944e-38, %v1693_v11  ;;  %vm1692_vm2 = vcmp.eq.f32.partialorder %v1691_v13, 8.507059e+37  ;;  %v3031_v13 = vld [vmem:[%s6279_s26 + $0x68] sm:$0xff] }
 0x1ab   : > { %v1670_v58 = vmul.f32 %v5893_v48, %v1669_v56  ;;  %5114 = vmatmul.msk.f32.gmra.mxu1 %vm934_vm1, %v2556_v55 }
 0x1ac   : > { %v6616_v60 = vpop.f32.mrf.mxu0 }
 0x1ad   : > { %v5895_v63 = vpop.eup %5894  ;;  %v1671_v0 = vadd.f32 %v5893_v48, %v1670_v58  ;;  %v5054_v1 = vmul.f32 -1.442695, %v6616_v60 }
 0x1ae   : > { %v5897_v2 = vpop.eup %5896  ;;  %v1535_v3 = vadd.f32 1.0, %v5895_v63 }
 0x1af   : > { %v1675_v4 = vsel %vm1674_vm12, %v5893_v48, %v1671_v0  ;;  %v1683_v5 = vmul.f32 %v5897_v2, %v1534_v36  ;;  %5898 = vpow2.f32 %v5054_v1  ;;  %5006 = vmatmul.msk.f32.gmra.mxu0 %vm934_vm1, %v893_v61  ;;  %vm1688_vm14 = vweird.f32 %v5897_v2 }
 0x1b0   : > { %v1680_v8 = vsel %vm1677_vm13, %v1679_v53, %v1675_v4  ;;  %5900 = vrcp.f32 %v1535_v3  ;;  %vm1689_vm0 = vmor %vm1687_vm15, %vm1688_vm14  ;;  %v1708_v29 = vand.u32 2147483648, %v1535_v3  ;;  %v1706_v31 = vand.u32 2147483647, %v1535_v3  ;;  %v5538_v4 = vld [vmem:[%s6284_s28 + $0x38] sm:$0xff] }
 0x1b1   : > { %v2557_v9 = vmul.f32 %v1680_v8, %v6588_v7  ;;  %v1684_v10 = vsub.f32 1.0, %v1683_v5  ;;  %vm1702_vm5 = vweird.f32 %v1535_v3  ;;  %3852 = vmatmul.bf16.gmra.mxu3 %v5538_v4 }
 0x1b2   : > { %5185 = vmatmul.msk.f32.gmra.mxu2 %vm3083_vm3, %v3028_v24  ;;  %vm1707_vm7 = vcmp.eq.f32.partialorder %v1706_v31, 8.507059e+37  ;;  %v3032_v31 = vld [vmem:[%s6279_s26 + $0x70] sm:$0xff] }
 0x1b3   : > { %v1685_v12 = vmul.f32 %v5897_v2, %v1684_v10  ;;  %5115 = vmatmul.msk.f32.gmra.mxu1 %vm934_vm1, %v2557_v9 }
 0x1b4   : > { %v6626_v14 = vpop.f32.mrf.mxu0 }
 0x1b5   : > { %v5899_v16 = vpop.eup %5898  ;;  %v1686_v17 = vadd.f32 %v5897_v2, %v1685_v12  ;;  %v5055_v18 = vmul.f32 -1.442695, %v6626_v14 }
 0x1b6   : > { %v5901_v19 = vpop.eup %5900  ;;  %v1536_v7 = vadd.f32 1.0, %v5899_v16 }
 0x1b7   : > { %v1690_v21 = vsel %vm1689_vm0, %v5897_v2, %v1686_v17  ;;  %v1698_v22 = vmul.f32 %v5901_v19, %v1535_v3  ;;  %5902 = vpow2.f32 %v5055_v18  ;;  %5007 = vmatmul.msk.f32.gmra.mxu0 %vm934_vm1, %v894_v15  ;;  %vm1703_vm4 = vweird.f32 %v5901_v19  ;;  %v897_v3 = vld [vmem:[%s6274_s19 + $0xe0] sm:$0xff] }
 0x1b8   : > { %v1695_v26 = vsel %vm1692_vm2, %v1694_v20, %v1690_v21  ;;  %5904 = vrcp.f32 %v1536_v7  ;;  %vm1704_vm6 = vmor %vm1702_vm5, %vm1703_vm4  ;;  %v1723_v47 = vand.u32 2147483648, %v1536_v7  ;;  %v1721_v49 = vand.u32 2147483647, %v1536_v7  ;;  %v898_v21 = vld [vmem:[%s6274_s19 + $0xe8] sm:$0xff] }
 0x1b9   : > { %v2558_v27 = vmul.f32 %v1695_v26, %v6597_v25  ;;  %v1699_v28 = vsub.f32 1.0, %v1698_v22  ;;  %v1709_v25 = vor.u32 1.1754944e-38, %v1708_v29  ;;  %vm1717_vm9 = vweird.f32 %v1536_v7 }
 0x1ba   : > { %5186 = vmatmul.msk.f32.gmra.mxu2 %vm3083_vm3, %v3029_v42  ;;  %v1724_v56 = vor.u32 1.1754944e-38, %v1723_v47  ;;  %vm1722_vm11 = vcmp.eq.f32.partialorder %v1721_v49, 8.507059e+37  ;;  %v3033_v49 = vld [vmem:[%s6279_s26 + $0x78] sm:$0xff] }
 0x1bb   : > { %v1700_v30 = vmul.f32 %v5901_v19, %v1699_v28  ;;  %5116 = vmatmul.msk.f32.gmra.mxu1 %vm934_vm1, %v2558_v27 }
 0x1bc   : > { %v6635_v23 = vpop.f32.mrf.mxu0 }
 0x1bd   : > { %v5903_v34 = vpop.eup %5902  ;;  %v1701_v35 = vadd.f32 %v5901_v19, %v1700_v30  ;;  %v5056_v37 = vmul.f32 -1.442695, %v6635_v23 }
 0x1be   : > { %v5905_v38 = vpop.eup %5904  ;;  %v1537_v39 = vadd.f32 1.0, %v5903_v34 }
 0x1bf   : > { %v1705_v40 = vsel %vm1704_vm6, %v5901_v19, %v1701_v35  ;;  %v1713_v41 = vmul.f32 %v5905_v38, %v1536_v7  ;;  %5906 = vpow2.f32 %v5056_v37  ;;  %5008 = vmatmul.msk.f32.gmra.mxu0 %vm934_vm1, %v895_v32  ;;  %vm1718_vm8 = vweird.f32 %v5905_v38 }
 0x1c0   : > { %v1710_v44 = vsel %vm1707_vm7, %v1709_v25, %v1705_v40  ;;  %5908 = vrcp.f32 %v1537_v39  ;;  %vm1719_vm10 = vmor %vm1717_vm9, %vm1718_vm8  ;;  %v1738_v0 = vand.u32 2147483648, %v1537_v39  ;;  %v1736_v2 = vand.u32 2147483647, %v1537_v39  ;;  %v5539_v40 = vld [vmem:[%s6284_s28 + $0x40] sm:$0xff] }
 0x1c1   : > { %v2559_v45 = vmul.f32 %v1710_v44, %v6607_v43  ;;  %v1714_v46 = vsub.f32 1.0, %v1713_v41  ;;  %vm1732_vm13 = vweird.f32 %v1537_v39  ;;  %3857 = vmatmul.bf16.gmra.mxu3 %v5539_v40 }
 0x1c2   : > { %5187 = vmatmul.msk.f32.gmra.mxu2 %vm3083_vm3, %v3030_v59  ;;  %vm1737_vm15 = vcmp.eq.f32.partialorder %v1736_v2, 8.507059e+37 }
 0x1c3   : > { %v1715_v48 = vmul.f32 %v5905_v38, %v1714_v46  ;;  %5117 = vmatmul.msk.f32.gmra.mxu1 %vm934_vm1, %v2559_v45 }
 0x1c4   : > { %v6645_v36 = vpop.f32.mrf.mxu0 }
 0x1c5   : > { %v5907_v51 = vpop.eup %5906  ;;  %v1716_v52 = vadd.f32 %v5905_v38, %v1715_v48  ;;  %v5057_v54 = vmul.f32 -1.442695, %v6645_v36 }
 0x1c6   : > { %v5909_v55 = vpop.eup %5908  ;;  %v1538_v43 = vadd.f32 1.0, %v5907_v51 }
 0x1c7   : > { %v1720_v57 = vsel %vm1719_vm10, %v5905_v38, %v1716_v52  ;;  %v1728_v58 = vmul.f32 %v5909_v55, %v1537_v39  ;;  %5910 = vpow2.f32 %v5057_v54  ;;  %5009 = vmatmul.msk.f32.gmra.mxu0 %vm934_vm1, %v896_v50  ;;  %vm1733_vm12 = vweird.f32 %v5909_v55  ;;  %v899_v39 = vld [vmem:[%s6274_s19 + $0xf0] sm:$0xff]  ;;  %v6682_v54 = vpop.f32.mrf.mxu3 }
 0x1c8   : > { %v1725_v61 = vsel %vm1722_vm11, %v1724_v56, %v1720_v57  ;;  %5912 = vrcp.f32 %v1538_v43  ;;  %vm1734_vm14 = vmor %vm1732_vm13, %vm1733_vm12  ;;  %v1753_v18 = vand.u32 2147483648, %v1538_v43  ;;  %v1751_v20 = vand.u32 2147483647, %v1538_v43 }
 0x1c9   : > { %v2560_v62 = vmul.f32 %v1725_v61, %v6616_v60  ;;  %v1729_v63 = vsub.f32 1.0, %v1728_v58  ;;  %v1739_v60 = vor.u32 1.1754944e-38, %v1738_v0  ;;  %vm1747_vm2 = vweird.f32 %v1538_v43  ;;  %v900_v58 = vld [vmem:[%s6274_s19 + $0xf8] sm:$0xff] }
 0x1ca   : > { %5188 = vmatmul.msk.f32.gmra.mxu2 %vm3083_vm3, %v3031_v13  ;;  %v1754_v28 = vor.u32 1.1754944e-38, %v1753_v18  ;;  %vm1752_vm5 = vcmp.eq.f32.partialorder %v1751_v20, 8.507059e+37  ;;  %v901_v13 = vld [vmem:[%s6274_s19 + $0x100] sm:$0xff] }
 0x1cb   : > { %v1730_v1 = vmul.f32 %v5909_v55, %v1729_v63  ;;  %5118 = vmatmul.msk.f32.gmra.mxu1 %vm934_vm1, %v2560_v62 }
 0x1cc   : > { %v6654_v53 = vpop.f32.mrf.mxu0 }
 0x1cd   : > { %v5911_v5 = vpop.eup %5910  ;;  %v1731_v6 = vadd.f32 %v5909_v55, %v1730_v1  ;;  %v5058_v8 = vmul.f32 -1.442695, %v6654_v53 }
 0x1ce   : > { %v5913_v9 = vpop.eup %5912  ;;  %v1539_v10 = vadd.f32 1.0, %v5911_v5 }
 0x1cf   : > { %v1735_v11 = vsel %vm1734_vm14, %v5909_v55, %v1731_v6  ;;  %v1743_v12 = vmul.f32 %v5913_v9, %v1538_v43  ;;  %5914 = vpow2.f32 %v5058_v8  ;;  %5010 = vmatmul.msk.f32.gmra.mxu0 %vm934_vm1, %v897_v3  ;;  %vm1748_vm0 = vweird.f32 %v5913_v9  ;;  %v3034_v3 = vld [vmem:[%s6279_s26 + $0x80] sm:$0xff]  ;;  %v6693_v8 = vpop.f32.mrf.mxu3 }
 0x1d0   : > { %v1740_v15 = vsel %vm1737_vm15, %v1739_v60, %v1735_v11  ;;  %5916 = vrcp.f32 %v1539_v10  ;;  %vm1749_vm4 = vmor %vm1747_vm2, %vm1748_vm0  ;;  %v1768_v35 = vand.u32 2147483648, %v1539_v10  ;;  %v1766_v38 = vand.u32 2147483647, %v1539_v10  ;;  %v6696_v11 = vpop.f32.mrf.mxu2 }
 0x1d1   : > { %v2561_v16 = vmul.f32 %v1740_v15, %v6626_v14  ;;  %v1744_v17 = vsub.f32 1.0, %v1743_v12  ;;  %vm1762_vm7 = vweird.f32 %v1539_v10  ;;  %v5540_v15 = vld [vmem:[%s6284_s28 + $0x48] sm:$0xff] }
 0x1d2   : > { %5189 = vmatmul.msk.f32.gmra.mxu2 %vm3083_vm3, %v3032_v31  ;;  %vm1767_vm9 = vcmp.eq.f32.partialorder %v1766_v38, 8.507059e+37  ;;  %3862 = vmatmul.bf16.gmra.mxu3 %v5540_v15  ;;  %v904_v15 = vld [vmem:[%s6274_s19 + $0x118] sm:$0xff] }
 0x1d3   : > { %v1745_v19 = vmul.f32 %v5913_v9, %v1744_v17  ;;  %5119 = vmatmul.msk.f32.gmra.mxu1 %vm934_vm1, %v2561_v16 }
 0x1d4   : > { %v6664_v7 = vpop.f32.mrf.mxu0 }
 0x1d5   : > { %v5915_v22 = vpop.eup %5914  ;;  %v1746_v24 = vadd.f32 %v5913_v9, %v1745_v19  ;;  %v5059_v26 = vmul.f32 -1.442695, %v6664_v7 }
 0x1d6   : > { %v5917_v27 = vpop.eup %5916  ;;  %v1540_v14 = vadd.f32 1.0, %v5915_v22 }
 0x1d7   : > { %v1750_v29 = vsel %vm1749_vm4, %v5913_v9, %v1746_v24  ;;  %v1758_v30 = vmul.f32 %v5917_v27, %v1539_v10  ;;  %5918 = vpow2.f32 %v5059_v26  ;;  %5011 = vmatmul.msk.f32.gmra.mxu0 %vm934_vm1, %v898_v21  ;;  %vm1763_vm6 = vweird.f32 %v5917_v27  ;;  %v3035_v24 = vld [vmem:[%s6279_s26 + $0x88] sm:$0xff] }
 0x1d8   : > { %v1755_v32 = vsel %vm1752_vm5, %v1754_v28, %v1750_v29  ;;  %5920 = vrcp.f32 %v1540_v14  ;;  %vm1764_vm8 = vmor %vm1762_vm7, %vm1763_vm6  ;;  %v1783_v55 = vand.u32 2147483648, %v1540_v14  ;;  %v1781_v43 = vand.u32 2147483647, %v1540_v14 }
 0x1d9   : > { %v2562_v33 = vmul.f32 %v1755_v32, %v6635_v23  ;;  %v1759_v34 = vsub.f32 1.0, %v1758_v30  ;;  %v1769_v23 = vor.u32 1.1754944e-38, %v1768_v35  ;;  %vm1777_vm11 = vweird.f32 %v1540_v14  ;;  %v6710_v32 = vpop.f32.mrf.mxu2 }
 0x1da   : > { %5190 = vmatmul.msk.f32.gmra.mxu2 %vm3083_vm3, %v3033_v49  ;;  %vm1782_vm13 = vcmp.eq.f32.partialorder %v1781_v43, 8.507059e+37 }
 0x1db   : > { %v1760_v37 = vmul.f32 %v5917_v27, %v1759_v34  ;;  %5120 = vmatmul.msk.f32.gmra.mxu1 %vm934_vm1, %v2562_v33  ;;  %v902_v34 = vld [vmem:[%s6274_s19 + $0x108] sm:$0xff] }
 0x1dc   : > { %v6673_v25 = vpop.f32.mrf.mxu0 }
 0x1dd   : > { %v5919_v41 = vpop.eup %5918  ;;  %v1761_v42 = vadd.f32 %v5917_v27, %v1760_v37  ;;  %v5060_v44 = vmul.f32 -1.442695, %v6673_v25 }
 0x1de   : > { %v5921_v45 = vpop.eup %5920  ;;  %v1541_v46 = vadd.f32 1.0, %v5919_v41 }
 0x1df   : > { %v1765_v47 = vsel %vm1764_vm8, %v5917_v27, %v1761_v42  ;;  %v1773_v48 = vmul.f32 %v5921_v45, %v1540_v14  ;;  %5922 = vpow2.f32 %v5060_v44  ;;  %5012 = vmatmul.msk.f32.gmra.mxu0 %vm934_vm1, %v899_v39  ;;  %vm1778_vm10 = vweird.f32 %v5921_v45  ;;  %v6707_v14 = vpop.f32.mrf.mxu3  ;;  %v3036_v44 = vld [vmem:[%s6279_s26 + $0x90] sm:$0xff] }
 0x1e0   : > { %v1770_v50 = vsel %vm1767_vm9, %v1769_v23, %v1765_v47  ;;  %5924 = vrcp.f32 %v1541_v46  ;;  %vm1779_vm12 = vmor %vm1777_vm11, %vm1778_vm10  ;;  %v1798_v9 = vand.u32 2147483648, %v1541_v46  ;;  %v1796_v10 = vand.u32 2147483647, %v1541_v46 }
 0x1e1   : > { %v2563_v51 = vmul.f32 %v1770_v50, %v6645_v36  ;;  %v1774_v52 = vsub.f32 1.0, %v1773_v48  ;;  %v1784_v36 = vor.u32 1.1754944e-38, %v1783_v55  ;;  %vm1792_vm15 = vweird.f32 %v1541_v46  ;;  %v903_v55 = vld [vmem:[%s6274_s19 + $0x110] sm:$0xff] }
 0x1e2   : > { %5191 = vmatmul.msk.f32.gmra.mxu2 %vm3083_vm3, %v3034_v3  ;;  %v1799_v19 = vor.u32 1.1754944e-38, %v1798_v9  ;;  %vm1797_vm2 = vcmp.eq.f32.partialorder %v1796_v10, 8.507059e+37 }
 0x1e3   : > { %v1775_v56 = vmul.f32 %v5921_v45, %v1774_v52  ;;  %5121 = vmatmul.msk.f32.gmra.mxu1 %vm934_vm1, %v2563_v51  ;;  %v6723_v51 = vpop.f32.mrf.mxu2 }
 0x1e4   : > { %v6685_v57 = vpop.f32.mrf.mxu0 }
 0x1e5   : > { %v5923_v59 = vpop.eup %5922  ;;  %v1776_v61 = vadd.f32 %v5921_v45, %v1775_v56  ;;  %v5061_v62 = vmul.f32 -1.442695, %v6685_v57  ;;  %v5541_v56 = vld [vmem:[%s6284_s28 + $0x50] sm:$0xff] }
 0x1e6   : > { %v5925_v63 = vpop.eup %5924  ;;  %v1542_v0 = vadd.f32 1.0, %v5923_v59  ;;  %3867 = vmatmul.bf16.gmra.mxu3 %v5541_v56 }
 0x1e7   : > { %v1780_v1 = vsel %vm1779_vm12, %v5921_v45, %v1776_v61  ;;  %v1788_v2 = vmul.f32 %v5925_v63, %v1541_v46  ;;  %5926 = vpow2.f32 %v5061_v62  ;;  %5013 = vmatmul.msk.f32.gmra.mxu0 %vm934_vm1, %v900_v58  ;;  %vm1793_vm14 = vweird.f32 %v5925_v63  ;;  %v6720_v47 = vpop.f32.mrf.mxu3 }
 0x1e8   : > { %v1785_v4 = vsel %vm1782_vm13, %v1784_v36, %v1780_v1  ;;  %5928 = vrcp.f32 %v1542_v0  ;;  %vm1794_vm0 = vmor %vm1792_vm15, %vm1793_vm14  ;;  %v1813_v29 = vand.u32 2147483648, %v1542_v0  ;;  %v1811_v31 = vand.u32 2147483647, %v1542_v0 }
 0x1e9   : > { %v2564_v5 = vmul.f32 %v1785_v4, %v6654_v53  ;;  %v1789_v6 = vsub.f32 1.0, %v1788_v2  ;;  %vm1807_vm5 = vweird.f32 %v1542_v0  ;;  %v6734_v2 = vpop.f32.mrf.mxu1 }
 0x1ea   : > { %5192 = vmatmul.msk.f32.gmra.mxu2 %vm3083_vm3, %v3035_v24  ;;  %v1814_v39 = vor.u32 1.1754944e-38, %v1813_v29  ;;  %vm1812_vm7 = vcmp.eq.f32.partialorder %v1811_v31, 8.507059e+37 }
 0x1eb   : > { %v1790_v60 = vmul.f32 %v5925_v63, %v1789_v6  ;;  %5122 = vmatmul.msk.f32.gmra.mxu1 %vm934_vm1, %v2564_v5  ;;  %v6742_v10 = vpop.f32.mrf.mxu2 }
 0x1ec   : > { %v6698_v12 = vpop.f32.mrf.mxu0 }
 0x1ed   : > { %v5927_v16 = vpop.eup %5926  ;;  %v1791_v17 = vadd.f32 %v5925_v63, %v1790_v60  ;;  %v5062_v53 = vmul.f32 -1.442695, %v6698_v12 }
 0x1ee   : > { %v5929_v18 = vpop.eup %5928  ;;  %v1543_v20 = vadd.f32 1.0, %v5927_v16 }
 0x1ef   : > { %v1795_v21 = vsel %vm1794_vm0, %v5925_v63, %v1791_v17  ;;  %v1803_v22 = vmul.f32 %v5929_v18, %v1542_v0  ;;  %5930 = vpow2.f32 %v5062_v53  ;;  %5014 = vmatmul.msk.f32.gmra.mxu0 %vm934_vm1, %v901_v13  ;;  %vm1808_vm4 = vweird.f32 %v5929_v18  ;;  %v3037_v0 = vld [vmem:[%s6279_s26 + $0x98] sm:$0xff]  ;;  %v6739_v5 = vpop.f32.mrf.mxu3 }
 0x1f0   : > { %v1800_v26 = vsel %vm1797_vm2, %v1799_v19, %v1795_v21  ;;  %5932 = vrcp.f32 %v1543_v20  ;;  %vm1809_vm6 = vmor %vm1807_vm5, %vm1808_vm4  ;;  %v1828_v48 = vand.u32 2147483648, %v1543_v20  ;;  %v1826_v50 = vand.u32 2147483647, %v1543_v20 }
 0x1f1   : > { %v2565_v27 = vmul.f32 %v1800_v26, %v6664_v7  ;;  %v1804_v28 = vsub.f32 1.0, %v1803_v22  ;;  %vm1822_vm9 = vweird.f32 %v1543_v20  ;;  %v3038_v22 = vld [vmem:[%s6279_s26 + $0xa0] sm:$0xff] }
 0x1f2   : > { %5193 = vmatmul.msk.f32.gmra.mxu2 %vm3083_vm3, %v3036_v44  ;;  %v1829_v61 = vor.u32 1.1754944e-38, %v1828_v48  ;;  %vm1827_vm11 = vcmp.eq.f32.partialorder %v1826_v50, 8.507059e+37 }
 0x1f3   : > { %v1805_v30 = vmul.f32 %v5929_v18, %v1804_v28  ;;  %5123 = vmatmul.msk.f32.gmra.mxu1 %vm934_vm1, %v2565_v27 }
 0x1f4   : > { %v6712_v33 = vpop.f32.mrf.mxu0 }
 0x1f5   : > { %v5931_v35 = vpop.eup %5930  ;;  %v1806_v37 = vadd.f32 %v5929_v18, %v1805_v30  ;;  %v5063_v7 = vmul.f32 -1.442695, %v6712_v33 }
 0x1f6   : > { %v5933_v38 = vpop.eup %5932  ;;  %v1544_v40 = vadd.f32 1.0, %v5931_v35 }
 0x1f7   : > { %v1810_v41 = vsel %vm1809_vm6, %v5929_v18, %v1806_v37  ;;  %v1818_v42 = vmul.f32 %v5933_v38, %v1543_v20  ;;  %5934 = vpow2.f32 %v5063_v7  ;;  %5015 = vmatmul.msk.f32.gmra.mxu0 %vm934_vm1, %v902_v34  ;;  %vm1823_vm8 = vweird.f32 %v5933_v38  ;;  %v6757_v30 = vpop.f32.mrf.mxu3  ;;  %v6765_v7 = vpop.f32.mrf.mxu2 }
 0x1f8   : > { %v1815_v45 = vsel %vm1812_vm7, %v1814_v39, %v1810_v41  ;;  %5936 = vrcp.f32 %v1544_v40  ;;  %vm1824_vm10 = vmor %vm1822_vm9, %vm1823_vm8  ;;  %v1843_v6 = vand.u32 2147483648, %v1544_v40  ;;  %v1841_v60 = vand.u32 2147483647, %v1544_v40 }
 0x1f9   : > { %v2566_v23 = vmul.f32 %v1815_v45, %v6673_v25  ;;  %v1819_v46 = vsub.f32 1.0, %v1818_v42  ;;  %vm1837_vm13 = vweird.f32 %v1544_v40 }
 0x1fa   : > { %5194 = vmatmul.msk.f32.gmra.mxu2 %vm3083_vm3, %v3037_v0  ;;  %v1844_v18 = vor.u32 1.1754944e-38, %v1843_v6  ;;  %vm1842_vm15 = vcmp.eq.f32.partialorder %v1841_v60, 8.507059e+37  ;;  %v3040_v60 = vld [vmem:[%s6279_s26 + $0xb0] sm:$0xff] }
 0x1fb   : > { %v1820_v49 = vmul.f32 %v5933_v38, %v1819_v46  ;;  %5124 = vmatmul.msk.f32.gmra.mxu1 %vm934_vm1, %v2566_v23  ;;  %v3039_v46 = vld [vmem:[%s6279_s26 + $0xa8] sm:$0xff] }
 0x1fc   : > { %v6725_v52 = vpop.f32.mrf.mxu0 }
 0x1fd   : > { %v5935_v43 = vpop.eup %5934  ;;  %v1821_v58 = vadd.f32 %v5933_v38, %v1820_v49  ;;  %v5064_v25 = vmul.f32 -1.442695, %v6725_v52 }
 0x1fe   : > { %v5937_v59 = vpop.eup %5936  ;;  %v6730_v62 = vadd.f32 1.0, %v5935_v43 }
 0x1ff   : > { %v1825_v63 = vsel %vm1824_vm10, %v5933_v38, %v1821_v58  ;;  %v1833_v36 = vmul.f32 %v5937_v59, %v1544_v40  ;;  %5938 = vpow2.f32 %v5064_v25  ;;  %5016 = vmatmul.msk.f32.gmra.mxu0 %vm934_vm1, %v903_v55  ;;  %vm1838_vm12 = vweird.f32 %v5937_v59  ;;  %v6782_v43 = vpop.f32.mrf.mxu3 }
 0x200   : > { %v1830_v1 = vsel %vm1827_vm11, %v1829_v61, %v1825_v63  ;;  %5940 = vrcp.f32 %v6730_v62  ;;  %vm1839_vm14 = vmor %vm1837_vm13, %vm1838_vm12  ;;  %v1858_v31 = vand.u32 2147483648, %v6730_v62  ;;  %v1856_v35 = vand.u32 2147483647, %v6730_v62 }
 0x201   : > { %v2567_v3 = vmul.f32 %v1830_v1, %v6685_v57  ;;  %v1834_v4 = vsub.f32 1.0, %v1833_v36  ;;  %vm1852_vm2 = vweird.f32 %v6730_v62 }
 0x202   : > { %5195 = vmatmul.msk.f32.gmra.mxu2 %vm3083_vm3, %v3038_v22  ;;  %v1859_v44 = vor.u32 1.1754944e-38, %v1858_v31  ;;  %vm1857_vm5 = vcmp.eq.f32.partialorder %v1856_v35, 8.507059e+37 }
 0x203   : > { %v1835_v9 = vmul.f32 %v5937_v59, %v1834_v4  ;;  %5125 = vmatmul.msk.f32.gmra.mxu1 %vm934_vm1, %v2567_v3 }
 0x204   : > { %v6744_v13 = vpop.f32.mrf.mxu0 }
 0x205   : > { %v5939_v16 = vpop.eup %5938  ;;  %v1836_v17 = vadd.f32 %v5937_v59, %v1835_v9  ;;  %v5065_v57 = vmul.f32 -1.442695, %v6744_v13 }
 0x206   : > { %v5941_v53 = vpop.eup %5940  ;;  %v6748_v19 = vadd.f32 1.0, %v5939_v16 }
 0x207   : > { %v1840_v20 = vsel %vm1839_vm14, %v5937_v59, %v1836_v17  ;;  %v1848_v21 = vmul.f32 %v5941_v53, %v6730_v62  ;;  %5942 = vpow2.f32 %v5065_v57  ;;  %5017 = vmatmul.msk.f32.gmra.mxu0 %vm934_vm1, %v904_v15  ;;  %vm1853_vm0 = vweird.f32 %v5941_v53  ;;  %v6790_v62 = vpop.f32.mrf.mxu2 }
 0x208   : > { %v1845_v24 = vsel %vm1842_vm15, %v1844_v18, %v1840_v20  ;;  %5944 = vrcp.f32 %v6748_v19  ;;  %v2826_v26 = vpop.f32.mrf.mxu1  ;;  %vm1854_vm4 = vmor %vm1852_vm2, %vm1853_vm0  ;;  %v1873_v58 = vand.u32 2147483648, %v6748_v19  ;;  %v1871_v59 = vand.u32 2147483647, %v6748_v19  ;;  %v6808_v18 = vpop.f32.mrf.mxu3 }
 0x209   : > { %v2568_v27 = vmul.f32 %v1845_v24, %v6698_v12  ;;  %v1849_v28 = vsub.f32 1.0, %v1848_v21  ;;  %v3978_v29 = vmul.f32 %v6682_v54, %v2826_v26  ;;  %v905_v12 = vld [vmem:[%s6274_s19 + $0x120] sm:$0xff]  ;;  %v5542_v54 = vld [vmem:[%s6284_s28 + $0x58] sm:$0xff]  ;;  %vm1867_vm7 = vweird.f32 %v6748_v19 }
 0x20a   : > { %3872 = vmatmul.bf16.gmra.mxu3 %v5542_v54  ;;  %5196 = vmatmul.msk.f32.gmra.mxu2 %vm3083_vm3, %v3039_v46  ;;  %vm1872_vm9 = vcmp.eq.f32.partialorder %v1871_v59, 8.507059e+37  ;;  %v3041_v54 = vld [vmem:[%s6279_s26 + $0xb8] sm:$0xff] }
 0x20b   : > { %v1850_v34 = vmul.f32 %v5941_v53, %v1849_v28  ;;  %v6762_v37 = vmul.f32 %v3978_v29, %v6696_v11  ;;  %5126 = vmatmul.msk.f32.gmra.mxu1 %vm934_vm1, %v2568_v27 }
 0x20c   : > { %v6767_v38 = vpop.f32.mrf.mxu0 }
 0x20d   : > { %v5943_v39 = vpop.eup %5942  ;;  %v1851_v40 = vadd.f32 %v5941_v53, %v1850_v34  ;;  %v5066_v41 = vmul.f32 -1.442695, %v6767_v38 }
 0x20e   : > { %v5945_v42 = vpop.eup %5944  ;;  %v6773_v11 = vadd.f32 1.0, %v5943_v39 }
 0x20f   : > { %v1855_v45 = vsel %vm1854_vm4, %v5941_v53, %v1851_v40  ;;  %v1863_v23 = vmul.f32 %v5945_v42, %v6748_v19  ;;  %5946 = vpow2.f32 %v5066_v41  ;;  %5018 = vmatmul.msk.f32.gmra.mxu0 %vm934_vm1, %v905_v12  ;;  %vm1868_vm6 = vweird.f32 %v5945_v42 }
 0x210   : > { %v1860_v48 = vsel %vm1857_vm5, %v1859_v44, %v1855_v45  ;;  %5948 = vrcp.f32 %v6773_v11  ;;  %v2829_v49 = vpop.f32.mrf.mxu1  ;;  %vm1869_vm8 = vmor %vm1867_vm7, %vm1868_vm6  ;;  %v1888_v19 = vand.u32 2147483648, %v6773_v11  ;;  %v1886_v21 = vand.u32 2147483647, %v6773_v11 }
 0x211   : > { %v2569_v50 = vmul.f32 %v1860_v48, %v6712_v33  ;;  %v1864_v55 = vsub.f32 1.0, %v1863_v23  ;;  %v3979_v56 = vmul.f32 %v6693_v8, %v2829_v49  ;;  %v906_v33 = vld [vmem:[%s6274_s19 + $0x128] sm:$0xff]  ;;  %vm1882_vm11 = vweird.f32 %v6773_v11 }
 0x212   : > { %5197 = vmatmul.msk.f32.gmra.mxu2 %vm3083_vm3, %v3040_v60  ;;  %v1889_v34 = vor.u32 1.1754944e-38, %v1888_v19  ;;  %vm1887_vm13 = vcmp.eq.f32.partialorder %v1886_v21, 8.507059e+37 }
 0x213   : > { %v1865_v25 = vmul.f32 %v5945_v42, %v1864_v55  ;;  %v6787_v61 = vmul.f32 %v3979_v56, %v6710_v32  ;;  %5127 = vmatmul.msk.f32.gmra.mxu1 %vm934_vm1, %v2569_v50  ;;  %v1874_v32 = vor.u32 1.1754944e-38, %v1873_v58 }
 0x214   : > { %v6792_v63 = vpop.f32.mrf.mxu0 }
 0x215   : > { %v5947_v8 = vpop.eup %5946  ;;  %v1866_v36 = vadd.f32 %v5945_v42, %v1865_v25  ;;  %v4106_v0 = vpack.c.bf16 %v6787_v61, %v6762_v37  ;;  %v5067_v1 = vmul.f32 -1.442695, %v6792_v63  ;;  %v6816_v24 = vpop.f32.mrf.mxu2 }
 0x216   : > { %v5949_v3 = vpop.eup %5948  ;;  %v6799_v4 = vadd.f32 1.0, %v5947_v8 }
 0x217   : > { %v1870_v6 = vsel %vm1869_vm8, %v5945_v42, %v1866_v36  ;;  %v1878_v9 = vmul.f32 %v5949_v3, %v6773_v11  ;;  %5950 = vpow2.f32 %v5067_v1  ;;  %5019 = vmatmul.msk.f32.gmra.mxu0 %vm934_vm1, %v906_v33  ;;  %vm1883_vm10 = vweird.f32 %v5949_v3  ;;  %v6833_v11 = vpop.f32.mrf.mxu3  ;;  %v3042_v36 = vld [vmem:[%s6279_s26 + $0xc0] sm:$0xff] }
 0x218   : > { %v1875_v15 = vsel %vm1872_vm9, %v1874_v32, %v1870_v6  ;;  %5952 = vrcp.f32 %v6799_v4  ;;  %v2832_v16 = vpop.f32.mrf.mxu1  ;;  %vm1884_vm12 = vmor %vm1882_vm11, %vm1883_vm10  ;;  %v1903_v45 = vand.u32 2147483648, %v6799_v4  ;;  %v1901_v46 = vand.u32 2147483647, %v6799_v4 }
 0x219   : > { %v2570_v17 = vmul.f32 %v1875_v15, %v6725_v52  ;;  %v1879_v57 = vsub.f32 1.0, %v1878_v9  ;;  %v3980_v53 = vmul.f32 %v6707_v14, %v2832_v16  ;;  %v907_v52 = vld [vmem:[%s6274_s19 + $0x130] sm:$0xff]  ;;  %v5543_v14 = vld [vmem:[%s6284_s28 + $0x60] sm:$0xff]  ;;  %vm1897_vm15 = vweird.f32 %v6799_v4 }
 0x21a   : > { %3877 = vmatmul.bf16.gmra.mxu3 %v5543_v14  ;;  %5198 = vmatmul.msk.f32.gmra.mxu2 %vm3083_vm3, %v3041_v54  ;;  %vm1902_vm2 = vcmp.eq.f32.partialorder %v1901_v46, 8.507059e+37 }
 0x21b   : > { %v1880_v20 = vmul.f32 %v5949_v3, %v1879_v57  ;;  %v6813_v22 = vmul.f32 %v3980_v53, %v6723_v51  ;;  %5128 = vmatmul.msk.f32.gmra.mxu1 %vm934_vm1, %v2570_v17 }
 0x21c   : > { %v6818_v26 = vpop.f32.mrf.mxu0 }
 0x21d   : > { %v5951_v27 = vpop.eup %5950  ;;  %v1881_v28 = vadd.f32 %v5949_v3, %v1880_v20  ;;  %v5068_v29 = vmul.f32 -1.442695, %v6818_v26  ;;  %v6841_v49 = vpop.f32.mrf.mxu2 }
 0x21e   : > { %v5953_v31 = vpop.eup %5952  ;;  %v6824_v51 = vadd.f32 1.0, %v5951_v27 }
 0x21f   : > { %v1885_v35 = vsel %vm1884_vm12, %v5949_v3, %v1881_v28  ;;  %v1893_v12 = vmul.f32 %v5953_v31, %v6799_v4  ;;  %5954 = vpow2.f32 %v5068_v29  ;;  %5020 = vmatmul.msk.f32.gmra.mxu0 %vm934_vm1, %v907_v52  ;;  %vm1898_vm14 = vweird.f32 %v5953_v31  ;;  %v6859_v9 = vpop.f32.mrf.mxu3  ;;  %v3043_v29 = vld [vmem:[%s6279_s26 + $0xc8] sm:$0xff] }
 0x220   : > { %v1890_v39 = vsel %vm1887_vm13, %v1889_v34, %v1885_v35  ;;  %5956 = vrcp.f32 %v6824_v51  ;;  %v2835_v40 = vpop.f32.mrf.mxu1  ;;  %vm1899_vm0 = vmor %vm1897_vm15, %vm1898_vm14  ;;  %v1918_v60 = vand.u32 2147483648, %v6824_v51  ;;  %v1916_v16 = vand.u32 2147483647, %v6824_v51 }
 0x221   : > { %v2571_v41 = vmul.f32 %v1890_v39, %v6744_v13  ;;  %v1894_v42 = vsub.f32 1.0, %v1893_v12  ;;  %v3981_v44 = vmul.f32 %v6720_v47, %v2835_v40  ;;  %v908_v13 = vld [vmem:[%s6274_s19 + $0x138] sm:$0xff]  ;;  %vm1912_vm5 = vweird.f32 %v6824_v51 }
 0x222   : > { %5199 = vmatmul.msk.f32.gmra.mxu2 %vm3083_vm3, %v3042_v36  ;;  %v1919_v14 = vor.u32 1.1754944e-38, %v1918_v60  ;;  %vm1917_vm7 = vcmp.eq.f32.partialorder %v1916_v16, 8.507059e+37 }
 0x223   : > { %v1895_v23 = vmul.f32 %v5953_v31, %v1894_v42  ;;  %v6838_v48 = vmul.f32 %v3981_v44, %v6742_v10  ;;  %5129 = vmatmul.msk.f32.gmra.mxu1 %vm934_vm1, %v2571_v41  ;;  %v1904_v10 = vor.u32 1.1754944e-38, %v1903_v45 }
 0x224   : > { %v6843_v50 = vpop.f32.mrf.mxu0 }
 0x225   : > { %v5955_v47 = vpop.eup %5954  ;;  %v1896_v55 = vadd.f32 %v5953_v31, %v1895_v23  ;;  %v4107_v56 = vpack.c.bf16 %v6838_v48, %v6813_v22  ;;  %v5069_v58 = vmul.f32 -1.442695, %v6843_v50  ;;  %v6867_v57 = vpop.f32.mrf.mxu2 }
 0x226   : > { %v5957_v25 = vpop.eup %5956  ;;  %v6850_v59 = vadd.f32 1.0, %v5955_v47 }
 0x227   : > { %v1900_v33 = vsel %vm1899_vm0, %v5953_v31, %v1896_v55  ;;  %v1908_v8 = vmul.f32 %v5957_v25, %v6824_v51  ;;  %5958 = vpow2.f32 %v5069_v58  ;;  %5021 = vmatmul.msk.f32.gmra.mxu0 %vm934_vm1, %v908_v13  ;;  %vm1913_vm4 = vweird.f32 %v5957_v25  ;;  %v6884_v54 = vpop.f32.mrf.mxu3 }
 0x228   : > { %v1905_v1 = vsel %vm1902_vm2, %v1904_v10, %v1900_v33  ;;  %5960 = vrcp.f32 %v6850_v59  ;;  %v2838_v3 = vpop.f32.mrf.mxu1  ;;  %vm1914_vm6 = vmor %vm1912_vm5, %vm1913_vm4  ;;  %v1933_v39 = vand.u32 2147483648, %v6850_v59  ;;  %v1931_v41 = vand.u32 2147483647, %v6850_v59  ;;  %v3044_v10 = vld [vmem:[%s6279_s26 + $0xd0] sm:$0xff] }
 0x229   : > { %v2572_v32 = vmul.f32 %v1905_v1, %v6767_v38  ;;  %v1909_v4 = vsub.f32 1.0, %v1908_v8  ;;  %v3982_v6 = vmul.f32 %v6739_v5, %v2838_v3  ;;  %v909_v38 = vld [vmem:[%s6274_s19 + $0x140] sm:$0xff]  ;;  %v5544_v5 = vld [vmem:[%s6284_s28 + $0x68] sm:$0xff]  ;;  %vm1927_vm9 = vweird.f32 %v6850_v59 }
 0x22a   : > { %3882 = vmatmul.bf16.gmra.mxu3 %v5544_v5  ;;  %5200 = vmatmul.msk.f32.gmra.mxu2 %vm3083_vm3, %v3043_v29  ;;  %vm1932_vm11 = vcmp.eq.f32.partialorder %v1931_v41, 8.507059e+37 }
 0x22b   : > { %v1910_v15 = vmul.f32 %v5957_v25, %v1909_v4  ;;  %v6864_v17 = vmul.f32 %v3982_v6, %v6765_v7  ;;  %5130 = vmatmul.msk.f32.gmra.mxu1 %vm934_vm1, %v2572_v32 }
 0x22c   : > { %v6869_v53 = vpop.f32.mrf.mxu0 }
 0x22d   : > { %v5959_v19 = vpop.eup %5958  ;;  %v1911_v20 = vadd.f32 %v5957_v25, %v1910_v15  ;;  %v5070_v21 = vmul.f32 -1.442695, %v6869_v53  ;;  %v6892_v44 = vpop.f32.mrf.mxu2 }
 0x22e   : > { %v5961_v52 = vpop.eup %5960  ;;  %v6875_v7 = vadd.f32 1.0, %v5959_v19 }
 0x22f   : > { %v1915_v27 = vsel %vm1914_vm6, %v5957_v25, %v1911_v20  ;;  %v1923_v28 = vmul.f32 %v5961_v52, %v6850_v59  ;;  %5962 = vpow2.f32 %v5070_v21  ;;  %5022 = vmatmul.msk.f32.gmra.mxu0 %vm934_vm1, %v909_v38  ;;  %vm1928_vm8 = vweird.f32 %v5961_v52  ;;  %v6910_v3 = vpop.f32.mrf.mxu3 }
 0x230   : > { %v1920_v31 = vsel %vm1917_vm7, %v1919_v14, %v1915_v27  ;;  %5964 = vrcp.f32 %v6875_v7  ;;  %v2841_v34 = vpop.f32.mrf.mxu1  ;;  %vm1929_vm10 = vmor %vm1927_vm9, %vm1928_vm8  ;;  %v1948_v32 = vand.u32 2147483648, %v6875_v7  ;;  %v1946_v6 = vand.u32 2147483647, %v6875_v7  ;;  %v3045_v27 = vld [vmem:[%s6279_s26 + $0xd8] sm:$0xff] }
 0x231   : > { %v2573_v51 = vmul.f32 %v1920_v31, %v6792_v63  ;;  %v1924_v35 = vsub.f32 1.0, %v1923_v28  ;;  %v3983_v12 = vmul.f32 %v6757_v30, %v2841_v34  ;;  %v910_v63 = vld [vmem:[%s6274_s19 + $0x148] sm:$0xff]  ;;  %vm1942_vm13 = vweird.f32 %v6875_v7 }
 0x232   : > { %5201 = vmatmul.msk.f32.gmra.mxu2 %vm3083_vm3, %v3044_v10  ;;  %v1949_v21 = vor.u32 1.1754944e-38, %v1948_v32  ;;  %vm1947_vm15 = vcmp.eq.f32.partialorder %v1946_v6, 8.507059e+37  ;;  %v3046_v10 = vld [vmem:[%s6279_s26 + $0xe0] sm:$0xff] }
 0x233   : > { %v1925_v40 = vmul.f32 %v5961_v52, %v1924_v35  ;;  %v6889_v42 = vmul.f32 %v3983_v12, %v6790_v62  ;;  %5131 = vmatmul.msk.f32.gmra.mxu1 %vm934_vm1, %v2573_v51  ;;  %v1934_v62 = vor.u32 1.1754944e-38, %v1933_v39 }
 0x234   : > { %v6894_v45 = vpop.f32.mrf.mxu0 }
 0x235   : > { %v5963_v30 = vpop.eup %5962  ;;  %v1926_v23 = vadd.f32 %v5961_v52, %v1925_v40  ;;  %v4108_v46 = vpack.c.bf16 %v6889_v42, %v6864_v17  ;;  %v5071_v13 = vmul.f32 -1.442695, %v6894_v45  ;;  %v6918_v15 = vpop.f32.mrf.mxu2  ;;  %v3057_v42 = vld [vmem:[%s6279_s26 + $0x138] sm:$0xff] }
 0x236   : > { %v5965_v47 = vpop.eup %5964  ;;  %v6901_v55 = vadd.f32 1.0, %v5963_v30 }
 0x237   : > { %v1930_v58 = vsel %vm1929_vm10, %v5961_v52, %v1926_v23  ;;  %v1938_v25 = vmul.f32 %v5965_v47, %v6875_v7  ;;  %5966 = vpow2.f32 %v5071_v13  ;;  %5023 = vmatmul.msk.f32.gmra.mxu0 %vm934_vm1, %v910_v63  ;;  %vm1943_vm12 = vweird.f32 %v5965_v47  ;;  %v6935_v51 = vpop.f32.mrf.mxu3 }
 0x238   : > { %v1935_v33 = vsel %vm1932_vm11, %v1934_v62, %v1930_v58  ;;  %5968 = vrcp.f32 %v6901_v55  ;;  %v2844_v59 = vpop.f32.mrf.mxu1  ;;  %vm1944_vm14 = vmor %vm1942_vm13, %vm1943_vm12  ;;  %v1963_v35 = vand.u32 2147483648, %v6901_v55  ;;  %v1961_v39 = vand.u32 2147483647, %v6901_v55 }
 0x239   : > { %v2574_v8 = vmul.f32 %v1935_v33, %v6818_v26  ;;  %v1939_v36 = vsub.f32 1.0, %v1938_v25  ;;  %v3984_v1 = vmul.f32 %v6782_v43, %v2844_v59  ;;  %v911_v26 = vld [vmem:[%s6274_s19 + $0x150] sm:$0xff]  ;;  %vm1957_vm2 = vweird.f32 %v6901_v55 }
 0x23a   : > { %v5545_v43 = vld [vmem:[%s6284_s28 + $0x70] sm:$0xff]  ;;  %5202 = vmatmul.msk.f32.gmra.mxu2 %vm3083_vm3, %v3045_v27  ;;  %vm1962_vm5 = vcmp.eq.f32.partialorder %v1961_v39, 8.507059e+37 }
 0x23b   : > { %v1940_v4 = vmul.f32 %v5965_v47, %v1939_v36  ;;  %v6915_v60 = vmul.f32 %v3984_v1, %v6816_v24  ;;  %5132 = vmatmul.msk.f32.gmra.mxu1 %vm934_vm1, %v2574_v8  ;;  %3887 = vmatmul.bf16.gmra.mxu3 %v5545_v43 }
 0x23c   : > { %v6920_v16 = vpop.f32.mrf.mxu0 }
 0x23d   : > { %v5967_v38 = vpop.eup %5966  ;;  %v1941_v5 = vadd.f32 %v5965_v47, %v1940_v4  ;;  %v5072_v19 = vmul.f32 -1.442695, %v6920_v16  ;;  %v6943_v41 = vpop.f32.mrf.mxu2 }
 0x23e   : > { %v5969_v20 = vpop.eup %5968  ;;  %v6926_v24 = vadd.f32 1.0, %v5967_v38 }
 0x23f   : > { %v1945_v52 = vsel %vm1944_vm14, %v5965_v47, %v1941_v5  ;;  %v1953_v14 = vmul.f32 %v5969_v20, %v6901_v55  ;;  %5970 = vpow2.f32 %v5072_v19  ;;  %5024 = vmatmul.msk.f32.gmra.mxu0 %vm934_vm1, %v911_v26  ;;  %vm1958_vm0 = vweird.f32 %v5969_v20  ;;  %v6961_v1 = vpop.f32.mrf.mxu3 }
 0x240   : > { %v1950_v28 = vsel %vm1947_vm15, %v1949_v21, %v1945_v52  ;;  %5972 = vrcp.f32 %v6926_v24  ;;  %v2847_v7 = vpop.f32.mrf.mxu1  ;;  %vm1959_vm4 = vmor %vm1957_vm2, %vm1958_vm0  ;;  %v1978_v32 = vand.u32 2147483648, %v6926_v24  ;;  %v1976_v6 = vand.u32 2147483647, %v6926_v24 }
 0x241   : > { %v2575_v29 = vmul.f32 %v1950_v28, %v6843_v50  ;;  %v1954_v31 = vsub.f32 1.0, %v1953_v14  ;;  %v3985_v34 = vmul.f32 %v6808_v18, %v2847_v7  ;;  %v912_v50 = vld [vmem:[%s6274_s19 + $0x158] sm:$0xff]  ;;  %vm1972_vm7 = vweird.f32 %v6926_v24  ;;  %v3047_v28 = vld [vmem:[%s6279_s26 + $0xe8] sm:$0xff] }
 0x242   : > { %5203 = vmatmul.msk.f32.gmra.mxu2 %vm3083_vm3, %v3046_v10  ;;  %v1979_v52 = vor.u32 1.1754944e-38, %v1978_v32  ;;  %vm1977_vm9 = vcmp.eq.f32.partialorder %v1976_v6, 8.507059e+37 }
 0x243   : > { %v1955_v12 = vmul.f32 %v5969_v20, %v1954_v31  ;;  %v6940_v40 = vmul.f32 %v3985_v34, %v6841_v49  ;;  %5133 = vmatmul.msk.f32.gmra.mxu1 %vm934_vm1, %v2575_v29  ;;  %v1964_v49 = vor.u32 1.1754944e-38, %v1963_v35 }
 0x244   : > { %v6945_v63 = vpop.f32.mrf.mxu0 }
 0x245   : > { %v5971_v18 = vpop.eup %5970  ;;  %v1956_v30 = vadd.f32 %v5969_v20, %v1955_v12  ;;  %v4109_v23 = vpack.c.bf16 %v6940_v40, %v6915_v60  ;;  %v5073_v13 = vmul.f32 -1.442695, %v6945_v63  ;;  %v6969_v43 = vpop.f32.mrf.mxu2 }
 0x246   : > { %v5973_v47 = vpop.eup %5972  ;;  %v6952_v62 = vadd.f32 1.0, %v5971_v18 }
 0x247   : > { %v1960_v58 = vsel %vm1959_vm4, %v5969_v20, %v1956_v30  ;;  %v1968_v25 = vmul.f32 %v5973_v47, %v6926_v24  ;;  %5974 = vpow2.f32 %v5073_v13  ;;  %5025 = vmatmul.msk.f32.gmra.mxu0 %vm934_vm1, %v912_v50  ;;  %vm1973_vm6 = vweird.f32 %v5973_v47  ;;  %v6987_v34 = vpop.f32.mrf.mxu3  ;;  %v914_v30 = vld [vmem:[%s6274_s19 + $0x168] sm:$0xff] }
 0x248   : > { %v1965_v33 = vsel %vm1962_vm5, %v1964_v49, %v1960_v58  ;;  %5976 = vrcp.f32 %v6952_v62  ;;  %v2850_v55 = vpop.f32.mrf.mxu1  ;;  %vm1974_vm8 = vmor %vm1972_vm7, %vm1973_vm6  ;;  %v1993_v35 = vand.u32 2147483648, %v6952_v62  ;;  %v1991_v39 = vand.u32 2147483647, %v6952_v62 }
 0x249   : > { %v2576_v59 = vmul.f32 %v1965_v33, %v6869_v53  ;;  %v1969_v8 = vsub.f32 1.0, %v1968_v25  ;;  %v3986_v36 = vmul.f32 %v6833_v11, %v2850_v55  ;;  %v913_v53 = vld [vmem:[%s6274_s19 + $0x160] sm:$0xff]  ;;  %v5546_v11 = vld [vmem:[%s6284_s28 + $0x78] sm:$0xff]  ;;  %vm1987_vm11 = vweird.f32 %v6952_v62  ;;  %v3048_v55 = vld [vmem:[%s6279_s26 + $0xf0] sm:$0xff] }
 0x24a   : > { %5204 = vmatmul.msk.f32.gmra.mxu2 %vm3083_vm3, %v3047_v28  ;;  %v1994_v58 = vor.u32 1.1754944e-38, %v1993_v35  ;;  %vm1992_vm13 = vcmp.eq.f32.partialorder %v1991_v39, 8.507059e+37 }
 0x24b   : > { %v1970_v4 = vmul.f32 %v5973_v47, %v1969_v8  ;;  %v6966_v26 = vmul.f32 %v3986_v36, %v6867_v57  ;;  %5134 = vmatmul.msk.f32.gmra.mxu1 %vm934_vm1, %v2576_v59  ;;  %3892 = vmatmul.bf16.gmra.mxu3 %v5546_v11 }
 0x24c   : > { %v6971_v38 = vpop.f32.mrf.mxu0 }
 0x24d   : > { %v5975_v5 = vpop.eup %5974  ;;  %v1971_v19 = vadd.f32 %v5973_v47, %v1970_v4  ;;  %v5074_v20 = vmul.f32 -1.442695, %v6971_v38  ;;  %v6992_v50 = vpop.f32.mrf.mxu2 }
 0x24e   : > { %v5977_v21 = vpop.eup %5976  ;;  %v6977_v57 = vadd.f32 1.0, %v5975_v5 }
 0x24f   : > { %v1975_v14 = vsel %vm1974_vm8, %v5973_v47, %v1971_v19  ;;  %v1983_v27 = vmul.f32 %v5977_v21, %v6952_v62  ;;  %5978 = vpow2.f32 %v5074_v20  ;;  %5026 = vmatmul.msk.f32.gmra.mxu0 %vm934_vm1, %v913_v53  ;;  %vm1988_vm10 = vweird.f32 %v5977_v21  ;;  %v7009_v32 = vpop.f32.mrf.mxu3  ;;  %v915_v19 = vld [vmem:[%s6274_s19 + $0x170] sm:$0xff]  ;;  %v5547_v20 = vld [vmem:[%s6284_s28 + $0x80] sm:$0xff] }
 0x250   : > { %v1980_v7 = vsel %vm1977_vm9, %v1979_v52, %v1975_v14  ;;  %5980 = vrcp.f32 %v6977_v57  ;;  %v6983_v24 = vpop.f32.mrf.mxu1  ;;  %vm1989_vm12 = vmor %vm1987_vm11, %vm1988_vm10  ;;  %v2008_v4 = vand.u32 2147483648, %v6977_v57  ;;  %v2006_v53 = vand.u32 2147483647, %v6977_v57 }
 0x251   : > { %v2577_v29 = vmul.f32 %v1980_v7, %v6894_v45  ;;  %v1984_v31 = vsub.f32 1.0, %v1983_v27  ;;  %vm2002_vm15 = vweird.f32 %v6977_v57 }
 0x252   : > { %5205 = vmatmul.msk.f32.gmra.mxu2 %vm3083_vm3, %v3048_v55  ;;  %v2009_v27 = vor.u32 1.1754944e-38, %v2008_v4  ;;  %vm2007_vm2 = vcmp.eq.f32.partialorder %v2006_v53, 8.507059e+37  ;;  %v3050_v53 = vld [vmem:[%s6279_s26 + $0x100] sm:$0xff] }
 0x253   : > { %v1985_v12 = vmul.f32 %v5977_v21, %v1984_v31  ;;  %5135 = vmatmul.msk.f32.gmra.mxu1 %vm934_vm1, %v2577_v29  ;;  %v3049_v31 = vld [vmem:[%s6279_s26 + $0xf8] sm:$0xff] }
 0x254   : > { %v6994_v18 = vpop.f32.mrf.mxu0 }
 0x255   : > { %v5979_v13 = vpop.eup %5978  ;;  %v1986_v47 = vadd.f32 %v5977_v21, %v1985_v12  ;;  %v5075_v45 = vmul.f32 -1.442695, %v6994_v18  ;;  %v7014_v11 = vpop.f32.mrf.mxu2 }
 0x256   : > { %v5981_v49 = vpop.eup %5980  ;;  %v6999_v25 = vadd.f32 1.0, %v5979_v13 }
 0x257   : > { %v1990_v10 = vsel %vm1989_vm12, %v5977_v21, %v1986_v47  ;;  %v1998_v33 = vmul.f32 %v5981_v49, %v6977_v57  ;;  %5982 = vpow2.f32 %v5075_v45  ;;  %5027 = vmatmul.msk.f32.gmra.mxu0 %vm934_vm1, %v914_v30  ;;  %vm2003_vm14 = vweird.f32 %v5981_v49  ;;  %v7032_v30 = vpop.f32.mrf.mxu3 }
 0x258   : > { %v1995_v59 = vsel %vm1992_vm13, %v1994_v58, %v1990_v10  ;;  %5984 = vrcp.f32 %v6999_v25  ;;  %v7005_v62 = vpop.f32.mrf.mxu1  ;;  %vm2004_vm0 = vmor %vm2002_vm15, %vm2003_vm14  ;;  %v2023_v13 = vand.u32 2147483648, %v6999_v25  ;;  %v2021_v45 = vand.u32 2147483647, %v6999_v25  ;;  %v916_v10 = vld [vmem:[%s6274_s19 + $0x178] sm:$0xff] }
 0x259   : > { %v2578_v8 = vmul.f32 %v1995_v59, %v6920_v16  ;;  %v1999_v36 = vsub.f32 1.0, %v1998_v33  ;;  %vm2017_vm5 = vweird.f32 %v6999_v25 }
 0x25a   : > { %5206 = vmatmul.msk.f32.gmra.mxu2 %vm3083_vm3, %v3049_v31  ;;  %vm2022_vm7 = vcmp.eq.f32.partialorder %v2021_v45, 8.507059e+37  ;;  %v917_v31 = vld [vmem:[%s6274_s19 + $0x180] sm:$0xff] }
 0x25b   : > { %v2000_v6 = vmul.f32 %v5981_v49, %v1999_v36  ;;  %5136 = vmatmul.msk.f32.gmra.mxu1 %vm934_vm1, %v2578_v8  ;;  %3897 = vmatmul.bf16.gmra.mxu3 %v5547_v20  ;;  %v2024_v8 = vor.u32 1.1754944e-38, %v2023_v13 }
 0x25c   : > { %v7016_v5 = vpop.f32.mrf.mxu0 }
 0x25d   : > { %v5983_v21 = vpop.eup %5982  ;;  %v2001_v16 = vadd.f32 %v5981_v49, %v2000_v6  ;;  %v5076_v52 = vmul.f32 -1.442695, %v7016_v5 }
 0x25e   : > { %v5985_v14 = vpop.eup %5984  ;;  %v7022_v28 = vadd.f32 1.0, %v5983_v21 }
 0x25f   : > { %v2005_v7 = vsel %vm2004_vm0, %v5981_v49, %v2001_v16  ;;  %v2013_v29 = vmul.f32 %v5985_v14, %v6999_v25  ;;  %5986 = vpow2.f32 %v5076_v52  ;;  %5028 = vmatmul.msk.f32.gmra.mxu0 %vm934_vm1, %v915_v19  ;;  %vm2018_vm4 = vweird.f32 %v5985_v14  ;;  %v7037_v49 = vpop.f32.mrf.mxu2  ;;  %v7054_v16 = vpop.f32.mrf.mxu3 }
 0x260   : > { %v2010_v35 = vsel %vm2007_vm2, %v2009_v27, %v2005_v7  ;;  %5988 = vrcp.f32 %v7022_v28  ;;  %v7028_v57 = vpop.f32.mrf.mxu1  ;;  %vm2019_vm6 = vmor %vm2017_vm5, %vm2018_vm4  ;;  %v2038_v52 = vand.u32 2147483648, %v7022_v28  ;;  %v2036_v27 = vand.u32 2147483647, %v7022_v28 }
 0x261   : > { %v2579_v12 = vmul.f32 %v2010_v35, %v6945_v63  ;;  %v2014_v39 = vsub.f32 1.0, %v2013_v29  ;;  %v5548_v35 = vld [vmem:[%s6284_s28 + $0x88] sm:$0xff]  ;;  %vm2032_vm9 = vweird.f32 %v7022_v28 }
 0x262   : > { %5207 = vmatmul.msk.f32.gmra.mxu2 %vm3083_vm3, %v3050_v53  ;;  %vm2037_vm11 = vcmp.eq.f32.partialorder %v2036_v27, 8.507059e+37 }
 0x263   : > { %v2015_v47 = vmul.f32 %v5985_v14, %v2014_v39  ;;  %5137 = vmatmul.msk.f32.gmra.mxu1 %vm934_vm1, %v2579_v12 }
 0x264   : > { %v7039_v58 = vpop.f32.mrf.mxu0 }
 0x265   : > { %v5987_v33 = vpop.eup %5986  ;;  %v2016_v55 = vadd.f32 %v5985_v14, %v2015_v47  ;;  %v5077_v63 = vmul.f32 -1.442695, %v7039_v58  ;;  %v2039_v47 = vor.u32 1.1754944e-38, %v2038_v52  ;;  %v918_v52 = vld [vmem:[%s6274_s19 + $0x188] sm:$0xff] }
 0x266   : > { %v5989_v59 = vpop.eup %5988  ;;  %v7044_v36 = vadd.f32 1.0, %v5987_v33 }
 0x267   : > { %v2020_v4 = vsel %vm2019_vm6, %v5985_v14, %v2016_v55  ;;  %v2028_v6 = vmul.f32 %v5989_v59, %v7022_v28  ;;  %5990 = vpow2.f32 %v5077_v63  ;;  %5029 = vmatmul.msk.f32.gmra.mxu0 %vm934_vm1, %v916_v10  ;;  %vm2033_vm8 = vweird.f32 %v5989_v59  ;;  %v7059_v7 = vpop.f32.mrf.mxu2  ;;  %v3051_v55 = vld [vmem:[%s6279_s26 + $0x108] sm:$0xff] }
 0x268   : > { %v2025_v19 = vsel %vm2022_vm7, %v2024_v8, %v2020_v4  ;;  %5992 = vrcp.f32 %v7044_v36  ;;  %v7050_v25 = vpop.f32.mrf.mxu1  ;;  %vm2034_vm10 = vmor %vm2032_vm9, %vm2033_vm8  ;;  %vm2047_vm13 = vweird.f32 %v7044_v36 }
 0x269   : > { %v2580_v20 = vmul.f32 %v2025_v19, %v6971_v38  ;;  %v2029_v21 = vsub.f32 1.0, %v2028_v6  ;;  %v7074_v6 = vpop.f32.mrf.mxu3  ;;  %v2051_v19 = vand.u32 2147483647, %v7044_v36 }
 0x26a   : > { %5208 = vmatmul.msk.f32.gmra.mxu2 %vm3083_vm3, %v3051_v55 }
 0x26b   : > { %v2030_v14 = vmul.f32 %v5989_v59, %v2029_v21  ;;  %5138 = vmatmul.msk.f32.gmra.mxu1 %vm934_vm1, %v2580_v20  ;;  %3902 = vmatmul.bf16.gmra.mxu3 %v5548_v35  ;;  %vm2052_vm15 = vcmp.eq.f32.partialorder %v2051_v19, 8.507059e+37  ;;  %v919_v19 = vld [vmem:[%s6274_s19 + $0x190] sm:$0xff] }
 0x26c   : > { %v7061_v29 = vpop.f32.mrf.mxu0 }
 0x26d   : > { %v5991_v12 = vpop.eup %5990  ;;  %v2031_v38 = vadd.f32 %v5989_v59, %v2030_v14  ;;  %v5078_v39 = vmul.f32 -1.442695, %v7061_v29 }
 0x26e   : > { %v5993_v13 = vpop.eup %5992  ;;  %v1559_v45 = vadd.f32 1.0, %v5991_v12 }
 0x26f   : > { %v2035_v10 = vsel %vm2034_vm10, %v5989_v59, %v2031_v38  ;;  %v2043_v33 = vmul.f32 %v5993_v13, %v7044_v36  ;;  %5994 = vpow2.f32 %v5078_v39  ;;  %5030 = vmatmul.msk.f32.gmra.mxu0 %vm934_vm1, %v917_v31  ;;  %v2053_v59 = vand.u32 2147483648, %v7044_v36  ;;  %v7079_v20 = vpop.f32.mrf.mxu2 }
 0x270   : > { %v2040_v63 = vsel %vm2037_vm11, %v2039_v47, %v2035_v10  ;;  %5996 = vrcp.f32 %v1559_v45  ;;  %v7070_v8 = vpop.f32.mrf.mxu1  ;;  %vm2048_vm12 = vweird.f32 %v5993_v13  ;;  %v3052_v47 = vld [vmem:[%s6279_s26 + $0x110] sm:$0xff]  ;;  %vm2062_vm2 = vweird.f32 %v1559_v45 }
 0x271   : > { %v2581_v28 = vmul.f32 %v2040_v63, %v6994_v18  ;;  %v2044_v4 = vsub.f32 1.0, %v2043_v33  ;;  %vm2049_vm14 = vmor %vm2047_vm13, %vm2048_vm12  ;;  %v2054_v35 = vor.u32 1.1754944e-38, %v2053_v59  ;;  %v7093_v63 = vpop.f32.mrf.mxu3 }
 0x272   : > { %5209 = vmatmul.msk.f32.gmra.mxu2 %vm3083_vm3, %v3052_v47 }
 0x273   : > { %v2045_v53 = vmul.f32 %v5993_v13, %v2044_v4  ;;  %5139 = vmatmul.msk.f32.gmra.mxu1 %vm934_vm1, %v2581_v28  ;;  %v2068_v28 = vand.u32 2147483648, %v1559_v45 }
 0x274   : > { %v7081_v21 = vpop.f32.mrf.mxu0 }
 0x275   : > { %v5995_v14 = vpop.eup %5994  ;;  %v2046_v27 = vadd.f32 %v5993_v13, %v2045_v53  ;;  %v5079_v18 = vmul.f32 -1.442695, %v7081_v21 }
 0x276   : > { %v5997_v31 = vpop.eup %5996  ;;  %v7086_v12 = vadd.f32 1.0, %v5995_v14 }
 0x277   : > { %v2050_v38 = vsel %vm2049_vm14, %v5993_v13, %v2046_v27  ;;  %v2058_v39 = vmul.f32 %v5997_v31, %v1559_v45  ;;  %5998 = vpow2.f32 %v5079_v18  ;;  %5031 = vmatmul.msk.f32.gmra.mxu0 %vm934_vm1, %v918_v52  ;;  %v2066_v13 = vand.u32 2147483647, %v1559_v45  ;;  %v7096_v59 = vpop.f32.mrf.mxu2  ;;  %v5549_v52 = vld [vmem:[%s6284_s28 + $0x90] sm:$0xff] }
 0x278   : > { %v2055_v10 = vsel %vm2052_vm15, %v2054_v35, %v2050_v38  ;;  %6000 = vrcp.f32 %v7086_v12  ;;  %v2868_v36 = vpop.f32.mrf.mxu1  ;;  %vm2063_vm0 = vweird.f32 %v5997_v31  ;;  %v2069_v35 = vor.u32 1.1754944e-38, %v2068_v28 }
 0x279   : > { %v2582_v33 = vmul.f32 %v2055_v10, %v7016_v5  ;;  %v2059_v55 = vsub.f32 1.0, %v2058_v39  ;;  %vm2064_vm4 = vmor %vm2062_vm2, %vm2063_vm0  ;;  %vm2067_vm5 = vcmp.eq.f32.partialorder %v2066_v13, 8.507059e+37  ;;  %v3992_v10 = vmul.f32 %v6987_v34, %v2868_v36 }
 0x27a   : > { %v2081_v34 = vand.u32 2147483647, %v7086_v12  ;;  %v2083_v36 = vand.u32 2147483648, %v7086_v12  ;;  %vm2077_vm7 = vweird.f32 %v7086_v12 }
 0x27b   : > { %v2060_v4 = vmul.f32 %v5997_v31, %v2059_v55  ;;  %5140 = vmatmul.msk.f32.gmra.mxu1 %vm934_vm1, %v2582_v33  ;;  %3907 = vmatmul.bf16.gmra.mxu3 %v5549_v52  ;;  %v3053_v33 = vld [vmem:[%s6279_s26 + $0x118] sm:$0xff] }
 0x27c   : > { %v7098_v53 = vpop.f32.mrf.mxu0  ;;  %5210 = vmatmul.msk.f32.gmra.mxu2 %vm3083_vm3, %v3053_v33  ;;  %vm2082_vm9 = vcmp.eq.f32.partialorder %v2081_v34, 8.507059e+37 }
 0x27d   : > { %v5999_v14 = vpop.eup %5998  ;;  %v2061_v27 = vadd.f32 %v5997_v31, %v2060_v4  ;;  %v5080_v5 = vmul.f32 -1.442695, %v7098_v53  ;;  %v7113_v4 = vpop.f32.mrf.mxu3 }
 0x27e   : > { %v6001_v18 = vpop.eup %6000  ;;  %v7103_v38 = vadd.f32 1.0, %v5999_v14  ;;  %v4056_v14 = vmul.f32 %v3992_v10, %v7014_v11  ;;  %v2084_v10 = vor.u32 1.1754944e-38, %v2083_v36 }
 0x27f   : > { %v2065_v39 = vsel %vm2064_vm4, %v5997_v31, %v2061_v27  ;;  %v2073_v47 = vmul.f32 %v6001_v18, %v7086_v12  ;;  %6002 = vpow2.f32 %v5080_v5  ;;  %5032 = vmatmul.msk.f32.gmra.mxu0 %vm934_vm1, %v919_v19  ;;  %v3991_v19 = vmul.f32 %v6961_v1, %v7070_v8  ;;  %v3054_v12 = vld [vmem:[%s6279_s26 + $0x120] sm:$0xff] }
 0x280   : > { %v2070_v55 = vsel %vm2067_vm5, %v2069_v35, %v2065_v39  ;;  %6004 = vrcp.f32 %v7103_v38  ;;  %v2871_v45 = vpop.f32.mrf.mxu1  ;;  %vm2078_vm6 = vweird.f32 %v6001_v18  ;;  %v920_v35 = vld [vmem:[%s6274_s19 + $0x198] sm:$0xff]  ;;  %v2098_v34 = vand.u32 2147483648, %v7103_v38 }
 0x281   : > { %v2583_v13 = vmul.f32 %v2070_v55, %v7039_v58  ;;  %v2074_v28 = vsub.f32 1.0, %v2073_v47  ;;  %v3993_v31 = vmul.f32 %v7009_v32, %v2871_v45  ;;  %v7122_v58 = vpop.f32.mrf.mxu2  ;;  %v3990_v32 = vmul.f32 %v6935_v51, %v7050_v25  ;;  %vm2079_vm8 = vmor %vm2077_vm7, %vm2078_vm6 }
 0x282   : > { %v4055_v51 = vmul.f32 %v3991_v19, %v6992_v50  ;;  %v3988_v45 = vmul.f32 %v6884_v54, %v7005_v62  ;;  %v3987_v54 = vmul.f32 %v6859_v9, %v6983_v24  ;;  %v2096_v19 = vand.u32 2147483647, %v7103_v38  ;;  %v5550_v24 = vld [vmem:[%s6284_s28 + $0x98] sm:$0xff] }
 0x283   : > { %v2075_v52 = vmul.f32 %v6001_v18, %v2074_v28  ;;  %v4057_v27 = vmul.f32 %v3993_v31, %v7037_v49  ;;  %5141 = vmatmul.msk.f32.gmra.mxu1 %vm934_vm1, %v2583_v13  ;;  %v3989_v49 = vmul.f32 %v6910_v3, %v7028_v57  ;;  %v4054_v3 = vmul.f32 %v3990_v32, %v6969_v43 }
 0x284   : > { %v7126_v5 = vpop.f32.mrf.mxu0  ;;  %5211 = vmatmul.msk.f32.gmra.mxu2 %vm3083_vm3, %v3054_v12  ;;  %vm2092_vm11 = vweird.f32 %v7103_v38  ;;  %vm2097_vm13 = vcmp.eq.f32.partialorder %v2096_v19, 8.507059e+37 }
 0x285   : > { %v6003_v39 = vpop.eup %6002  ;;  %v2076_v47 = vadd.f32 %v6001_v18, %v2075_v52  ;;  %v4113_v1 = vpack.c.bf16 %v4057_v27, %v4056_v14  ;;  %v5081_v11 = vmul.f32 -1.442695, %v7126_v5  ;;  %v7147_v31 = vpop.f32.mrf.mxu3  ;;  %v4053_v43 = vmul.f32 %v3989_v49, %v6943_v41  ;;  %v921_v41 = vld [vmem:[%s6274_s19 + $0x1a0] sm:$0xff] }
 0x286   : > { %v6005_v8 = vpop.eup %6004  ;;  %v7135_v25 = vadd.f32 1.0, %v6003_v39  ;;  %v4112_v62 = vpack.c.bf16 %v4055_v51, %v4054_v3  ;;  %v4052_v52 = vmul.f32 %v3988_v45, %v6918_v15 }
 0x287   : > { %v2080_v33 = vsel %vm2079_vm8, %v6001_v18, %v2076_v47  ;;  %v2088_v55 = vmul.f32 %v6005_v8, %v7103_v38  ;;  %6006 = vpow2.f32 %v5081_v11  ;;  %5033 = vmatmul.msk.f32.gmra.mxu0 %vm934_vm1, %v920_v35  ;;  %vm2093_vm10 = vweird.f32 %v6005_v8  ;;  %v3055_v38 = vld [vmem:[%s6279_s26 + $0x128] sm:$0xff] }
 0x288   : > { %v2085_v57 = vsel %vm2082_vm9, %v2084_v10, %v2080_v33  ;;  %6008 = vrcp.f32 %v7135_v25  ;;  %4474 = vmatpush.bf16.msra.mxu0 %v4113_v1  ;;  %v2874_v50 = vpop.f32.mrf.mxu1  ;;  %v4051_v35 = vmul.f32 %v3987_v54, %v6892_v44  ;;  %v4111_v39 = vpack.c.bf16 %v4053_v43, %v4052_v52  ;;  %vm2094_vm12 = vmor %vm2092_vm11, %vm2093_vm10 }
 0x289   : > { %v2584_v18 = vmul.f32 %v2085_v57, %v7061_v29  ;;  %v2089_v13 = vsub.f32 1.0, %v2088_v55  ;;  %v3994_v28 = vmul.f32 %v7032_v30, %v2874_v50  ;;  %v7158_v30 = vpop.f32.mrf.mxu2  ;;  %v2099_v47 = vor.u32 1.1754944e-38, %v2098_v34 }
 0x28a   : > { %v4110_v55 = vpack.c.bf16 %v4051_v35, %v6966_v26  ;;  %v2113_v12 = vand.u32 2147483648, %v7135_v25  ;;  %v2111_v3 = vand.u32 2147483647, %v7135_v25  ;;  %vm2107_vm15 = vweird.f32 %v7135_v25 }
 0x28b   : > { %v2090_v36 = vmul.f32 %v6005_v8, %v2089_v13  ;;  %v7155_v29 = vmul.f32 %v3994_v28, %v7059_v7  ;;  %5142 = vmatmul.msk.f32.gmra.mxu1 %vm934_vm1, %v2584_v18  ;;  %3912 = vmatmul.bf16.gmra.mxu3 %v5550_v24 }
 0x28c   : > { %4475 = vmatpush.bf16.msra.mxu0 %v4112_v62  ;;  %v7161_v9 = vpop.f32.mrf.mxu0  ;;  %5212 = vmatmul.msk.f32.gmra.mxu2 %vm3083_vm3, %v3055_v38  ;;  %v2114_v54 = vor.u32 1.1754944e-38, %v2113_v12  ;;  %vm2112_vm2 = vcmp.eq.f32.partialorder %v2111_v3, 8.507059e+37 }
 0x28d   : > { %v6007_v14 = vpop.eup %6006  ;;  %v2091_v27 = vadd.f32 %v6005_v8, %v2090_v36  ;;  %v5082_v32 = vmul.f32 -1.442695, %v7161_v9  ;;  %v7178_v33 = vpop.f32.mrf.mxu3  ;;  %v3056_v36 = vld [vmem:[%s6279_s26 + $0x130] sm:$0xff] }
 0x28e   : > { %v6009_v7 = vpop.eup %6008  ;;  %v7169_v15 = vadd.f32 1.0, %v6007_v14 }
 0x28f   : > { %v2095_v1 = vsel %vm2094_vm12, %v6005_v8, %v2091_v27  ;;  %v2103_v11 = vmul.f32 %v6009_v7, %v7135_v25  ;;  %6010 = vpow2.f32 %v5082_v32  ;;  %5034 = vmatmul.msk.f32.gmra.mxu0 %vm934_vm1, %v921_v41  ;;  %vm2108_vm14 = vweird.f32 %v6009_v7 }
 0x290   : > { %v2100_v49 = vsel %vm2097_vm13, %v2099_v47, %v2095_v1  ;;  %6012 = vrcp.f32 %v7169_v15  ;;  %4476 = vmatpush.bf16.msra.mxu0 %v4111_v39  ;;  %v2877_v44 = vpop.f32.mrf.mxu1  ;;  %vm2109_vm0 = vmor %vm2107_vm15, %vm2108_vm14  ;;  %v2128_v27 = vand.u32 2147483648, %v7169_v15  ;;  %vm2122_vm5 = vweird.f32 %v7169_v15 }
 0x291   : > { %v2585_v10 = vmul.f32 %v2100_v49, %v7081_v21  ;;  %v2104_v51 = vsub.f32 1.0, %v2103_v11  ;;  %v3995_v8 = vmul.f32 %v7054_v16, %v2877_v44  ;;  %v7187_v50 = vpop.f32.mrf.mxu2  ;;  %v922_v16 = vld [vmem:[%s6274_s19 + $0x1a8] sm:$0xff] }
 0x292   : > { %v2129_v1 = vor.u32 1.1754944e-38, %v2128_v27 }
 0x293   : > { %v2105_v45 = vmul.f32 %v6009_v7, %v2104_v51  ;;  %v7184_v57 = vmul.f32 %v3995_v8, %v7079_v20  ;;  %5143 = vmatmul.msk.f32.gmra.mxu1 %vm934_vm1, %v2585_v10 }
 0x294   : > { %4477 = vmatpush.bf16.msra.mxu0 %v4110_v55  ;;  %v7189_v21 = vpop.f32.mrf.mxu0  ;;  %5213 = vmatmul.msk.f32.gmra.mxu2 %vm3083_vm3, %v3056_v36 }
 0x295   : > { %v6011_v18 = vpop.eup %6010  ;;  %v2106_v26 = vadd.f32 %v6009_v7, %v2105_v45  ;;  %v4114_v13 = vpack.c.bf16 %v7184_v57, %v7155_v29  ;;  %v5083_v28 = vmul.f32 -1.442695, %v7189_v21  ;;  %v7208_v14 = vpop.f32.mrf.mxu3  ;;  %v3074_v57 = vld [vmem:[%s6279_s26 + $0x1c0] sm:$0xff] }
 0x296   : > { %v6013_v20 = vpop.eup %6012  ;;  %v7196_v43 = vadd.f32 1.0, %v6011_v18 }
 0x297   : > { %v2110_v62 = vsel %vm2109_vm0, %v6009_v7, %v2106_v26  ;;  %v2118_v34 = vmul.f32 %v6013_v20, %v7169_v15  ;;  %6014 = vpow2.f32 %v5083_v28  ;;  %5035 = vmatmul.msk.f32.gmra.mxu0 %vm934_vm1, %v922_v16  ;;  %vm2123_vm4 = vweird.f32 %v6013_v20 }
 0x298   : > { %v2115_v19 = vsel %vm2112_vm2, %v2114_v54, %v2110_v62  ;;  %6016 = vrcp.f32 %v7196_v43  ;;  %4478 = vmatpush.bf16.msra.mxu0 %v4109_v23  ;;  %v2880_v25 = vpop.f32.mrf.mxu1  ;;  %v2126_v7 = vand.u32 2147483647, %v7169_v15  ;;  %vm2124_vm6 = vmor %vm2122_vm5, %vm2123_vm4  ;;  %v2143_v8 = vand.u32 2147483648, %v7196_v43 }
 0x299   : > { %v2586_v52 = vmul.f32 %v2115_v19, %v7098_v53  ;;  %v2119_v41 = vsub.f32 1.0, %v2118_v34  ;;  %v3996_v24 = vmul.f32 %v7074_v6, %v2880_v25  ;;  %v7216_v40 = vpop.f32.mrf.mxu2  ;;  %v923_v6 = vld [vmem:[%s6274_s19 + $0x1b0] sm:$0xff]  ;;  %v5551_v53 = vld [vmem:[%s6284_s28 + $0xa0] sm:$0xff]  ;;  %v2141_v12 = vand.u32 2147483647, %v7196_v43 }
 0x29a   : > { %vm2127_vm7 = vcmp.eq.f32.partialorder %v2126_v7, 8.507059e+37  ;;  %vm2137_vm9 = vweird.f32 %v7196_v43  ;;  %v2144_v18 = vor.u32 1.1754944e-38, %v2143_v8 }
 0x29b   : > { %v2120_v32 = vmul.f32 %v6013_v20, %v2119_v41  ;;  %v7213_v60 = vmul.f32 %v3996_v24, %v7096_v59  ;;  %5144 = vmatmul.msk.f32.gmra.mxu1 %vm934_vm1, %v2586_v52  ;;  %3917 = vmatmul.bf16.gmra.mxu3 %v5551_v53  ;;  %vm2142_vm11 = vcmp.eq.f32.partialorder %v2141_v12, 8.507059e+37 }
 0x29c   : > { %4479 = vmatpush.bf16.msra.mxu0 %v4108_v46  ;;  %v7221_v23 = vpop.f32.mrf.mxu0  ;;  %5214 = vmatmul.msk.f32.gmra.mxu2 %vm3083_vm3, %v3057_v42 }
 0x29d   : > { %v6015_v35 = vpop.eup %6014  ;;  %v2121_v39 = vadd.f32 %v6013_v20, %v2120_v32  ;;  %v5084_v59 = vmul.f32 -1.442695, %v7221_v23  ;;  %v7239_v51 = vpop.f32.mrf.mxu3 }
 0x29e   : > { %v6017_v47 = vpop.eup %6016  ;;  %v7227_v11 = vadd.f32 1.0, %v6015_v35 }
 0x29f   : > { %v2125_v38 = vsel %vm2124_vm6, %v6013_v20, %v2121_v39  ;;  %v2133_v17 = vmul.f32 %v6017_v47, %v7196_v43  ;;  %6018 = vpow2.f32 %v5084_v59  ;;  %5036 = vmatmul.msk.f32.gmra.mxu0 %vm934_vm1, %v923_v6  ;;  %vm2138_vm8 = vweird.f32 %v6017_v47  ;;  %v3059_v59 = vld [vmem:[%s6279_s26 + $0x148] sm:$0xff] }
 0x2a0   : > { %v2130_v46 = vsel %vm2127_vm7, %v2129_v1, %v2125_v38  ;;  %6020 = vrcp.f32 %v7227_v11  ;;  %4480 = vmatpush.bf16.msra.mxu0 %v4107_v56  ;;  %v2883_v15 = vpop.f32.mrf.mxu1  ;;  %vm2139_vm10 = vmor %vm2137_vm9, %vm2138_vm8  ;;  %v2158_v36 = vand.u32 2147483648, %v7227_v11  ;;  %v2156_v25 = vand.u32 2147483647, %v7227_v11 }
 0x2a1   : > { %v2587_v49 = vmul.f32 %v2130_v46, %v7126_v5  ;;  %v2134_v44 = vsub.f32 1.0, %v2133_v17  ;;  %v3997_v10 = vmul.f32 %v7093_v63, %v2883_v15  ;;  %v7247_v48 = vpop.f32.mrf.mxu2  ;;  %v924_v63 = vld [vmem:[%s6274_s19 + $0x1b8] sm:$0xff]  ;;  %vm2152_vm13 = vweird.f32 %v7227_v11 }
 0x2a2   : > { %v2159_v53 = vor.u32 1.1754944e-38, %v2158_v36  ;;  %vm2157_vm15 = vcmp.eq.f32.partialorder %v2156_v25, 8.507059e+37 }
 0x2a3   : > { %v2135_v55 = vmul.f32 %v6017_v47, %v2134_v44  ;;  %v7244_v22 = vmul.f32 %v3997_v10, %v7122_v58  ;;  %5145 = vmatmul.msk.f32.gmra.mxu1 %vm934_vm1, %v2587_v49 }
 0x2a4   : > { %4481 = vmatpush.bf16.msra.mxu0 %v4106_v0  ;;  %v7252_v56 = vpop.f32.mrf.mxu0  ;;  %v3058_v0 = vld [vmem:[%s6279_s26 + $0x140] sm:$0xff] }
 0x2a5   : > { %v6019_v5 = vpop.eup %6018  ;;  %v2136_v45 = vadd.f32 %v6017_v47, %v2135_v55  ;;  %v4115_v58 = vpack.c.bf16 %v7244_v22, %v7213_v60  ;;  %v5085_v3 = vmul.f32 -1.442695, %v7252_v56  ;;  %5215 = vmatmul.msk.f32.gmra.mxu2 %vm3083_vm3, %v3058_v0  ;;  %v7268_v34 = vpop.f32.mrf.mxu3 }
 0x2a6   : > { %v6021_v16 = vpop.eup %6020  ;;  %v7259_v26 = vadd.f32 1.0, %v6019_v5 }
 0x2a7   : > { %v2140_v37 = vsel %vm2139_vm10, %v6017_v47, %v2136_v45  ;;  %v2148_v61 = vmul.f32 %v6021_v16, %v7227_v11  ;;  %6022 = vpow2.f32 %v5085_v3  ;;  %5037 = vmatmul.msk.f32.gmra.mxu0 %vm934_vm1, %v924_v63  ;;  %vm2153_vm12 = vweird.f32 %v6021_v16 }
 0x2a8   : > { %v2145_v28 = vsel %vm2142_vm11, %v2144_v18, %v2140_v37  ;;  %6024 = vrcp.f32 %v7259_v26  ;;  %v2886_v20 = vpop.f32.mrf.mxu1  ;;  %vm2154_vm14 = vmor %vm2152_vm13, %vm2153_vm12  ;;  %v2173_v46 = vand.u32 2147483648, %v7259_v26  ;;  %v2171_v49 = vand.u32 2147483647, %v7259_v26  ;;  %v3060_v18 = vld [vmem:[%s6279_s26 + $0x150] sm:$0xff] }
 0x2a9   : > { %v2588_v54 = vmul.f32 %v2145_v28, %v7161_v9  ;;  %v2149_v43 = vsub.f32 1.0, %v2148_v61  ;;  %v3998_v62 = vmul.f32 %v7113_v4, %v2886_v20  ;;  %v7276_v41 = vpop.f32.mrf.mxu2  ;;  %v925_v9 = vld [vmem:[%s6274_s19 + $0x1c0] sm:$0xff]  ;;  %v5552_v4 = vld [vmem:[%s6284_s28 + $0xa8] sm:$0xff]  ;;  %vm2167_vm2 = vweird.f32 %v7259_v26 }
 0x2aa   : > { %vm2172_vm5 = vcmp.eq.f32.partialorder %v2171_v49, 8.507059e+37 }
 0x2ab   : > { %v2150_v19 = vmul.f32 %v6021_v16, %v2149_v43  ;;  %v7273_v52 = vmul.f32 %v3998_v62, %v7158_v30  ;;  %5146 = vmatmul.msk.f32.gmra.mxu1 %vm934_vm1, %v2588_v54  ;;  %3922 = vmatmul.bf16.gmra.mxu3 %v5552_v4 }
 0x2ac   : > { %v7278_v24 = vpop.f32.mrf.mxu0 }
 0x2ad   : > { %v6023_v27 = vpop.eup %6022  ;;  %v2151_v32 = vadd.f32 %v6021_v16, %v2150_v19  ;;  %v5086_v7 = vmul.f32 -1.442695, %v7278_v24  ;;  %5216 = vmatmul.msk.f32.gmra.mxu2 %vm3083_vm3, %v3059_v59  ;;  %v7293_v42 = vpop.f32.mrf.mxu3 }
 0x2ae   : > { %v6025_v6 = vpop.eup %6024  ;;  %v7284_v30 = vadd.f32 1.0, %v6023_v27 }
 0x2af   : > { %v2155_v35 = vsel %vm2154_vm14, %v6021_v16, %v2151_v32  ;;  %v2163_v39 = vmul.f32 %v6025_v6, %v7259_v26  ;;  %6026 = vpow2.f32 %v5086_v7  ;;  %5038 = vmatmul.msk.f32.gmra.mxu0 %vm934_vm1, %v925_v9  ;;  %vm2168_vm0 = vweird.f32 %v6025_v6 }
 0x2b0   : > { %v2160_v47 = vsel %vm2157_vm15, %v2159_v53, %v2155_v35  ;;  %6028 = vrcp.f32 %v7284_v30  ;;  %v2889_v1 = vpop.f32.mrf.mxu1  ;;  %vm2169_vm4 = vmor %vm2167_vm2, %vm2168_vm0  ;;  %v2188_v54 = vand.u32 2147483648, %v7284_v30  ;;  %v2186_v62 = vand.u32 2147483647, %v7284_v30  ;;  %v3061_v35 = vld [vmem:[%s6279_s26 + $0x158] sm:$0xff] }
 0x2b1   : > { %v2589_v11 = vmul.f32 %v2160_v47, %v7189_v21  ;;  %v2164_v38 = vsub.f32 1.0, %v2163_v39  ;;  %v3999_v17 = vmul.f32 %v7147_v31, %v2889_v1  ;;  %v7301_v10 = vpop.f32.mrf.mxu2  ;;  %v926_v21 = vld [vmem:[%s6274_s19 + $0x1c8] sm:$0xff]  ;;  %vm2182_vm7 = vweird.f32 %v7284_v30 }
 0x2b2   : > { %v2189_v7 = vor.u32 1.1754944e-38, %v2188_v54  ;;  %vm2187_vm9 = vcmp.eq.f32.partialorder %v2186_v62, 8.507059e+37 }
 0x2b3   : > { %v2165_v15 = vmul.f32 %v6025_v6, %v2164_v38  ;;  %v7298_v44 = vmul.f32 %v3999_v17, %v7187_v50  ;;  %5147 = vmatmul.msk.f32.gmra.mxu1 %vm934_vm1, %v2589_v11  ;;  %v2174_v50 = vor.u32 1.1754944e-38, %v2173_v46 }
 0x2b4   : > { %v7303_v8 = vpop.f32.mrf.mxu0 }
 0x2b5   : > { %v6027_v31 = vpop.eup %6026  ;;  %v2166_v55 = vadd.f32 %v6025_v6, %v2165_v15  ;;  %v4116_v12 = vpack.c.bf16 %v7298_v44, %v7273_v52  ;;  %v5087_v63 = vmul.f32 -1.442695, %v7303_v8  ;;  %5217 = vmatmul.msk.f32.gmra.mxu2 %vm3083_vm3, %v3060_v18  ;;  %v7319_v20 = vpop.f32.mrf.mxu3  ;;  %v3062_v18 = vld [vmem:[%s6279_s26 + $0x160] sm:$0xff]  ;;  %v3073_v44 = vld [vmem:[%s6279_s26 + $0x1b8] sm:$0xff] }
 0x2b6   : > { %v6029_v5 = vpop.eup %6028  ;;  %v7310_v45 = vadd.f32 1.0, %v6027_v31 }
 0x2b7   : > { %v2170_v3 = vsel %vm2169_vm4, %v6025_v6, %v2166_v55  ;;  %v2178_v16 = vmul.f32 %v6029_v5, %v7284_v30  ;;  %6030 = vpow2.f32 %v5087_v63  ;;  %5039 = vmatmul.msk.f32.gmra.mxu0 %vm934_vm1, %v926_v21  ;;  %vm2183_vm6 = vweird.f32 %v6029_v5 }
 0x2b8   : > { %v2175_v37 = vsel %vm2172_vm5, %v2174_v50, %v2170_v3  ;;  %6032 = vrcp.f32 %v7310_v45  ;;  %v2892_v26 = vpop.f32.mrf.mxu1  ;;  %vm2184_vm8 = vmor %vm2182_vm7, %vm2183_vm6  ;;  %v2203_v38 = vand.u32 2147483648, %v7310_v45  ;;  %v2201_v46 = vand.u32 2147483647, %v7310_v45 }
 0x2b9   : > { %v2590_v61 = vmul.f32 %v2175_v37, %v7221_v23  ;;  %v2179_v0 = vsub.f32 1.0, %v2178_v16  ;;  %v4000_v28 = vmul.f32 %v7178_v33, %v2892_v26  ;;  %v7327_v19 = vpop.f32.mrf.mxu2  ;;  %v927_v23 = vld [vmem:[%s6274_s19 + $0x1d0] sm:$0xff]  ;;  %vm2197_vm11 = vweird.f32 %v7310_v45 }
 0x2ba   : > { %v5553_v33 = vld [vmem:[%s6284_s28 + $0xb0] sm:$0xff]  ;;  %vm2202_vm13 = vcmp.eq.f32.partialorder %v2201_v46, 8.507059e+37 }
 0x2bb   : > { %v2180_v43 = vmul.f32 %v6029_v5, %v2179_v0  ;;  %v7324_v36 = vmul.f32 %v4000_v28, %v7216_v40  ;;  %5148 = vmatmul.msk.f32.gmra.mxu1 %vm934_vm1, %v2590_v61  ;;  %3927 = vmatmul.bf16.gmra.mxu3 %v5553_v33 }
 0x2bc   : > { %v7329_v25 = vpop.f32.mrf.mxu0 }
 0x2bd   : > { %v6031_v9 = vpop.eup %6030  ;;  %v2181_v4 = vadd.f32 %v6029_v5, %v2180_v43  ;;  %v5088_v27 = vmul.f32 -1.442695, %v7329_v25  ;;  %5218 = vmatmul.msk.f32.gmra.mxu2 %vm3083_vm3, %v3061_v35 }
 0x2be   : > { %v6033_v32 = vpop.eup %6032  ;;  %v7335_v40 = vadd.f32 1.0, %v6031_v9  ;;  %v7344_v11 = vpop.f32.mrf.mxu3 }
 0x2bf   : > { %v2185_v6 = vsel %vm2184_vm8, %v6029_v5, %v2181_v4  ;;  %v2193_v53 = vmul.f32 %v6033_v32, %v7310_v45  ;;  %6034 = vpow2.f32 %v5088_v27  ;;  %5040 = vmatmul.msk.f32.gmra.mxu0 %vm934_vm1, %v927_v23  ;;  %vm2198_vm10 = vweird.f32 %v6033_v32 }
 0x2c0   : > { %v2190_v39 = vsel %vm2187_vm9, %v2189_v7, %v2185_v6  ;;  %6036 = vrcp.f32 %v7335_v40  ;;  %v2895_v30 = vpop.f32.mrf.mxu1  ;;  %vm2199_vm12 = vmor %vm2197_vm11, %vm2198_vm10  ;;  %v2218_v54 = vand.u32 2147483648, %v7335_v40  ;;  %v2216_v62 = vand.u32 2147483647, %v7335_v40 }
 0x2c1   : > { %v2591_v59 = vmul.f32 %v2190_v39, %v7252_v56  ;;  %v2194_v47 = vsub.f32 1.0, %v2193_v53  ;;  %v4001_v1 = vmul.f32 %v7208_v14, %v2895_v30  ;;  %v7352_v49 = vpop.f32.mrf.mxu2  ;;  %v928_v56 = vld [vmem:[%s6274_s19 + $0x1d8] sm:$0xff]  ;;  %vm2212_vm15 = vweird.f32 %v7335_v40  ;;  %v3063_v39 = vld [vmem:[%s6279_s26 + $0x168] sm:$0xff] }
 0x2c2   : > { %v2219_v6 = vor.u32 1.1754944e-38, %v2218_v54  ;;  %vm2217_vm2 = vcmp.eq.f32.partialorder %v2216_v62, 8.507059e+37 }
 0x2c3   : > { %v2195_v17 = vmul.f32 %v6033_v32, %v2194_v47  ;;  %v7349_v15 = vmul.f32 %v4001_v1, %v7247_v48  ;;  %5149 = vmatmul.msk.f32.gmra.mxu1 %vm934_vm1, %v2591_v59  ;;  %v2204_v48 = vor.u32 1.1754944e-38, %v2203_v38 }
 0x2c4   : > { %v7354_v21 = vpop.f32.mrf.mxu0 }
 0x2c5   : > { %v6035_v14 = vpop.eup %6034  ;;  %v2196_v31 = vadd.f32 %v6033_v32, %v2195_v17  ;;  %v4117_v55 = vpack.c.bf16 %v7349_v15, %v7324_v36  ;;  %v5089_v63 = vmul.f32 -1.442695, %v7354_v21  ;;  %5219 = vmatmul.msk.f32.gmra.mxu2 %vm3083_vm3, %v3062_v18 }
 0x2c6   : > { %v6037_v5 = vpop.eup %6036  ;;  %v7361_v50 = vadd.f32 1.0, %v6035_v14  ;;  %v7370_v28 = vpop.f32.mrf.mxu3 }
 0x2c7   : > { %v2200_v3 = vsel %vm2199_vm12, %v6033_v32, %v2196_v31  ;;  %v2208_v16 = vmul.f32 %v6037_v5, %v7335_v40  ;;  %6038 = vpow2.f32 %v5089_v63  ;;  %5041 = vmatmul.msk.f32.gmra.mxu0 %vm934_vm1, %v928_v56  ;;  %vm2213_vm14 = vweird.f32 %v6037_v5  ;;  %v930_v31 = vld [vmem:[%s6274_s19 + $0x1e8] sm:$0xff] }
 0x2c8   : > { %v2205_v37 = vsel %vm2202_vm13, %v2204_v48, %v2200_v3  ;;  %6040 = vrcp.f32 %v7361_v50  ;;  %v2898_v45 = vpop.f32.mrf.mxu1  ;;  %vm2214_vm0 = vmor %vm2212_vm15, %vm2213_vm14  ;;  %v2233_v38 = vand.u32 2147483648, %v7361_v50  ;;  %v2231_v46 = vand.u32 2147483647, %v7361_v50 }
 0x2c9   : > { %v2592_v26 = vmul.f32 %v2205_v37, %v7278_v24  ;;  %v2209_v61 = vsub.f32 1.0, %v2208_v16  ;;  %v4002_v0 = vmul.f32 %v7239_v51, %v2898_v45  ;;  %v7378_v33 = vpop.f32.mrf.mxu2  ;;  %v929_v24 = vld [vmem:[%s6274_s19 + $0x1e0] sm:$0xff]  ;;  %v5554_v51 = vld [vmem:[%s6284_s28 + $0xb8] sm:$0xff]  ;;  %vm2227_vm5 = vweird.f32 %v7361_v50  ;;  %v3064_v45 = vld [vmem:[%s6279_s26 + $0x170] sm:$0xff] }
 0x2ca   : > { %v2234_v3 = vor.u32 1.1754944e-38, %v2233_v38  ;;  %vm2232_vm7 = vcmp.eq.f32.partialorder %v2231_v46, 8.507059e+37 }
 0x2cb   : > { %v2210_v43 = vmul.f32 %v6037_v5, %v2209_v61  ;;  %v7375_v23 = vmul.f32 %v4002_v0, %v7276_v41  ;;  %5150 = vmatmul.msk.f32.gmra.mxu1 %vm934_vm1, %v2592_v26  ;;  %3932 = vmatmul.bf16.gmra.mxu3 %v5554_v51 }
 0x2cc   : > { %v7380_v9 = vpop.f32.mrf.mxu0 }
 0x2cd   : > { %v6039_v4 = vpop.eup %6038  ;;  %v2211_v27 = vadd.f32 %v6037_v5, %v2210_v43  ;;  %v5090_v32 = vmul.f32 -1.442695, %v7380_v9  ;;  %5220 = vmatmul.msk.f32.gmra.mxu2 %vm3083_vm3, %v3063_v39 }
 0x2ce   : > { %v6041_v7 = vpop.eup %6040  ;;  %v7386_v41 = vadd.f32 1.0, %v6039_v4  ;;  %v7396_v1 = vpop.f32.mrf.mxu3 }
 0x2cf   : > { %v2215_v53 = vsel %vm2214_vm0, %v6037_v5, %v2211_v27  ;;  %v2223_v35 = vmul.f32 %v6041_v7, %v7361_v50  ;;  %6042 = vpow2.f32 %v5090_v32  ;;  %5042 = vmatmul.msk.f32.gmra.mxu0 %vm934_vm1, %v929_v24  ;;  %vm2228_vm4 = vweird.f32 %v6041_v7  ;;  %v931_v27 = vld [vmem:[%s6274_s19 + $0x1f0] sm:$0xff]  ;;  %v5555_v32 = vld [vmem:[%s6284_s28 + $0xc0] sm:$0xff] }
 0x2d0   : > { %v2220_v30 = vsel %vm2217_vm2, %v2219_v6, %v2215_v53  ;;  %6044 = vrcp.f32 %v7386_v41  ;;  %v7392_v40 = vpop.f32.mrf.mxu1  ;;  %vm2229_vm6 = vmor %vm2227_vm5, %vm2228_vm4  ;;  %v2248_v43 = vand.u32 2147483648, %v7386_v41  ;;  %v2246_v24 = vand.u32 2147483647, %v7386_v41 }
 0x2d1   : > { %v2593_v59 = vmul.f32 %v2220_v30, %v7303_v8  ;;  %v2224_v47 = vsub.f32 1.0, %v2223_v35  ;;  %v7401_v56 = vpop.f32.mrf.mxu2  ;;  %vm2242_vm9 = vweird.f32 %v7386_v41 }
 0x2d2   : > { %v2249_v35 = vor.u32 1.1754944e-38, %v2248_v43  ;;  %vm2247_vm11 = vcmp.eq.f32.partialorder %v2246_v24, 8.507059e+37 }
 0x2d3   : > { %v2225_v17 = vmul.f32 %v6041_v7, %v2224_v47  ;;  %5151 = vmatmul.msk.f32.gmra.mxu1 %vm934_vm1, %v2593_v59  ;;  %v3065_v47 = vld [vmem:[%s6279_s26 + $0x178] sm:$0xff] }
 0x2d4   : > { %v7403_v14 = vpop.f32.mrf.mxu0 }
 0x2d5   : > { %v6043_v63 = vpop.eup %6042  ;;  %v2226_v5 = vadd.f32 %v6041_v7, %v2225_v17  ;;  %v5091_v8 = vmul.f32 -1.442695, %v7403_v14  ;;  %5221 = vmatmul.msk.f32.gmra.mxu2 %vm3083_vm3, %v3064_v45 }
 0x2d6   : > { %v6045_v48 = vpop.eup %6044  ;;  %v1572_v16 = vadd.f32 1.0, %v6043_v63  ;;  %v7415_v54 = vpop.f32.mrf.mxu3 }
 0x2d7   : > { %v2230_v18 = vsel %vm2229_vm6, %v6041_v7, %v2226_v5  ;;  %v2238_v37 = vmul.f32 %v6045_v48, %v7386_v41  ;;  %6046 = vpow2.f32 %v5091_v8  ;;  %5043 = vmatmul.msk.f32.gmra.mxu0 %vm934_vm1, %v930_v31  ;;  %vm2243_vm8 = vweird.f32 %v6045_v48 }
 0x2d8   : > { %v2235_v26 = vsel %vm2232_vm7, %v2234_v3, %v2230_v18  ;;  %6048 = vrcp.f32 %v1572_v16  ;;  %v7411_v61 = vpop.f32.mrf.mxu1  ;;  %vm2244_vm10 = vmor %vm2242_vm9, %vm2243_vm8  ;;  %v2263_v63 = vand.u32 2147483648, %v1572_v16  ;;  %v2261_v8 = vand.u32 2147483647, %v1572_v16 }
 0x2d9   : > { %v2594_v50 = vmul.f32 %v2235_v26, %v7329_v25  ;;  %v2239_v0 = vsub.f32 1.0, %v2238_v37  ;;  %v7420_v51 = vpop.f32.mrf.mxu2  ;;  %vm2257_vm13 = vweird.f32 %v1572_v16 }
 0x2da   : > { %v2264_v26 = vor.u32 1.1754944e-38, %v2263_v63  ;;  %vm2262_vm15 = vcmp.eq.f32.partialorder %v2261_v8, 8.507059e+37 }
 0x2db   : > { %v2240_v62 = vmul.f32 %v6045_v48, %v2239_v0  ;;  %5152 = vmatmul.msk.f32.gmra.mxu1 %vm934_vm1, %v2594_v50  ;;  %3937 = vmatmul.bf16.gmra.mxu3 %v5555_v32 }
 0x2dc   : > { %v7422_v4 = vpop.f32.mrf.mxu0 }
 0x2dd   : > { %v6047_v7 = vpop.eup %6046  ;;  %v2241_v25 = vadd.f32 %v6045_v48, %v2240_v62  ;;  %v5092_v6 = vmul.f32 -1.442695, %v7422_v4  ;;  %5222 = vmatmul.msk.f32.gmra.mxu2 %vm3083_vm3, %v3065_v47  ;;  %v3066_v62 = vld [vmem:[%s6279_s26 + $0x180] sm:$0xff] }
 0x2de   : > { %v6049_v53 = vpop.eup %6048  ;;  %v1573_v39 = vadd.f32 1.0, %v6047_v7  ;;  %v7434_v31 = vpop.f32.mrf.mxu3 }
 0x2df   : > { %v2245_v30 = vsel %vm2244_vm10, %v6045_v48, %v2241_v25  ;;  %v2253_v59 = vmul.f32 %v6049_v53, %v1572_v16  ;;  %6050 = vpow2.f32 %v5092_v6  ;;  %5044 = vmatmul.msk.f32.gmra.mxu0 %vm934_vm1, %v931_v27  ;;  %vm2258_vm12 = vweird.f32 %v6049_v53 }
 0x2e0   : > { %v2250_v38 = vsel %vm2247_vm11, %v2249_v35, %v2245_v30  ;;  %6052 = vrcp.f32 %v1573_v39  ;;  %v7430_v17 = vpop.f32.mrf.mxu1  ;;  %vm2259_vm14 = vmor %vm2257_vm13, %vm2258_vm12  ;;  %v2278_v25 = vand.u32 2147483648, %v1573_v39  ;;  %vm2272_vm2 = vweird.f32 %v1573_v39 }
 0x2e1   : > { %v2595_v41 = vmul.f32 %v2250_v38, %v7354_v21  ;;  %v2254_v46 = vsub.f32 1.0, %v2253_v59  ;;  %v7437_v48 = vpop.f32.mrf.mxu2  ;;  %v5556_v59 = vld [vmem:[%s6284_s28 + $0xc8] sm:$0xff] }
 0x2e3   : > { %v2255_v5 = vmul.f32 %v6049_v53, %v2254_v46  ;;  %5153 = vmatmul.msk.f32.gmra.mxu1 %vm934_vm1, %v2595_v41  ;;  %v2279_v46 = vor.u32 1.1754944e-38, %v2278_v25 }
 0x2e4   : > { %v7439_v3 = vpop.f32.mrf.mxu0 }
 0x2e5   : > { %v6051_v18 = vpop.eup %6050  ;;  %v2256_v37 = vadd.f32 %v6049_v53, %v2255_v5  ;;  %v5093_v45 = vmul.f32 -1.442695, %v7439_v3  ;;  %5223 = vmatmul.msk.f32.gmra.mxu2 %vm3083_vm3, %v3066_v62 }
 0x2e6   : > { %v6053_v21 = vpop.eup %6052  ;;  %v1574_v50 = vadd.f32 1.0, %v6051_v18  ;;  %v7447_v7 = vpop.f32.mrf.mxu3  ;;  %v3067_v18 = vld [vmem:[%s6279_s26 + $0x188] sm:$0xff] }
 0x2e7   : > { %v2260_v0 = vsel %vm2259_vm14, %v6049_v53, %v2256_v37  ;;  %v2268_v43 = vmul.f32 %v6053_v21, %v1573_v39  ;;  %6054 = vpow2.f32 %v5093_v45  ;;  %vm2273_vm0 = vweird.f32 %v6053_v21 }
 0x2e8   : > { %v2265_v24 = vsel %vm2262_vm15, %v2264_v26, %v2260_v0  ;;  %6056 = vrcp.f32 %v1574_v50  ;;  %v7443_v27 = vpop.f32.mrf.mxu1  ;;  %v2276_v53 = vand.u32 2147483647, %v1573_v39  ;;  %vm2274_vm4 = vmor %vm2272_vm2, %vm2273_vm0  ;;  %vm2287_vm7 = vweird.f32 %v1574_v50 }
 0x2e9   : > { %v2596_v16 = vmul.f32 %v2265_v24, %v7380_v9  ;;  %v2269_v32 = vsub.f32 1.0, %v2268_v43  ;;  %v7450_v35 = vpop.f32.mrf.mxu2  ;;  %v2293_v43 = vand.u32 2147483648, %v1574_v50  ;;  %v2291_v24 = vand.u32 2147483647, %v1574_v50 }
 0x2ea   : > { %vm2277_vm5 = vcmp.eq.f32.partialorder %v2276_v53, 8.507059e+37 }
 0x2eb   : > { %v2270_v6 = vmul.f32 %v6053_v21, %v2269_v32  ;;  %5154 = vmatmul.msk.f32.gmra.mxu1 %vm934_vm1, %v2596_v16  ;;  %3942 = vmatmul.bf16.gmra.mxu3 %v5556_v59  ;;  %v2294_v53 = vor.u32 1.1754944e-38, %v2293_v43  ;;  %vm2292_vm9 = vcmp.eq.f32.partialorder %v2291_v24, 8.507059e+37 }
 0x2ec   : > { %v7452_v30 = vpop.f32.mrf.mxu0 }
 0x2ed   : > { %v6055_v47 = vpop.eup %6054  ;;  %v2271_v38 = vadd.f32 %v6053_v21, %v2270_v6  ;;  %v5094_v9 = vmul.f32 -1.442695, %v7452_v30  ;;  %5224 = vmatmul.msk.f32.gmra.mxu2 %vm3083_vm3, %v3067_v18 }
 0x2ee   : > { %v6057_v41 = vpop.eup %6056  ;;  %v1575_v63 = vadd.f32 1.0, %v6055_v47  ;;  %v7461_v0 = vpop.f32.mrf.mxu3 }
 0x2ef   : > { %v2275_v5 = vsel %vm2274_vm4, %v6053_v21, %v2271_v38  ;;  %v2283_v8 = vmul.f32 %v6057_v41, %v1574_v50  ;;  %6058 = vpow2.f32 %v5094_v9  ;;  %vm2288_vm6 = vweird.f32 %v6057_v41  ;;  %v3068_v9 = vld [vmem:[%s6279_s26 + $0x190] sm:$0xff] }
 0x2f0   : > { %v2280_v37 = vsel %vm2277_vm5, %v2279_v46, %v2275_v5  ;;  %6060 = vrcp.f32 %v1575_v63  ;;  %v7457_v45 = vpop.f32.mrf.mxu1  ;;  %vm2289_vm8 = vmor %vm2287_vm7, %vm2288_vm6  ;;  %vm2302_vm11 = vweird.f32 %v1575_v63 }
 0x2f1   : > { %v2597_v39 = vmul.f32 %v2280_v37, %v7403_v14  ;;  %v2284_v26 = vsub.f32 1.0, %v2283_v8  ;;  %v7464_v21 = vpop.f32.mrf.mxu2  ;;  %v2306_v37 = vand.u32 2147483647, %v1575_v63 }
 0x2f3   : > { %v2285_v62 = vmul.f32 %v6057_v41, %v2284_v26  ;;  %5155 = vmatmul.msk.f32.gmra.mxu1 %vm934_vm1, %v2597_v39  ;;  %v2308_v39 = vand.u32 2147483648, %v1575_v63  ;;  %vm2307_vm13 = vcmp.eq.f32.partialorder %v2306_v37, 8.507059e+37 }
 0x2f4   : > { %v7466_v16 = vpop.f32.mrf.mxu0 }
 0x2f5   : > { %v6059_v32 = vpop.eup %6058  ;;  %v2286_v25 = vadd.f32 %v6057_v41, %v2285_v62  ;;  %v5095_v6 = vmul.f32 -1.442695, %v7466_v16  ;;  %5225 = vmatmul.msk.f32.gmra.mxu2 %vm3083_vm3, %v3068_v9  ;;  %v5557_v62 = vld [vmem:[%s6284_s28 + $0xd0] sm:$0xff] }
 0x2f6   : > { %v6061_v14 = vpop.eup %6060  ;;  %v7469_v59 = vadd.f32 1.0, %v6059_v32  ;;  %v7475_v18 = vpop.f32.mrf.mxu3 }
 0x2f7   : > { %v2290_v47 = vsel %vm2289_vm8, %v6057_v41, %v2286_v25  ;;  %v2298_v38 = vmul.f32 %v6061_v14, %v1575_v63  ;;  %6062 = vpow2.f32 %v5095_v6  ;;  %vm2303_vm10 = vweird.f32 %v6061_v14 }
 0x2f8   : > { %v2295_v46 = vsel %vm2292_vm9, %v2294_v53, %v2290_v47  ;;  %6064 = vrcp.f32 %v7469_v59  ;;  %v2916_v5 = vpop.f32.mrf.mxu1  ;;  %vm2304_vm12 = vmor %vm2302_vm11, %vm2303_vm10  ;;  %v2309_v6 = vor.u32 1.1754944e-38, %v2308_v39  ;;  %vm2317_vm15 = vweird.f32 %v7469_v59 }
 0x2f9   : > { %v2598_v50 = vmul.f32 %v2295_v46, %v7422_v4  ;;  %v2299_v8 = vsub.f32 1.0, %v2298_v38  ;;  %v7478_v41 = vpop.f32.mrf.mxu2  ;;  %v4008_v9 = vmul.f32 %v7396_v1, %v2916_v5  ;;  %v3069_v46 = vld [vmem:[%s6279_s26 + $0x198] sm:$0xff]  ;;  %v4007_v1 = vmul.f32 %v7370_v28, %v7457_v45 }
 0x2fb   : > { %v2300_v26 = vmul.f32 %v6061_v14, %v2299_v8  ;;  %5156 = vmatmul.msk.f32.gmra.mxu1 %vm934_vm1, %v2598_v50  ;;  %3947 = vmatmul.bf16.gmra.mxu3 %v5557_v62  ;;  %v2323_v62 = vand.u32 2147483648, %v7469_v59 }
 0x2fc   : > { %v7480_v43 = vpop.f32.mrf.mxu0 }
 0x2fd   : > { %v6063_v24 = vpop.eup %6062  ;;  %v2301_v32 = vadd.f32 %v6061_v14, %v2300_v26  ;;  %v5096_v4 = vmul.f32 -1.442695, %v7480_v43  ;;  %5226 = vmatmul.msk.f32.gmra.mxu2 %vm3083_vm3, %v3069_v46 }
 0x2fe   : > { %v6065_v25 = vpop.eup %6064  ;;  %v7484_v53 = vadd.f32 1.0, %v6063_v24  ;;  %v7493_v26 = vpop.f32.mrf.mxu3  ;;  %v4072_v24 = vmul.f32 %v4008_v9, %v7420_v51  ;;  %v4071_v9 = vmul.f32 %v4007_v1, %v7401_v56 }
 0x2ff   : > { %v2305_v47 = vsel %vm2304_vm12, %v6061_v14, %v2301_v32  ;;  %v2313_v38 = vmul.f32 %v6065_v25, %v7469_v59  ;;  %6066 = vpow2.f32 %v5096_v4  ;;  %v2321_v14 = vand.u32 2147483647, %v7469_v59  ;;  %v3070_v59 = vld [vmem:[%s6279_s26 + $0x1a0] sm:$0xff] }
 0x300   : > { %v2310_v50 = vsel %vm2307_vm13, %v2309_v6, %v2305_v47  ;;  %6068 = vrcp.f32 %v7484_v53  ;;  %v2919_v63 = vpop.f32.mrf.mxu1  ;;  %vm2318_vm14 = vweird.f32 %v6065_v25  ;;  %vm2332_vm5 = vweird.f32 %v7484_v53 }
 0x301   : > { %v2599_v8 = vmul.f32 %v2310_v50, %v7439_v3  ;;  %v2314_v37 = vsub.f32 1.0, %v2313_v38  ;;  %v4009_v39 = vmul.f32 %v7415_v54, %v2919_v63  ;;  %v7502_v3 = vpop.f32.mrf.mxu2  ;;  %v4006_v54 = vmul.f32 %v7344_v11, %v7443_v27  ;;  %vm2319_vm0 = vmor %vm2317_vm15, %vm2318_vm14 }
 0x302   : > { %v2324_v38 = vor.u32 1.1754944e-38, %v2323_v62  ;;  %vm2322_vm2 = vcmp.eq.f32.partialorder %v2321_v14, 8.507059e+37  ;;  %v4004_v50 = vmul.f32 %v7293_v42, %v7411_v61  ;;  %v2338_v61 = vand.u32 2147483648, %v7484_v53 }
 0x303   : > { %v2315_v5 = vmul.f32 %v6065_v25, %v2314_v37  ;;  %v4073_v32 = vmul.f32 %v4009_v39, %v7437_v48  ;;  %5157 = vmatmul.msk.f32.gmra.mxu1 %vm934_vm1, %v2599_v8  ;;  %v4005_v48 = vmul.f32 %v7319_v20, %v7430_v17  ;;  %v4070_v63 = vmul.f32 %v4006_v54, %v7378_v33 }
 0x304   : > { %v7506_v4 = vpop.f32.mrf.mxu0  ;;  %v4003_v39 = vmul.f32 %v7268_v34, %v7392_v40  ;;  %v2336_v62 = vand.u32 2147483647, %v7484_v53  ;;  %v4068_v1 = vmul.f32 %v4004_v50, %v7327_v19 }
 0x305   : > { %v6067_v6 = vpop.eup %6066  ;;  %v2316_v47 = vadd.f32 %v6065_v25, %v2315_v5  ;;  %v4121_v28 = vpack.c.bf16 %v4073_v32, %v4072_v24  ;;  %v5097_v45 = vmul.f32 -1.442695, %v7506_v4  ;;  %5227 = vmatmul.msk.f32.gmra.mxu2 %vm3083_vm3, %v3070_v59  ;;  %v4069_v42 = vmul.f32 %v4005_v48, %v7352_v49  ;;  %v5558_v49 = vld [vmem:[%s6284_s28 + $0xd8] sm:$0xff] }
 0x306   : > { %v6069_v51 = vpop.eup %6068  ;;  %v7513_v46 = vadd.f32 1.0, %v6067_v6  ;;  %v7524_v37 = vpop.f32.mrf.mxu3  ;;  %v4120_v33 = vpack.c.bf16 %v4071_v9, %v4070_v63  ;;  %v2339_v6 = vor.u32 1.1754944e-38, %v2338_v61  ;;  %vm2337_vm7 = vcmp.eq.f32.partialorder %v2336_v62, 8.507059e+37 }
 0x307   : > { %v2320_v11 = vsel %vm2319_vm0, %v6065_v25, %v2316_v47  ;;  %v2328_v27 = vmul.f32 %v6069_v51, %v7484_v53  ;;  %6070 = vpow2.f32 %v5097_v45  ;;  %4523 = vmatpush.bf16.msra.mxu1 %v4121_v28  ;;  %vm2333_vm4 = vweird.f32 %v6069_v51  ;;  %v3071_v45 = vld [vmem:[%s6279_s26 + $0x1a8] sm:$0xff] }
 0x308   : > { %v2325_v8 = vsel %vm2322_vm2, %v2324_v38, %v2320_v11  ;;  %6072 = vrcp.f32 %v7513_v46  ;;  %v2922_v20 = vpop.f32.mrf.mxu1  ;;  %v4119_v54 = vpack.c.bf16 %v4069_v42, %v4068_v1  ;;  %vm2334_vm6 = vmor %vm2332_vm5, %vm2333_vm4  ;;  %v2351_v50 = vand.u32 2147483647, %v7513_v46 }
 0x309   : > { %v2600_v56 = vmul.f32 %v2325_v8, %v7452_v30  ;;  %v2329_v17 = vsub.f32 1.0, %v2328_v27  ;;  %v4010_v25 = vmul.f32 %v7434_v31, %v2922_v20  ;;  %v7535_v31 = vpop.f32.mrf.mxu2  ;;  %v2353_v27 = vand.u32 2147483648, %v7513_v46 }
 0x30a   : > { %vm2347_vm9 = vweird.f32 %v7513_v46  ;;  %vm2352_vm11 = vcmp.eq.f32.partialorder %v2351_v50, 8.507059e+37 }
 0x30b   : > { %v2330_v14 = vmul.f32 %v6069_v51, %v2329_v17  ;;  %v7532_v30 = vmul.f32 %v4010_v25, %v7450_v35  ;;  %5158 = vmatmul.msk.f32.gmra.mxu1 %vm934_vm1, %v2600_v56  ;;  %v4067_v35 = vmul.f32 %v4003_v39, %v7301_v10  ;;  %3952 = vmatmul.bf16.gmra.mxu3 %v5558_v49 }
 0x30c   : > { %4524 = vmatpush.bf16.msra.mxu1 %v4120_v33  ;;  %v7538_v34 = vpop.f32.mrf.mxu0  ;;  %v3072_v33 = vld [vmem:[%s6279_s26 + $0x1b0] sm:$0xff] }
 0x30d   : > { %v6071_v40 = vpop.eup %6070  ;;  %v2331_v5 = vadd.f32 %v6069_v51, %v2330_v14  ;;  %v5098_v24 = vmul.f32 -1.442695, %v7538_v34  ;;  %5228 = vmatmul.msk.f32.gmra.mxu2 %vm3083_vm3, %v3071_v45 }
 0x30e   : > { %v6073_v32 = vpop.eup %6072  ;;  %v7545_v47 = vadd.f32 1.0, %v6071_v40  ;;  %v7553_v11 = vpop.f32.mrf.mxu3 }
 0x30f   : > { %v2335_v19 = vsel %vm2334_vm6, %v6069_v51, %v2331_v5  ;;  %v2343_v28 = vmul.f32 %v6073_v32, %v7513_v46  ;;  %6074 = vpow2.f32 %v5098_v24  ;;  %v4118_v51 = vpack.c.bf16 %v4067_v35, %v7375_v23 }
 0x310   : > { %v2340_v48 = vsel %vm2337_vm7, %v2339_v6, %v2335_v19  ;;  %6076 = vrcp.f32 %v7545_v47  ;;  %4525 = vmatpush.bf16.msra.mxu1 %v4119_v54  ;;  %v2925_v53 = vpop.f32.mrf.mxu1  ;;  %vm2348_vm8 = vweird.f32 %v6073_v32  ;;  %v2368_v40 = vand.u32 2147483648, %v7545_v47 }
 0x311   : > { %v2601_v10 = vmul.f32 %v2340_v48, %v7466_v16  ;;  %v2344_v38 = vsub.f32 1.0, %v2343_v28  ;;  %v4011_v9 = vmul.f32 %v7447_v7, %v2925_v53  ;;  %v7562_v8 = vpop.f32.mrf.mxu2  ;;  %vm2349_vm10 = vmor %vm2347_vm9, %vm2348_vm8  ;;  %v2366_v24 = vand.u32 2147483647, %v7545_v47 }
 0x312   : > { %vm2362_vm13 = vweird.f32 %v7545_v47  ;;  %v2369_v54 = vor.u32 1.1754944e-38, %v2368_v40 }
 0x313   : > { %v2345_v59 = vmul.f32 %v6073_v32, %v2344_v38  ;;  %v7559_v63 = vmul.f32 %v4011_v9, %v7464_v21  ;;  %5159 = vmatmul.msk.f32.gmra.mxu1 %vm934_vm1, %v2601_v10  ;;  %v2354_v21 = vor.u32 1.1754944e-38, %v2353_v27  ;;  %vm2367_vm15 = vcmp.eq.f32.partialorder %v2366_v24, 8.507059e+37 }
 0x314   : > { %4526 = vmatpush.bf16.msra.mxu1 %v4118_v51  ;;  %v7564_v7 = vpop.f32.mrf.mxu0 }
 0x315   : > { %v6075_v16 = vpop.eup %6074  ;;  %v2346_v20 = vadd.f32 %v6073_v32, %v2345_v59  ;;  %v4122_v23 = vpack.c.bf16 %v7559_v63, %v7532_v30  ;;  %v5099_v56 = vmul.f32 -1.442695, %v7564_v7  ;;  %5229 = vmatmul.msk.f32.gmra.mxu2 %vm3083_vm3, %v3072_v33 }
 0x316   : > { %v6077_v17 = vpop.eup %6076  ;;  %v7570_v25 = vadd.f32 1.0, %v6075_v16  ;;  %v7581_v49 = vpop.f32.mrf.mxu3 }
 0x317   : > { %v2350_v39 = vsel %vm2349_vm10, %v6073_v32, %v2346_v20  ;;  %v2358_v42 = vmul.f32 %v6077_v17, %v7545_v47  ;;  %6078 = vpow2.f32 %v5099_v56  ;;  %vm2363_vm12 = vweird.f32 %v6077_v17 }
 0x318   : > { %v2355_v61 = vsel %vm2352_vm11, %v2354_v21, %v2350_v39  ;;  %6080 = vrcp.f32 %v7570_v25  ;;  %4527 = vmatpush.bf16.msra.mxu1 %v4117_v55  ;;  %v2928_v46 = vpop.f32.mrf.mxu1  ;;  %vm2364_vm14 = vmor %vm2362_vm13, %vm2363_vm12  ;;  %v2383_v10 = vand.u32 2147483648, %v7570_v25  ;;  %v2381_v9 = vand.u32 2147483647, %v7570_v25 }
 0x319   : > { %v2602_v14 = vmul.f32 %v2355_v61, %v7480_v43  ;;  %v2359_v62 = vsub.f32 1.0, %v2358_v42  ;;  %v4012_v1 = vmul.f32 %v7461_v0, %v2928_v46  ;;  %v7589_v15 = vpop.f32.mrf.mxu2  ;;  %v5559_v0 = vld [vmem:[%s6284_s28 + $0xe0] sm:$0xff]  ;;  %vm2377_vm2 = vweird.f32 %v7570_v25 }
 0x31a   : > { %v2384_v59 = vor.u32 1.1754944e-38, %v2383_v10  ;;  %vm2382_vm5 = vcmp.eq.f32.partialorder %v2381_v9, 8.507059e+37 }
 0x31b   : > { %v2360_v5 = vmul.f32 %v6077_v17, %v2359_v62  ;;  %v7586_v36 = vmul.f32 %v4012_v1, %v7478_v41  ;;  %5160 = vmatmul.msk.f32.gmra.mxu1 %vm934_vm1, %v2602_v14  ;;  %3957 = vmatmul.bf16.gmra.mxu3 %v5559_v0  ;;  %v5560_v14 = vld [vmem:[%s6284_s28 + $0xe8] sm:$0xff] }
 0x31c   : > { %4528 = vmatpush.bf16.msra.mxu1 %v4116_v12  ;;  %v7594_v55 = vpop.f32.mrf.mxu0 }
 0x31d   : > { %v6079_v43 = vpop.eup %6078  ;;  %v2361_v32 = vadd.f32 %v6077_v17, %v2360_v5  ;;  %v5100_v35 = vmul.f32 -1.442695, %v7594_v55  ;;  %5230 = vmatmul.msk.f32.gmra.mxu2 %vm3083_vm3, %v3073_v44 }
 0x31e   : > { %v6081_v41 = vpop.eup %6080  ;;  %v7599_v6 = vadd.f32 1.0, %v6079_v43  ;;  %v7610_v53 = vpop.f32.mrf.mxu3  ;;  %v3075_v43 = vld [vmem:[%s6279_s26 + $0x1c8] sm:$0xff] }
 0x31f   : > { %v2365_v19 = vsel %vm2364_vm14, %v6077_v17, %v2361_v32  ;;  %v2373_v52 = vmul.f32 %v6081_v41, %v7570_v25  ;;  %6082 = vpow2.f32 %v5100_v35  ;;  %vm2378_vm0 = vweird.f32 %v6081_v41 }
 0x320   : > { %v2370_v12 = vsel %vm2367_vm15, %v2369_v54, %v2365_v19  ;;  %6084 = vrcp.f32 %v7599_v6  ;;  %4529 = vmatpush.bf16.msra.mxu1 %v4115_v58  ;;  %v2931_v47 = vpop.f32.mrf.mxu1  ;;  %vm2379_vm4 = vmor %vm2377_vm2, %vm2378_vm0  ;;  %v2398_v39 = vand.u32 2147483648, %v7599_v6  ;;  %v2396_v33 = vand.u32 2147483647, %v7599_v6 }
 0x321   : > { %v2603_v28 = vmul.f32 %v2370_v12, %v7506_v4  ;;  %v2374_v45 = vsub.f32 1.0, %v2373_v52  ;;  %v4013_v48 = vmul.f32 %v7475_v18, %v2931_v47  ;;  %v7618_v60 = vpop.f32.mrf.mxu2  ;;  %vm2392_vm7 = vweird.f32 %v7599_v6 }
 0x322   : > { %v2399_v5 = vor.u32 1.1754944e-38, %v2398_v39  ;;  %vm2397_vm9 = vcmp.eq.f32.partialorder %v2396_v33, 8.507059e+37  ;;  %v5561_v39 = vld [vmem:[%s6284_s28 + $0xf0] sm:$0xff] }
 0x323   : > { %v2375_v38 = vmul.f32 %v6081_v41, %v2374_v45  ;;  %v7615_v51 = vmul.f32 %v4013_v48, %v7502_v3  ;;  %5161 = vmatmul.msk.f32.gmra.mxu1 %vm934_vm1, %v2603_v28 }
 0x324   : > { %4530 = vmatpush.bf16.msra.mxu1 %v4114_v13  ;;  %v7623_v22 = vpop.f32.mrf.mxu0 }
 0x325   : > { %v6083_v58 = vpop.eup %6082  ;;  %v2376_v18 = vadd.f32 %v6081_v41, %v2375_v38  ;;  %v4123_v4 = vpack.c.bf16 %v7615_v51, %v7586_v36  ;;  %v5101_v3 = vmul.f32 -1.442695, %v7623_v22  ;;  %5231 = vmatmul.msk.f32.gmra.mxu2 %vm3083_vm3, %v3074_v57  ;;  %v5586_v36 = vld [vmem:[%s6289_s13 + $0x78] sm:$0xff]  ;;  %v5593_v51 = vld [vmem:[%s6289_s13 + $0xb0] sm:$0xff] }
 0x326   : > { %v6085_v27 = vpop.eup %6084  ;;  %v7629_v50 = vadd.f32 1.0, %v6083_v58  ;;  %v7637_v25 = vpop.f32.mrf.mxu3 }
 0x327   : > { %v2380_v16 = vsel %vm2379_vm4, %v6081_v41, %v2376_v18  ;;  %v2388_v29 = vmul.f32 %v6085_v27, %v7599_v6  ;;  %6086 = vpow2.f32 %v5101_v3  ;;  %vm2393_vm6 = vweird.f32 %v6085_v27  ;;  %v3076_v3 = vld [vmem:[%s6279_s26 + $0x1d0] sm:$0xff] }
 0x328   : > { %v2385_v13 = vsel %vm2382_vm5, %v2384_v59, %v2380_v16  ;;  %6088 = vrcp.f32 %v7629_v50  ;;  %v2934_v20 = vpop.f32.mrf.mxu1  ;;  %vm2394_vm8 = vmor %vm2392_vm7, %vm2393_vm6  ;;  %v2413_v52 = vand.u32 2147483648, %v7629_v50  ;;  %v2411_v12 = vand.u32 2147483647, %v7629_v50  ;;  %5774 = vmatpush.lsf.bf16.msrb.mxu1 %v5586_v36 }
 0x329   : > { %v2604_v56 = vmul.f32 %v2385_v13, %v7538_v34  ;;  %v2389_v17 = vsub.f32 1.0, %v2388_v29  ;;  %v4014_v21 = vmul.f32 %v7493_v26, %v2934_v20  ;;  %v7645_v46 = vpop.f32.mrf.mxu2  ;;  %vm2407_vm11 = vweird.f32 %v7629_v50 }
 0x32a   : > { %vm2412_vm13 = vcmp.eq.f32.partialorder %v2411_v12, 8.507059e+37 }
 0x32b   : > { %v2390_v42 = vmul.f32 %v6085_v27, %v2389_v17  ;;  %v7642_v61 = vmul.f32 %v4014_v21, %v7535_v31  ;;  %5162 = vmatmul.msk.f32.gmra.mxu1 %vm934_vm1, %v2604_v56  ;;  %3962 = vmatmul.bf16.gmra.mxu3 %v5560_v14 }
 0x32c   : > { %v7647_v34 = vpop.f32.mrf.mxu0 }
 0x32d   : > { %v6087_v26 = vpop.eup %6086  ;;  %v2391_v62 = vadd.f32 %v6085_v27, %v2390_v42  ;;  %v5102_v1 = vmul.f32 -1.442695, %v7647_v34  ;;  %5232 = vmatmul.msk.f32.gmra.mxu2 %vm3083_vm3, %v3075_v43 }
 0x32e   : > { %v6089_v40 = vpop.eup %6088  ;;  %v7652_v24 = vadd.f32 1.0, %v6087_v26  ;;  %v7660_v19 = vpop.f32.mrf.mxu3 }
 0x32f   : > { %v2395_v31 = vsel %vm2394_vm8, %v6085_v27, %v2391_v62  ;;  %v2403_v0 = vmul.f32 %v6089_v40, %v7629_v50  ;;  %6090 = vpow2.f32 %v5102_v1  ;;  %vm2408_vm10 = vweird.f32 %v6089_v40 }
 0x330   : > { %v2400_v32 = vsel %vm2397_vm9, %v2399_v5, %v2395_v31  ;;  %6092 = vrcp.f32 %v7652_v24  ;;  %v2937_v35 = vpop.f32.mrf.mxu1  ;;  %vm2409_vm12 = vmor %vm2407_vm11, %vm2408_vm10  ;;  %v2428_v13 = vand.u32 2147483648, %v7652_v24  ;;  %v2426_v56 = vand.u32 2147483647, %v7652_v24 }
 0x331   : > { %v2605_v41 = vmul.f32 %v2400_v32, %v7564_v7  ;;  %v2404_v54 = vsub.f32 1.0, %v2403_v0  ;;  %v4015_v6 = vmul.f32 %v7524_v37, %v2937_v35  ;;  %v7668_v28 = vpop.f32.mrf.mxu2  ;;  %vm2422_vm15 = vweird.f32 %v7652_v24 }
 0x332   : > { %v2429_v26 = vor.u32 1.1754944e-38, %v2428_v13  ;;  %vm2427_vm2 = vcmp.eq.f32.partialorder %v2426_v56, 8.507059e+37 }
 0x333   : > { %v2405_v44 = vmul.f32 %v6089_v40, %v2404_v54  ;;  %v7665_v47 = vmul.f32 %v4015_v6, %v7562_v8  ;;  %5163 = vmatmul.msk.f32.gmra.mxu1 %vm934_vm1, %v2605_v41  ;;  %v2414_v8 = vor.u32 1.1754944e-38, %v2413_v52 }
 0x334   : > { %v7670_v7 = vpop.f32.mrf.mxu0 }
 0x335   : > { %v6091_v45 = vpop.eup %6090  ;;  %v2406_v37 = vadd.f32 %v6089_v40, %v2405_v44  ;;  %v4124_v48 = vpack.c.bf16 %v7665_v47, %v7642_v61  ;;  %v5103_v10 = vmul.f32 -1.442695, %v7670_v7  ;;  %5233 = vmatmul.msk.f32.gmra.mxu2 %vm3083_vm3, %v3076_v3 }
 0x336   : > { %v6093_v38 = vpop.eup %6092  ;;  %v7676_v9 = vadd.f32 1.0, %v6091_v45  ;;  %v7684_v57 = vpop.f32.mrf.mxu3 }
 0x337   : > { %v2410_v58 = vsel %vm2409_vm12, %v6089_v40, %v2406_v37  ;;  %v2418_v18 = vmul.f32 %v6093_v38, %v7652_v24  ;;  %6094 = vpow2.f32 %v5103_v10  ;;  %vm2423_vm14 = vweird.f32 %v6093_v38  ;;  %v3077_v40 = vld [vmem:[%s6279_s26 + $0x1d8] sm:$0xff] }
 0x338   : > { %v2415_v27 = vsel %vm2412_vm13, %v2414_v8, %v2410_v58  ;;  %6096 = vrcp.f32 %v7676_v9  ;;  %v2940_v59 = vpop.f32.mrf.mxu1  ;;  %vm2424_vm0 = vmor %vm2422_vm15, %vm2423_vm14  ;;  %v2443_v35 = vand.u32 2147483648, %v7676_v9  ;;  %v2441_v54 = vand.u32 2147483647, %v7676_v9 }
 0x339   : > { %v2606_v50 = vmul.f32 %v2415_v27, %v7594_v55  ;;  %v2419_v16 = vsub.f32 1.0, %v2418_v18  ;;  %v4016_v29 = vmul.f32 %v7553_v11, %v2940_v59  ;;  %v7692_v21 = vpop.f32.mrf.mxu2  ;;  %vm2437_vm5 = vweird.f32 %v7676_v9  ;;  %v3078_v18 = vld [vmem:[%s6279_s26 + $0x1e0] sm:$0xff] }
 0x33a   : > { %vm2442_vm7 = vcmp.eq.f32.partialorder %v2441_v54, 8.507059e+37  ;;  %v5595_v27 = vld [vmem:[%s6289_s13 + $0xc0] sm:$0xff] }
 0x33b   : > { %v2420_v20 = vmul.f32 %v6093_v38, %v2419_v16  ;;  %v7689_v17 = vmul.f32 %v4016_v29, %v7589_v15  ;;  %5164 = vmatmul.msk.f32.gmra.mxu1 %vm934_vm1, %v2606_v50  ;;  %3967 = vmatmul.bf16.gmra.mxu3 %v5561_v39  ;;  %v5577_v29 = vld [vmem:[%s6289_s13 + $0x30] sm:$0xff] }
 0x33c   : > { %v7694_v55 = vpop.f32.mrf.mxu0  ;;  %4458 = vxpose.xlu0.c.b16.start [1/8] %v5595_v27, 128 }
 0x33d   : > { %v6095_v11 = vpop.eup %6094  ;;  %v2421_v42 = vadd.f32 %v6093_v38, %v2420_v20  ;;  %v5104_v33 = vmul.f32 -1.442695, %v7694_v55  ;;  %5234 = vmatmul.msk.f32.gmra.mxu2 %vm3083_vm3, %v3077_v40  ;;  %v5576_v40 = vld [vmem:[%s6289_s13 + $0x28] sm:$0xff] }
 0x33e   : > { %v6097_v14 = vpop.eup %6096  ;;  %v7699_v62 = vadd.f32 1.0, %v6095_v11  ;;  %v7707_v32 = vpop.f32.mrf.mxu3 }
 0x33f   : > { %v2425_v15 = vsel %vm2424_vm0, %v6093_v38, %v2421_v42  ;;  %v2433_v1 = vmul.f32 %v6097_v14, %v7676_v9  ;;  %6098 = vpow2.f32 %v5104_v33  ;;  %vm2438_vm4 = vweird.f32 %v6097_v14  ;;  %v5578_v38 = vld [vmem:[%s6289_s13 + $0x38] sm:$0xff] }
 0x340   : > { %v2430_v5 = vsel %vm2427_vm2, %v2429_v26, %v2425_v15  ;;  %6100 = vrcp.f32 %v7699_v62  ;;  %v2943_v31 = vpop.f32.mrf.mxu1  ;;  %vm2439_vm6 = vmor %vm2437_vm5, %vm2438_vm4  ;;  %5746 = vmatpush.lsf.bf16.msrb.mxu0 %v5578_v38  ;;  %v2458_v16 = vand.u32 2147483648, %v7699_v62  ;;  %v2456_v20 = vand.u32 2147483647, %v7699_v62  ;;  %v5562_v42 = vld [vmem:[%s6284_s28 + $0xf8] sm:$0xff]  ;;  %s8113_s28 = sld [smem:[#allocation10_spill]] (!%p5527_p9) }
 0x341   : > { %v2607_v24 = vmul.f32 %v2430_v5, %v7623_v22  ;;  %v2434_v0 = vsub.f32 1.0, %v2433_v1  ;;  %v4017_v43 = vmul.f32 %v7581_v49, %v2943_v31  ;;  %v7715_v52 = vpop.f32.mrf.mxu2  ;;  %vm2452_vm9 = vweird.f32 %v7699_v62 }
 0x342   : > { %v2459_v15 = vor.u32 1.1754944e-38, %v2458_v16  ;;  %vm2457_vm11 = vcmp.eq.f32.partialorder %v2456_v20, 8.507059e+37  ;;  %v5596_v20 = vld [vmem:[%s6289_s13 + $0xc8] sm:$0xff] }
 0x343   : > { %v2435_v41 = vmul.f32 %v6097_v14, %v2434_v0  ;;  %v7712_v6 = vmul.f32 %v4017_v43, %v7618_v60  ;;  %5165 = vmatmul.msk.f32.gmra.mxu1 %vm934_vm1, %v2607_v24  ;;  %v2444_v60 = vor.u32 1.1754944e-38, %v2443_v35  ;;  %v3079_v24 = vld [vmem:[%s6279_s26 + $0x1e8] sm:$0xff]  ;;  %v5109_v43 = vmul.f32 -1.442695, %v6734_v2 }
 0x344   : > { %v7717_v22 = vpop.f32.mrf.mxu0  ;;  %5747 = vmatpush.lsf.bf16.msrb.mxu0 %v5577_v29  ;;  %v3080_v29 = vld [vmem:[%s6279_s26 + $0x1f0] sm:$0xff] }
 0x345   : > { %v6099_v49 = vpop.eup %6098  ;;  %v2436_v44 = vadd.f32 %v6097_v14, %v2435_v41  ;;  %v4125_v12 = vpack.c.bf16 %v7712_v6, %v7689_v17  ;;  %v5105_v45 = vmul.f32 -1.442695, %v7717_v22  ;;  %5235 = vmatmul.msk.f32.gmra.mxu2 %vm3083_vm3, %v3078_v18 }
 0x346   : > { %v6101_v37 = vpop.eup %6100  ;;  %v7723_v10 = vadd.f32 1.0, %v6099_v49  ;;  %v7738_v56 = vpop.f32.mrf.mxu3  ;;  %v5575_v49 = vld [vmem:[%s6289_s13 + $0x20] sm:$0xff] }
 0x347   : > { %v2440_v8 = vsel %vm2439_vm6, %v6097_v14, %v2436_v44  ;;  %v2448_v58 = vmul.f32 %v6101_v37, %v7699_v62  ;;  %6102 = vpow2.f32 %v5105_v45  ;;  %vm2453_vm8 = vweird.f32 %v6101_v37 }
 0x348   : > { %v2445_v9 = vsel %vm2442_vm7, %v2444_v60, %v2440_v8  ;;  %6104 = vrcp.f32 %v7723_v10  ;;  %v7729_v3 = vpop.f32.mrf.mxu1  ;;  %vm2454_vm10 = vmor %vm2452_vm9, %vm2453_vm8  ;;  %5748 = vmatpush.lsf.bf16.msrb.mxu0 %v5576_v40  ;;  %v2473_v54 = vand.u32 2147483648, %v7723_v10  ;;  %v2471_v45 = vand.u32 2147483647, %v7723_v10 }
 0x349   : > { %v2608_v59 = vmul.f32 %v2445_v9, %v7647_v34  ;;  %v2449_v50 = vsub.f32 1.0, %v2448_v58  ;;  %v7740_v39 = vpop.f32.mrf.mxu2  ;;  %vm2467_vm13 = vweird.f32 %v7723_v10 }
 0x34a   : > { %v2474_v9 = vor.u32 1.1754944e-38, %v2473_v54  ;;  %vm2472_vm15 = vcmp.eq.f32.partialorder %v2471_v45, 8.507059e+37 }
 0x34b   : > { %v2450_v13 = vmul.f32 %v6101_v37, %v2449_v50  ;;  %5166 = vmatmul.msk.f32.gmra.mxu1 %vm934_vm1, %v2608_v59  ;;  %3972 = vmatmul.bf16.gmra.mxu3 %v5562_v42  ;;  %v5574_v59 = vld [vmem:[%s6289_s13 + $0x18] sm:$0xff] }
 0x34c   : > { %v7742_v11 = vpop.f32.mrf.mxu0  ;;  %5749 = vmatpush.lsf.bf16.msrb.mxu0 %v5575_v49  ;;  %4459 = vxpose.xlu0.c.b16.cont [2/8] %v5596_v20, 128 }
 0x34d   : > { %v6103_v34 = vpop.eup %6102  ;;  %v2451_v33 = vadd.f32 %v6101_v37, %v2450_v13  ;;  %v5106_v14 = vmul.f32 -1.442695, %v7742_v11  ;;  %5236 = vmatmul.msk.f32.gmra.mxu2 %vm3083_vm3, %v3079_v24 }
 0x34e   : > { %v6105_v26 = vpop.eup %6104  ;;  %v7747_v1 = vadd.f32 1.0, %v6103_v34  ;;  %v7768_v58 = vpop.f32.mrf.mxu3 }
 0x34f   : > { %v2455_v5 = vsel %vm2454_vm10, %v6101_v37, %v2451_v33  ;;  %v2463_v31 = vmul.f32 %v6105_v26, %v7723_v10  ;;  %6106 = vpow2.f32 %v5106_v14  ;;  %vm2468_vm12 = vweird.f32 %v6105_v26  ;;  %v5573_v14 = vld [vmem:[%s6289_s13 + $0x10] sm:$0xff] }
 0x350   : > { %v2460_v0 = vsel %vm2457_vm11, %v2459_v15, %v2455_v5  ;;  %6108 = vrcp.f32 %v7747_v1  ;;  %v7753_v62 = vpop.f32.mrf.mxu1  ;;  %vm2469_vm14 = vmor %vm2467_vm13, %vm2468_vm12  ;;  %5750 = vmatpush.lsf.bf16.msrb.mxu0 %v5574_v59  ;;  %v2488_v33 = vand.u32 2147483648, %v7747_v1  ;;  %v2486_v40 = vand.u32 2147483647, %v7747_v1 }
 0x351   : > { %v2609_v35 = vmul.f32 %v2460_v0, %v7670_v7  ;;  %v2464_v41 = vsub.f32 1.0, %v2463_v31  ;;  %v7762_v37 = vpop.f32.mrf.mxu2  ;;  %6110 = vpow2.f32 %v5109_v43  ;;  %vm2482_vm2 = vweird.f32 %v7747_v1  ;;  %v3081_v43 = vld [vmem:[%s6279_s26 + $0x1f8] sm:$0xff] }
 0x352   : > { %v2489_v54 = vor.u32 1.1754944e-38, %v2488_v33  ;;  %vm2487_vm5 = vcmp.eq.f32.partialorder %v2486_v40, 8.507059e+37 }
 0x353   : > { %v2465_v44 = vmul.f32 %v6105_v26, %v2464_v41  ;;  %5167 = vmatmul.msk.f32.gmra.mxu1 %vm934_vm1, %v2609_v35 }
 0x354   : > { %v7764_v60 = vpop.f32.mrf.mxu0  ;;  %5751 = vmatpush.lsf.bf16.msrb.mxu0 %v5573_v14 }
 0x355   : > { %v6107_v38 = vpop.eup %6106  ;;  %v2466_v7 = vadd.f32 %v6105_v26, %v2465_v44  ;;  %v5107_v8 = vmul.f32 -1.442695, %v7764_v60  ;;  %5237 = vmatmul.msk.f32.gmra.mxu2 %vm3083_vm3, %v3080_v29  ;;  %v5572_v44 = vld [vmem:[%s6289_s13 + $0x8] sm:$0xff] }
 0x356   : > { %v6109_v18 = vpop.eup %6108  ;;  %v7770_v27 = vadd.f32 1.0, %v6107_v38 }
 0x357   : > { %v2470_v50 = vsel %vm2469_vm14, %v6105_v26, %v2466_v7  ;;  %v2478_v16 = vmul.f32 %v6109_v18, %v7747_v1  ;;  %6112 = vpow2.f32 %v5107_v8  ;;  %v6111_v26 = vpop.eup %6110  ;;  %vm2483_vm0 = vweird.f32 %v6109_v18  ;;  %v7796_v7 = vpop.f32.mrf.mxu3 }
 0x358   : > { %v2475_v13 = vsel %vm2472_vm15, %v2474_v9, %v2470_v50  ;;  %6114 = vrcp.f32 %v7770_v27  ;;  %v7776_v10 = vpop.f32.mrf.mxu1  ;;  %v7792_v41 = vadd.f32 1.0, %v6111_v26  ;;  %vm2484_vm4 = vmor %vm2482_vm2, %vm2483_vm0  ;;  %5752 = vmatpush.lsf.bf16.msrb.mxu0 %v5572_v44  ;;  %v5571_v50 = vld [vmem:[%s6289_s13] sm:$0xff]  ;;  %v2501_v29 = vand.u32 2147483647, %v7770_v27 }
 0x359   : > { %v2610_v42 = vmul.f32 %v2475_v13, %v7694_v55  ;;  %v2479_v34 = vsub.f32 1.0, %v2478_v16  ;;  %v7785_v5 = vpop.f32.mrf.mxu2 }
 0x35a   : > { %vm2502_vm8 = vcmp.eq.f32.partialorder %v2501_v29, 8.507059e+37  ;;  %vm2542_vm14 = vweird.f32 %v7792_v41 }
 0x35b   : > { %v2480_v15 = vmul.f32 %v6109_v18, %v2479_v34  ;;  %5168 = vmatmul.msk.f32.gmra.mxu1 %vm934_vm1, %v2610_v42 }
 0x35c   : > { %v7787_v31 = vpop.f32.mrf.mxu0  ;;  %5753 = vmatpush.lsf.bf16.msrb.mxu0 %v5571_v50 }
 0x35d   : > { %v6113_v55 = vpop.eup %6112  ;;  %v2481_v24 = vadd.f32 %v6109_v18, %v2480_v15  ;;  %v5108_v0 = vmul.f32 -1.442695, %v7787_v31  ;;  %5238 = vmatmul.msk.f32.gmra.mxu2 %vm3083_vm3, %v3081_v43  ;;  %vm2497_vm3 = vweird.f32 %v7770_v27 }
 0x35e   : > { %v6115_v35 = vpop.eup %6114  ;;  %v1589_v49 = vadd.f32 1.0, %v6113_v55  ;;  %5754 = vllmr.16.mxu0 }
 0x35f   : > { %v2485_v45 = vsel %vm2484_vm4, %v6109_v18, %v2481_v24  ;;  %v2493_v38 = vmul.f32 %v6115_v35, %v7770_v27  ;;  %6116 = vpow2.f32 %v5108_v0  ;;  %v2503_v18 = vand.u32 2147483648, %v7770_v27  ;;  %v5597_v24 = vld [vmem:[%s6289_s13 + $0xd0] sm:$0xff] }
 0x360   : > { %v2490_v8 = vsel %vm2487_vm5, %v2489_v54, %v2485_v45  ;;  %6118 = vrcp.f32 %v1589_v49  ;;  %v7798_v1 = vpop.f32.mrf.mxu1  ;;  %vm2498_vm6 = vweird.f32 %v6115_v35  ;;  %v7814_v54 = vpop.f32.mrf.mxu3  ;;  %v2518_v27 = vand.u32 2147483648, %v1589_v49  ;;  %4460 = vxpose.xlu0.c.b16.cont [3/8] %v5597_v24, 128 }
 0x361   : > { %v2611_v9 = vmul.f32 %v2490_v8, %v7717_v22  ;;  %v2494_v59 = vsub.f32 1.0, %v2493_v38  ;;  %6120 = vrcp.f32 %v7792_v41  ;;  %v7807_v13 = vpop.f32.mrf.mxu2  ;;  %vm2499_vm7 = vmor %vm2497_vm3, %vm2498_vm6  ;;  %v2504_v34 = vor.u32 1.1754944e-38, %v2503_v18 }
 0x362   : > { %vm2512_vm10 = vweird.f32 %v1589_v49 }
 0x363   : > { %v2495_v16 = vmul.f32 %v6115_v35, %v2494_v59  ;;  %5169 = vmatmul.msk.f32.gmra.mxu1 %vm934_vm1, %v2611_v9  ;;  %v2519_v59 = vor.u32 1.1754944e-38, %v2518_v27  ;;  %v2546_v27 = vand.u32 2147483647, %v7792_v41 }
 0x365   : > { %v6117_v20 = vpop.eup %6116  ;;  %v2496_v42 = vadd.f32 %v6115_v35, %v2495_v16  ;;  %vm2547_vm6 = vcmp.eq.f32.partialorder %v2546_v27, 8.507059e+37  ;;  %v5602_v27 = vld [vmem:[%s6289_s13 + $0xf8] sm:$0xff] }
 0x366   : > { %v6119_v22 = vpop.eup %6118  ;;  %v1590_v33 = vadd.f32 1.0, %v6117_v20 }
 0x367   : > { %v2500_v14 = vsel %vm2499_vm7, %v6115_v35, %v2496_v42  ;;  %v2508_v26 = vmul.f32 %v6119_v22, %v1589_v49  ;;  %v6121_v15 = vpop.eup %6120  ;;  %vm2513_vm9 = vweird.f32 %v6119_v22  ;;  %v2516_v35 = vand.u32 2147483647, %v1589_v49 }
 0x368   : > { %v2505_v40 = vsel %vm2502_vm8, %v2504_v34, %v2500_v14  ;;  %6122 = vrcp.f32 %v1590_v33  ;;  %v7810_v55 = vpop.f32.mrf.mxu1  ;;  %v2538_v44 = vmul.f32 %v6121_v15, %v7792_v41  ;;  %vm2514_vm11 = vmor %vm2512_vm10, %vm2513_vm9  ;;  %v2533_v34 = vand.u32 2147483648, %v1590_v33  ;;  %v7822_v49 = vpop.f32.mrf.mxu3 }
 0x369   : > { %v2612_v0 = vmul.f32 %v2505_v40, %v7742_v11  ;;  %v2509_v43 = vsub.f32 1.0, %v2508_v26  ;;  %v7818_v38 = vpop.f32.mrf.mxu2  ;;  %vm2517_vm12 = vcmp.eq.f32.partialorder %v2516_v35, 8.507059e+37  ;;  %v2531_v40 = vand.u32 2147483647, %v1590_v33 }
 0x36a   : > { %v2539_v11 = vsub.f32 1.0, %v2538_v44  ;;  %vm2543_vm15 = vweird.f32 %v6121_v15  ;;  %vm2527_vm0 = vweird.f32 %v1590_v33 }
 0x36b   : > { %v2510_v45 = vmul.f32 %v6119_v22, %v2509_v43  ;;  %5170 = vmatmul.msk.f32.gmra.mxu1 %vm934_vm1, %v2612_v0  ;;  %v2534_v0 = vor.u32 1.1754944e-38, %v2533_v34  ;;  %vm2532_vm4 = vcmp.eq.f32.partialorder %v2531_v40, 8.507059e+37  ;;  %vm2544_vm5 = vmor %vm2542_vm14, %vm2543_vm15 }
 0x36c   : > { %v2540_v14 = vmul.f32 %v6121_v15, %v2539_v11 }
 0x36d   : > { %v2511_v8 = vadd.f32 %v6119_v22, %v2510_v45 }
 0x36e   : > { %v6123_v9 = vpop.eup %6122  ;;  %v2541_v43 = vadd.f32 %v6121_v15, %v2540_v14 }
 0x36f   : > { %v2515_v18 = vsel %vm2514_vm11, %v6119_v22, %v2511_v8  ;;  %v2523_v50 = vmul.f32 %v6123_v9, %v1590_v33  ;;  %vm2528_vm13 = vweird.f32 %v6123_v9  ;;  %v5598_v8 = vld [vmem:[%s6289_s13 + $0xd8] sm:$0xff] }
 0x370   : > { %v2520_v16 = vsel %vm2517_vm12, %v2519_v59, %v2515_v18  ;;  %v2961_v29 = vpop.f32.mrf.mxu1  ;;  %vm2529_vm2 = vmor %vm2527_vm0, %vm2528_vm13  ;;  %4461 = vxpose.xlu0.c.b16.cont [4/8] %v5598_v8, 128  ;;  %v2545_v18 = vsel %vm2544_vm5, %v6121_v15, %v2541_v43  ;;  %v7832_v33 = vpop.f32.mrf.mxu3  ;;  %v4022_v15 = vmul.f32 %v7707_v32, %v7810_v55 }
 0x371   : > { %v2613_v20 = vmul.f32 %v2520_v16, %v7764_v60  ;;  %v2524_v42 = vsub.f32 1.0, %v2523_v50  ;;  %v7824_v24 = vpop.f32.mrf.mxu2  ;;  %v2548_v60 = vand.u32 2147483648, %v7792_v41 }
 0x373   : > { %v2525_v26 = vmul.f32 %v6123_v9, %v2524_v42  ;;  %5171 = vmatmul.msk.f32.gmra.mxu1 %vm934_vm1, %v2613_v20  ;;  %v2549_v11 = vor.u32 1.1754944e-38, %v2548_v60  ;;  %v4023_v42 = vmul.f32 %v7738_v56, %v2961_v29  ;;  %v4020_v56 = vmul.f32 %v7660_v19, %v7776_v10  ;;  %v5584_v60 = vld [vmem:[%s6289_s13 + $0x68] sm:$0xff] }
 0x374   : > { %v4018_v19 = vmul.f32 %v7610_v53, %v7729_v3  ;;  %v5592_v3 = vld [vmem:[%s6289_s13 + $0xa8] sm:$0xff] }
 0x375   : > { %v2526_v22 = vadd.f32 %v6123_v9, %v2525_v26  ;;  %v2550_v50 = vsel %vm2547_vm6, %v2549_v11, %v2545_v18  ;;  %v4087_v26 = vmul.f32 %v4023_v42, %v7762_v37  ;;  %v5589_v11 = vld [vmem:[%s6289_s13 + $0x90] sm:$0xff] }
 0x376   : > { %v2615_v20 = vmul.f32 %v2550_v50, %v6734_v2  ;;  %v4082_v40 = vmul.f32 %v4018_v19, %v7645_v46  ;;  %v5600_v46 = vld [vmem:[%s6289_s13 + $0xe8] sm:$0xff] }
 0x377   : > { %v2530_v44 = vsel %vm2529_vm2, %v6123_v9, %v2526_v22 }
 0x378   : > { %v2535_v45 = vsel %vm2532_vm4, %v2534_v0, %v2530_v44  ;;  %v2964_v35 = vpop.f32.mrf.mxu1  ;;  %v7851_v29 = vpop.f32.mrf.mxu3  ;;  %v5591_v0 = vld [vmem:[%s6289_s13 + $0xa0] sm:$0xff] }
 0x379   : > { %v2614_v59 = vmul.f32 %v2535_v45, %v7787_v31  ;;  %v7834_v16 = vpop.f32.mrf.mxu2  ;;  %v4024_v41 = vmul.f32 %v7768_v58, %v2964_v35  ;;  %v4021_v58 = vmul.f32 %v7684_v57, %v7798_v1  ;;  %v4019_v57 = vmul.f32 %v7637_v25, %v7753_v62  ;;  %v5583_v44 = vld [vmem:[%s6289_s13 + $0x60] sm:$0xff]  ;;  %v5590_v45 = vld [vmem:[%s6289_s13 + $0x98] sm:$0xff] }
 0x37b   : > { %5172 = vmatmul.msk.f32.gmra.mxu1 %vm934_vm1, %v2614_v59  ;;  %v4088_v34 = vmul.f32 %v4024_v41, %v7785_v5  ;;  %v4085_v37 = vmul.f32 %v4021_v58, %v7715_v52  ;;  %v4083_v10 = vmul.f32 %v4019_v57, %v7668_v28  ;;  %v5582_v59 = vld [vmem:[%s6289_s13 + $0x58] sm:$0xff]  ;;  %v5581_v41 = vld [vmem:[%s6289_s13 + $0x50] sm:$0xff]  ;;  %v5587_v58 = vld [vmem:[%s6289_s13 + $0x80] sm:$0xff] }
 0x37d   : > { %v4126_v25 = vpack.c.bf16 %v4083_v10, %v4082_v40 }
 0x37f   : > { %5755 = vmatmul.lmr.bf16.vlgmr.msra.gmra.16.mxu0 }
 0x380   : > { %v2967_v9 = vpop.f32.mrf.mxu1  ;;  %v7868_v52 = vpop.f32.mrf.mxu3 }
 0x381   : > { %v4025_v31 = vmul.f32 %v7796_v7, %v2967_v9  ;;  %v4086_v7 = vmul.f32 %v4022_v15, %v7740_v39  ;;  %v7855_v5 = vpop.f32.mrf.mxu2  ;;  %v4084_v39 = vmul.f32 %v4020_v56, %v7692_v21  ;;  %v5588_v9 = vld [vmem:[%s6289_s13 + $0x88] sm:$0xff]  ;;  %v5579_v56 = vld [vmem:[%s6289_s13 + $0x40] sm:$0xff] }
 0x383   : > { %v4089_v14 = vmul.f32 %v4025_v31, %v7807_v13  ;;  %5173 = vmatmul.msk.f32.gmra.mxu1 %vm934_vm1, %v2615_v20  ;;  %v5599_v13 = vld [vmem:[%s6289_s13 + $0xe0] sm:$0xff]  ;;  %v4128_v1 = vpack.c.bf16 %v4087_v26, %v4086_v7  ;;  %v4127_v55 = vpack.c.bf16 %v4085_v37, %v4084_v39 }
 0x384   : > { %4462 = vxpose.xlu0.c.b16.cont [5/8] %v5599_v13, 128 }
 0x385   : > { %v4129_v2 = vpack.c.bf16 %v4089_v14, %v4088_v34  ;;  %v5580_v14 = vld [vmem:[%s6289_s13 + $0x48] sm:$0xff] }
 0x387   : > { %4572 = vmatpush.bf16.msra.mxu2 %v4129_v2  ;;  %5756 = vmatmul.lmr.bf16.gmra.16.mxu0 }
 0x388   : > { %v7853_v32 = vpop.f32.mrf.mxu1  ;;  %v7881_v28 = vpop.f32.mrf.mxu3 }
 0x389   : > { %v7870_v62 = vpop.f32.mrf.mxu2 }
 0x38b   : > { %4573 = vmatpush.bf16.msra.mxu2 %v4128_v1 }
 0x38f   : > { %4574 = vmatpush.bf16.msra.mxu2 %v4127_v55  ;;  %5757 = vmatmul.lmr.bf16.gmra.16.mxu0 }
 0x390   : > { %v7866_v22 = vpop.f32.mrf.mxu1  ;;  %v3953_v6 = vpop.f32.mrf.mxu3 }
 0x391   : > { %v7883_v21 = vpop.f32.mrf.mxu2 }
 0x393   : > { %4575 = vmatpush.bf16.msra.mxu2 %v4126_v25 }
 0x394   : > { %4463 = vxpose.xlu0.c.b16.cont [6/8] %v5600_v46, 128 }
 0x397   : > { %4576 = vmatpush.bf16.msra.mxu2 %v4125_v12  ;;  %5758 = vmatmul.lmr.bf16.gmra.16.mxu0  ;;  %v5594_v12 = vld [vmem:[%s6289_s13 + $0xb8] sm:$0xff] }
 0x398   : > { %v7875_v53 = vpop.f32.mrf.mxu1  ;;  %v3955_v30 = vpop.f32.mrf.mxu3 }
 0x399   : > { %v3459_v61 = vpop.f32.mrf.mxu2 }
 0x39b   : > { %4577 = vmatpush.bf16.msra.mxu2 %v4124_v48  ;;  %v5601_v48 = vld [vmem:[%s6289_s13 + $0xf0] sm:$0xff] }
 0x39f   : > { %4578 = vmatpush.bf16.msra.mxu2 %v4123_v4  ;;  %5759 = vmatmul.lmr.bf16.gmra.16.mxu0  ;;  %v5585_v4 = vld [vmem:[%s6289_s13 + $0x70] sm:$0xff] }
 0x3a0   : > { %v7888_v17 = vpop.f32.mrf.mxu1  ;;  %5775 = vmatpush.lsf.bf16.msrb.mxu1 %v5585_v4  ;;  %v3958_v35 = vpop.f32.mrf.mxu3 }
 0x3a3   : > { %4579 = vmatpush.bf16.msra.mxu2 %v4122_v23  ;;  %v3462_v23 = vpop.f32.mrf.mxu2 }
 0x3a4   : > { %4464 = vxpose.xlu0.c.b16.cont [7/8] %v5601_v48, 128  ;;  %5776 = vmatpush.lsf.bf16.msrb.mxu1 %v5584_v60 }
 0x3a7   : > { %5802 = vmatpush.lsf.bf16.msrb.mxu2 %v5594_v12  ;;  %5760 = vmatmul.lmr.bf16.gmra.16.mxu0 }
 0x3a8   : > { %v7893_v47 = vpop.f32.mrf.mxu1  ;;  %5777 = vmatpush.lsf.bf16.msrb.mxu1 %v5583_v44  ;;  %v7912_v15 = vpop.f32.mrf.mxu3 }
 0x3ab   : > { %5803 = vmatpush.lsf.bf16.msrb.mxu2 %v5593_v51  ;;  %v3465_v8 = vpop.f32.mrf.mxu2 }
 0x3ac   : > { %5778 = vmatpush.lsf.bf16.msrb.mxu1 %v5582_v59 }
 0x3af   : > { %5804 = vmatpush.lsf.bf16.msrb.mxu2 %v5592_v3  ;;  %5761 = vmatmul.lmr.bf16.gmra.16.mxu0 }
 0x3b0   : > { %v7899_v63 = vpop.f32.mrf.mxu1  ;;  %5779 = vmatpush.lsf.bf16.msrb.mxu1 %v5581_v41  ;;  %v3963_v57 = vpop.f32.mrf.mxu3 }
 0x3b3   : > { %5805 = vmatpush.lsf.bf16.msrb.mxu2 %v5591_v0  ;;  %v7914_v34 = vpop.f32.mrf.mxu2 }
 0x3b4   : > { %4465 = vxpose.xlu0.c.b16.end [8/8] %v5602_v27, 128  ;;  %5780 = vmatpush.lsf.bf16.msrb.mxu1 %v5580_v14 }
 0x3b7   : > { %5806 = vmatpush.lsf.bf16.msrb.mxu2 %v5590_v45  ;;  %5762 = vmatmul.lmr.bf16.gmra.16.mxu0 }
 0x3b8   : > { %v2988_v43 = vpop.f32.mrf.mxu1  ;;  %5781 = vmatpush.lsf.bf16.msrb.mxu1 %v5579_v56  ;;  %v3965_v19 = vpop.f32.mrf.mxu3 }
 0x3b9   : > { %v4032_v18 = vmul.f32 %v3953_v6, %v2988_v43 }
 0x3ba   : > { %5782 = vllmr.16.mxu1 }
 0x3bb   : > { %5807 = vmatpush.lsf.bf16.msrb.mxu2 %v5589_v11  ;;  %v4096_v42 = vmul.f32 %v4032_v18, %v3459_v61  ;;  %v3471_v37 = vpop.f32.mrf.mxu2 }
 0x3bf   : > { %5808 = vmatpush.lsf.bf16.msrb.mxu2 %v5588_v9  ;;  %5763 = vmatmul.lmr.bf16.gmra.16.mxu0 }
 0x3c0   : > { %v2991_v50 = vpop.f32.mrf.mxu1  ;;  %v3968_v40 = vpop.f32.mrf.mxu3 }
 0x3c1   : > { %v4033_v20 = vmul.f32 %v3955_v30, %v2991_v50 }
 0x3c3   : > { %v4097_v31 = vmul.f32 %v4033_v20, %v3462_v23  ;;  %5809 = vmatpush.lsf.bf16.msrb.mxu2 %v5587_v58  ;;  %v3474_v10 = vpop.f32.mrf.mxu2  ;;  %v4031_v58 = vmul.f32 %v7881_v28, %v7899_v63 }
 0x3c5   : > { %v7918_v26 = vpack.c.bf16 %v4097_v31, %v4096_v42  ;;  %5810 = vllmr.16.mxu2  ;;  %v4095_v56 = vmul.f32 %v4031_v58, %v7883_v21  ;;  %v4026_v21 = vmul.f32 %v7814_v54, %v7853_v32 }
 0x3c7   : > { %5764 = vmatmul.lmr.bf16.gmra.16.mxu0  ;;  %v4090_v63 = vmul.f32 %v4026_v21, %v7818_v38 }
 0x3c8   : > { %v2994_v2 = vpop.f32.mrf.mxu1  ;;  %v3970_v6 = vpop.f32.mrf.mxu3 }
 0x3c9   : > { %v4034_v7 = vmul.f32 %v3958_v35, %v2994_v2 }
 0x3cb   : > { %v7921_v13 = vmul.f32 %v4034_v7, %v3465_v8  ;;  %v3477_v25 = vpop.f32.mrf.mxu2  ;;  %v4028_v7 = vmul.f32 %v7832_v33, %v7875_v53 }
 0x3cd   : > { %v4092_v33 = vmul.f32 %v4028_v7, %v7834_v16 }
 0x3cf   : > { %5765 = vmatmul.lmr.bf16.gmra.16.mxu0 }
 0x3d0   : > { %v2997_v1 = vpop.f32.mrf.mxu1  ;;  %v3973_v12 = vpop.f32.mrf.mxu3 }
 0x3d1   : > { %v4035_v50 = vmul.f32 %v7912_v15, %v2997_v1  ;;  %v4030_v15 = vmul.f32 %v7868_v52, %v7893_v47  ;;  %v4027_v52 = vmul.f32 %v7822_v49, %v7866_v22 }
 0x3d3   : > { %v3480_v61 = vpop.f32.mrf.mxu2  ;;  %v4099_v42 = vmul.f32 %v4035_v50, %v7914_v34  ;;  %v4029_v34 = vmul.f32 %v7851_v29, %v7888_v17 }
 0x3d5   : > { %v4134_v2 = vpack.c.bf16 %v4099_v42, %v7921_v13  ;;  %v4093_v47 = vmul.f32 %v4029_v34, %v7855_v5 }
 0x3d7   : > { %5766 = vmatmul.lmr.bf16.gmra.16.mxu0  ;;  %v4131_v53 = vpack.c.bf16 %v4093_v47, %v4092_v33 }
 0x3d8   : > { %v3000_v39 = vpop.f32.mrf.mxu1  ;;  %v3975_v23 = vpop.f32.mrf.mxu3 }
 0x3d9   : > { %v4036_v11 = vmul.f32 %v3963_v57, %v3000_v39  ;;  %v4094_v57 = vmul.f32 %v4030_v15, %v7870_v62  ;;  %v4091_v62 = vmul.f32 %v4027_v52, %v7824_v24  ;;  %v4141_v52 = vld [vmem:[#allocation3 + $0x60] sm:$0xff] }
 0x3db   : > { %5783 = vmatmul.lmr.bf16.vlgmr.msra.gmra.16.mxu1  ;;  %v3483_v36 = vpop.f32.mrf.mxu2  ;;  %v4100_v20 = vmul.f32 %v4036_v11, %v3471_v37  ;;  %v4132_v29 = vpack.c.bf16 %v4095_v56, %v4094_v57  ;;  %v4130_v49 = vpack.c.bf16 %v4091_v62, %v4090_v63  ;;  %v4142_v62 = vld [vmem:[#allocation3 + $0x68] sm:$0xff] }
 0x3df   : > { %5767 = vmatmul.lmr.bf16.gmra.16.mxu0 }
 0x3e0   : > { %v3003_v55 = vpop.f32.mrf.mxu1 }
 0x3e1   : > { %v4037_v35 = vmul.f32 %v3965_v19, %v3003_v55 }
 0x3e3   : > { %5784 = vmatmul.lmr.bf16.gmra.16.mxu1  ;;  %v3486_v3 = vpop.f32.mrf.mxu2  ;;  %v4101_v41 = vmul.f32 %v4037_v35, %v3474_v10 }
 0x3e5   : > { %v4135_v31 = vpack.c.bf16 %v4101_v41, %v4100_v20 }
 0x3e6   : > { %5811 = vmatmul.lmr.bf16.vlgmr.msra.gmra.16.mxu2 }
 0x3e7   : > { %5768 = vmatmul.lmr.bf16.gmra.16.mxu0 }
 0x3e8   : > { %v3006_v46 = vpop.f32.mrf.mxu1 }
 0x3e9   : > { %v4038_v43 = vmul.f32 %v3968_v40, %v3006_v46 }
 0x3eb   : > { %5785 = vmatmul.lmr.bf16.gmra.16.mxu1  ;;  %v4102_v18 = vmul.f32 %v4038_v43, %v3477_v25 }
 0x3ee   : > { %5812 = vmatmul.lmr.bf16.gmra.16.mxu2 }
 0x3ef   : > { %5769 = vmatmul.lmr.bf16.gmra.16.mxu0 }
 0x3f0   : > { %v3009_v48 = vpop.f32.mrf.mxu1  ;;  %v4466_v17 = vpop.trf.xlu0 }
 0x3f1   : > { %v4039_v60 = vmul.f32 %v3970_v6, %v3009_v48 }
 0x3f3   : > { %v4103_v8 = vmul.f32 %v4039_v60, %v3480_v61  ;;  %5786 = vmatmul.lmr.bf16.gmra.16.mxu1 }
 0x3f5   : > { %v4136_v9 = vpack.c.bf16 %v4103_v8, %v4102_v18 }
 0x3f6   : > { %5813 = vmatmul.lmr.bf16.gmra.16.mxu2 }
 0x3f7   : > { %5770 = vmatmul.lmr.bf16.gmra.16.mxu0 }
 0x3f8   : > { %v3012_v51 = vpop.f32.mrf.mxu1 }
 0x3f9   : > { %v4040_v30 = vmul.f32 %v3973_v12, %v3012_v51 }
 0x3fb   : > { %v4104_v27 = vmul.f32 %v4040_v30, %v3483_v36  ;;  %5787 = vmatmul.lmr.bf16.gmra.16.mxu1 }
 0x3fc   : > { %v7923_v45 = vpop.f32.mrf.mxu0 }
 0x3fe   : > { %5814 = vmatmul.lmr.bf16.gmra.16.mxu2 }
 0x400   : > { %v3015_v4 = vpop.f32.mrf.mxu1  ;;  %v4467_v22 = vpop.trf.xlu0 }
 0x401   : > { %v4041_v0 = vmul.f32 %v3975_v23, %v3015_v4 }
 0x403   : > { %v4105_v44 = vmul.f32 %v4041_v0, %v3486_v3  ;;  %5788 = vmatmul.lmr.bf16.gmra.16.mxu1 }
 0x404   : > { %v7927_v14 = vpop.f32.mrf.mxu0 }
 0x405   : > { %v4137_v59 = vpack.c.bf16 %v4105_v44, %v4104_v27  ;;  %v4138_v44 = vld [vmem:[#allocation3] sm:$0xff] }
 0x406   : > { %5815 = vmatmul.lmr.bf16.gmra.16.mxu2 }
 0x407   : > { %4621 = vmatpush.bf16.msra.mxu0 %v4137_v59  ;;  %5687 = vmatpush.bf16.msrb.mxu3 %v4137_v59 }
 0x40b   : > { %4622 = vmatpush.bf16.msra.mxu0 %v4136_v9  ;;  %5688 = vmatpush.bf16.msrb.mxu3 %v4136_v9  ;;  %v4140_v9 = vld [vmem:[#allocation3 + $0x50] sm:$0xff] }
 0x40c   : > { %v7942_v28 = vpop.f32.mrf.mxu0  ;;  %5789 = vmatmul.lmr.bf16.gmra.16.mxu1 }
 0x40e   : > { %5816 = vmatmul.lmr.bf16.gmra.16.mxu2 }
 0x40f   : > { %4623 = vmatpush.bf16.msra.mxu0 %v4135_v31  ;;  %5689 = vmatpush.bf16.msrb.mxu3 %v4135_v31 }
 0x410   : > { %v4468_v24 = vpop.trf.xlu0 }
 0x413   : > { %4624 = vmatpush.bf16.msra.mxu0 %v4134_v2  ;;  %5690 = vmatpush.bf16.msrb.mxu3 %v4134_v2  ;;  %v4139_v2 = vld [vmem:[#allocation3 + $0x18] sm:$0xff] }
 0x414   : > { %v7952_v5 = vpop.f32.mrf.mxu0  ;;  %5790 = vmatmul.lmr.bf16.gmra.16.mxu1 }
 0x416   : > { %5817 = vmatmul.lmr.bf16.gmra.16.mxu2 }
 0x417   : > { %4625 = vmatpush.bf16.msra.mxu0 %v7918_v26  ;;  %5691 = vmatpush.bf16.msrb.mxu3 %v7918_v26 }
 0x41b   : > { %4626 = vmatpush.bf16.msra.mxu0 %v4132_v29  ;;  %5692 = vmatpush.bf16.msrb.mxu3 %v4132_v29 }
 0x41c   : > { %v7954_v54 = vpop.f32.mrf.mxu0  ;;  %5791 = vmatmul.lmr.bf16.gmra.16.mxu1 }
 0x41e   : > { %5818 = vmatmul.lmr.bf16.gmra.16.mxu2 }
 0x41f   : > { %4627 = vmatpush.bf16.msra.mxu0 %v4131_v53  ;;  %5693 = vmatpush.bf16.msrb.mxu3 %v4131_v53 }
 0x420   : > { %v4469_v32 = vpop.trf.xlu0 }
 0x423   : > { %4628 = vmatpush.bf16.msra.mxu0 %v4130_v49  ;;  %5694 = vmatpush.bf16.msrb.mxu3 %v4130_v49 }
 0x424   : > { %v7956_v16 = vpop.f32.mrf.mxu0  ;;  %5792 = vmatmul.lmr.bf16.gmra.16.mxu1 }
 0x426   : > { %4629 = vmatmul.bf16.vlgmr.msra.gmra.mxu0 %v4466_v17  ;;  %4634 = vmatmul.bf16.vlgmr.msrb.gmra.mxu3 %v4467_v22 }
 0x427   : > { %5819 = vmatmul.lmr.bf16.gmra.16.mxu2 }
 0x42c   : > { %5793 = vmatmul.lmr.bf16.gmra.16.mxu1  ;;  %v7958_v38 = vpop.f32.mrf.mxu0 }
 0x42f   : > { %5820 = vmatmul.lmr.bf16.gmra.16.mxu2 }
 0x430   : > { %v4470_v13 = vpop.trf.xlu0 }
 0x434   : > { %5794 = vmatmul.lmr.bf16.gmra.16.mxu1  ;;  %v7960_v26 = vpop.f32.mrf.mxu0 }
 0x436   : > { %4639 = vmatmul.bf16.gmra.mxu3 %v4468_v24 }
 0x437   : > { %5821 = vmatmul.lmr.bf16.gmra.16.mxu2 }
 0x43c   : > { %5795 = vmatmul.lmr.bf16.gmra.16.mxu1  ;;  %v7962_v37 = vpop.f32.mrf.mxu0 }
 0x43f   : > { %5822 = vmatmul.lmr.bf16.gmra.16.mxu2 }
 0x440   : > { %v4471_v19 = vpop.trf.xlu0 }
 0x444   : > { %5796 = vmatmul.lmr.bf16.gmra.16.mxu1  ;;  %v7964_v1 = vpop.f32.mrf.mxu0 }
 0x446   : > { %4644 = vmatmul.bf16.gmra.mxu3 %v4469_v32 }
 0x447   : > { %5823 = vmatmul.lmr.bf16.gmra.16.mxu2 }
 0x44c   : > { %5797 = vmatmul.lmr.bf16.gmra.16.mxu1  ;;  %v7966_v39 = vpop.f32.mrf.mxu0 }
 0x44f   : > { %5824 = vmatmul.lmr.bf16.gmra.16.mxu2 }
 0x450   : > { %v4472_v55 = vpop.trf.xlu0 }
 0x454   : > { %5798 = vmatmul.lmr.bf16.gmra.16.mxu1  ;;  %v7968_v10 = vpop.f32.mrf.mxu0 }
 0x456   : > { %4649 = vmatmul.bf16.gmra.mxu3 %v4470_v13  ;;  %v4143_v13 = vld [vmem:[#allocation3 + $0x20] sm:$0xff] }
 0x457   : > { %5825 = vmatmul.lmr.bf16.gmra.16.mxu2 }
 0x458   : > { %v4532_v40 = vpop.f32.mrf.mxu1 }
 0x459   : > { %v4533_v0 = vadd.f32 %v4532_v40, %v7923_v45 }
 0x45c   : > { %v7970_v46 = vpop.f32.mrf.mxu0 }
 0x45f   : > { %5826 = vmatmul.lmr.bf16.gmra.16.mxu2 }
 0x460   : > { %v4534_v6 = vpop.f32.mrf.mxu1  ;;  %v4473_v48 = vpop.trf.xlu0 }
 0x461   : > { %v4535_v50 = vadd.f32 %v4534_v6, %v7927_v14 }
 0x464   : > { %v7972_v12 = vpop.f32.mrf.mxu0 }
 0x466   : > { %4654 = vmatmul.bf16.gmra.mxu3 %v4471_v19 }
 0x468   : > { %v4537_v36 = vpop.f32.mrf.mxu1 }
 0x469   : > { %v4581_v25 = vpop.f32.mrf.mxu2  ;;  %v4538_v59 = vadd.f32 %v4537_v36, %v7942_v28 }
 0x46a   : > { %v4582_v27 = vadd.f32 %v4581_v25, %v4533_v0  ;;  %v4145_v0 = vld [vmem:[#allocation3 + $0x10] sm:$0xff] }
 0x46c   : > { %v7974_v30 = vpop.f32.mrf.mxu0 }
 0x470   : > { %v4539_v23 = vpop.f32.mrf.mxu1 }
 0x471   : > { %v4583_v61 = vpop.f32.mrf.mxu2  ;;  %v4540_v56 = vadd.f32 %v4539_v23, %v7952_v5 }
 0x472   : > { %v4584_v31 = vadd.f32 %v4583_v61, %v4535_v50 }
 0x474   : > { %v7976_v3 = vpop.f32.mrf.mxu0 }
 0x476   : > { %4659 = vmatmul.bf16.gmra.mxu3 %v4472_v55 }
 0x478   : > { %v4542_v60 = vpop.f32.mrf.mxu1 }
 0x479   : > { %v4586_v51 = vpop.f32.mrf.mxu2  ;;  %v4543_v21 = vadd.f32 %v4542_v60, %v7954_v54 }
 0x47a   : > { %v4587_v41 = vadd.f32 %v4586_v51, %v4538_v59 }
 0x480   : > { %v4544_v11 = vpop.f32.mrf.mxu1 }
 0x481   : > { %v4588_v4 = vpop.f32.mrf.mxu2  ;;  %v4545_v5 = vadd.f32 %v4544_v11, %v7956_v16  ;;  %v4146_v11 = vld [vmem:[#allocation3 + $0x28] sm:$0xff] }
 0x482   : > { %v4589_v28 = vadd.f32 %v4588_v4, %v4540_v56  ;;  %v4148_v56 = vld [vmem:[#allocation3 + $0x38] sm:$0xff] }
 0x486   : > { %4664 = vmatmul.bf16.gmra.mxu3 %v4473_v48  ;;  %v4144_v48 = vld [vmem:[#allocation3 + $0x70] sm:$0xff] }
 0x489   : > { %v4591_v43 = vpop.f32.mrf.mxu2  ;;  %v4547_v57 = vpop.f32.mrf.mxu1 }
 0x48a   : > { %v4592_v33 = vadd.f32 %v4591_v43, %v4543_v21  ;;  %v4548_v6 = vadd.f32 %v4547_v57, %v7958_v38 }
 0x491   : > { %v4593_v42 = vpop.f32.mrf.mxu2  ;;  %v4549_v63 = vpop.f32.mrf.mxu1 }
 0x492   : > { %v4594_v32 = vadd.f32 %v4593_v42, %v4545_v5  ;;  %v4550_v4 = vadd.f32 %v4549_v63, %v7960_v26  ;;  %v4147_v42 = vld [vmem:[#allocation3 + $0x40] sm:$0xff]  ;;  %v4150_v63 = vld [vmem:[#allocation3 + $0x58] sm:$0xff] }
 0x499   : > { %v4596_v29 = vpop.f32.mrf.mxu2  ;;  %v4552_v40 = vpop.f32.mrf.mxu1 }
 0x49a   : > { %v4597_v61 = vadd.f32 %v4596_v29, %v4548_v6  ;;  %v4149_v29 = vld [vmem:[#allocation3 + $0x8] sm:$0xff] }
 0x4a1   : > { %v4598_v24 = vpop.f32.mrf.mxu2  ;;  %v4554_v16 = vpop.f32.mrf.mxu1 }
 0x4a2   : > { %v4599_v60 = vadd.f32 %v4598_v24, %v4550_v4  ;;  %v4555_v26 = vadd.f32 %v4554_v16, %v7964_v1 }
 0x4a3   : > { %v4630_v35 = vpop.f32.mrf.mxu0 }
 0x4a4   : > { %v4631_v8 = vadd.f32 %v4630_v35, %v4582_v27 }
 0x4a6   : > { %v4670_v18 = vadd.f32 %v4631_v8, %v4138_v44  ;;  %v4553_v8 = vadd.f32 %v4552_v40, %v7962_v37 }
 0x4a8   : > { %4686 = vst [vmem:[#allocation3] sm:$0xff] %v4670_v18 }
 0x4a9   : > { %v4635_v20 = vpop.f32.mrf.mxu3  ;;  %v4557_v38 = vpop.f32.mrf.mxu1 }
 0x4aa   : > { %v4636_v58 = vadd.f32 %v4635_v20, %v4587_v41  ;;  %v4601_v54 = vpop.f32.mrf.mxu2 }
 0x4ab   : > { %v4632_v45 = vpop.f32.mrf.mxu0  ;;  %v4602_v59 = vadd.f32 %v4601_v54, %v4553_v8 }
 0x4ac   : > { %v4633_v15 = vadd.f32 %v4632_v45, %v4584_v31  ;;  %v4672_v34 = vadd.f32 %v4636_v58, %v4140_v9 }
 0x4ae   : > { %v4671_v7 = vadd.f32 %v4633_v15, %v4139_v2  ;;  %4688 = vst [vmem:[#allocation3 + $0x50] sm:$0xff] %v4672_v34  ;;  %v4558_v15 = vadd.f32 %v4557_v38, %v7966_v39 }
 0x4b0   : > { %4687 = vst [vmem:[#allocation3 + $0x18] sm:$0xff] %v4671_v7 }
 0x4b1   : > { %v4637_v14 = vpop.f32.mrf.mxu3  ;;  %v4559_v58 = vpop.f32.mrf.mxu1 }
 0x4b2   : > { %v4638_v47 = vadd.f32 %v4637_v14, %v4589_v28  ;;  %v4603_v27 = vpop.f32.mrf.mxu2  ;;  %v4560_v14 = vadd.f32 %v4559_v58, %v7968_v10 }
 0x4b3   : > { %v4604_v20 = vadd.f32 %v4603_v27, %v4555_v26 }
 0x4b4   : > { %v4673_v17 = vadd.f32 %v4638_v47, %v4141_v52 }
 0x4b6   : > { %4689 = vst [vmem:[#allocation3 + $0x60] sm:$0xff] %v4673_v17 }
 0x4b9   : > { %v4640_v53 = vpop.f32.mrf.mxu3  ;;  %v4562_v28 = vpop.f32.mrf.mxu1 }
 0x4ba   : > { %v4641_v49 = vadd.f32 %v4640_v53, %v4592_v33  ;;  %v4606_v41 = vpop.f32.mrf.mxu2 }
 0x4bb   : > { %v4607_v34 = vadd.f32 %v4606_v41, %v4558_v15 }
 0x4bc   : > { %v4674_v22 = vadd.f32 %v4641_v49, %v4142_v62  ;;  %v4563_v62 = vadd.f32 %v4562_v28, %v7970_v46 }
 0x4be   : > { %4690 = vst [vmem:[#allocation3 + $0x68] sm:$0xff] %v4674_v22 }
 0x4c1   : > { %v4642_v19 = vpop.f32.mrf.mxu3  ;;  %v4564_v39 = vpop.f32.mrf.mxu1 }
 0x4c2   : > { %v4643_v55 = vadd.f32 %v4642_v19, %v4594_v32  ;;  %v4608_v37 = vpop.f32.mrf.mxu2  ;;  %v4565_v32 = vadd.f32 %v4564_v39, %v7972_v12  ;;  %v4151_v19 = vld [vmem:[#allocation3 + $0x48] sm:$0xff] }
 0x4c3   : > { %v4609_v47 = vadd.f32 %v4608_v37, %v4560_v14 }
 0x4c4   : > { %v4675_v25 = vadd.f32 %v4643_v55, %v4143_v13 }
 0x4c6   : > { %4691 = vst [vmem:[#allocation3 + $0x20] sm:$0xff] %v4675_v25 }
 0x4c9   : > { %v4645_v36 = vpop.f32.mrf.mxu3  ;;  %v4567_v10 = vpop.f32.mrf.mxu1 }
 0x4ca   : > { %v4646_v51 = vadd.f32 %v4645_v36, %v4597_v61  ;;  %v4611_v1 = vpop.f32.mrf.mxu2  ;;  %v4568_v46 = vadd.f32 %v4567_v10, %v7974_v30  ;;  %v4152_v61 = vld [vmem:[#allocation3 + $0x78] sm:$0xff] }
 0x4cb   : > { %v4612_v53 = vadd.f32 %v4611_v1, %v4563_v62 }
 0x4cc   : > { %v4676_v23 = vadd.f32 %v4646_v51, %v4144_v48 }
 0x4ce   : > { %4692 = vst [vmem:[#allocation3 + $0x70] sm:$0xff] %v4676_v23 }
 0x4d1   : > { %v4647_v43 = vpop.f32.mrf.mxu3  ;;  %v4569_v36 = vpop.f32.mrf.mxu1 }
 0x4d2   : > { %v4648_v44 = vadd.f32 %v4647_v43, %v4599_v60  ;;  %v4613_v22 = vpop.f32.mrf.mxu2  ;;  %v4570_v4 = vadd.f32 %v4569_v36, %v7976_v3  ;;  %v4153_v60 = vld [vmem:[#allocation3 + $0x30] sm:$0xff] }
 0x4d3   : > { %v4614_v13 = vadd.f32 %v4613_v22, %v4565_v32 }
 0x4d4   : > { %v4677_v35 = vadd.f32 %v4648_v44, %v4145_v0 }
 0x4d6   : > { %4693 = vst [vmem:[#allocation3 + $0x10] sm:$0xff] %v4677_v35 }
 0x4d9   : > { %v4650_v18 = vpop.f32.mrf.mxu3 }
 0x4da   : > { %v4651_v50 = vadd.f32 %v4650_v18, %v4602_v59  ;;  %v4616_v25 = vpop.f32.mrf.mxu2 }
 0x4db   : > { %v4617_v54 = vadd.f32 %v4616_v25, %v4568_v46 }
 0x4dc   : > { %v4678_v9 = vadd.f32 %v4651_v50, %v4146_v11 }
 0x4de   : > { %4694 = vst [vmem:[#allocation3 + $0x28] sm:$0xff] %v4678_v9 }
 0x4e1   : > { %v4652_v31 = vpop.f32.mrf.mxu3 }
 0x4e2   : > { %v4653_v2 = vadd.f32 %v4652_v31, %v4604_v20  ;;  %v4618_v12 = vpop.f32.mrf.mxu2 }
 0x4e3   : > { %v4619_v16 = vadd.f32 %v4618_v12, %v4570_v4 }
 0x4e4   : > { %v4679_v45 = vadd.f32 %v4653_v2, %v4147_v42 }
 0x4e6   : > { %4695 = vst [vmem:[#allocation3 + $0x40] sm:$0xff] %v4679_v45 }
 0x4e9   : > { %v4655_v7 = vpop.f32.mrf.mxu3 }
 0x4ea   : > { %v4656_v57 = vadd.f32 %v4655_v7, %v4607_v34 }
 0x4ec   : > { %v4680_v52 = vadd.f32 %v4656_v57, %v4148_v56 }
 0x4ee   : > { %4696 = vst [vmem:[#allocation3 + $0x38] sm:$0xff] %v4680_v52 }
 0x4f1   : > { %v4657_v17 = vpop.f32.mrf.mxu3 }
 0x4f2   : > { %v4658_v21 = vadd.f32 %v4657_v17, %v4609_v47 }
 0x4f4   : > { %v4681_v33 = vadd.f32 %v4658_v21, %v4149_v29 }
 0x4f6   : > { %4697 = vst [vmem:[#allocation3 + $0x8] sm:$0xff] %v4681_v33 }
 0x4f9   : > { %v4660_v49 = vpop.f32.mrf.mxu3 }
 0x4fa   : > { %v4661_v5 = vadd.f32 %v4660_v49, %v4612_v53 }
 0x4fc   : > { %v4682_v24 = vadd.f32 %v4661_v5, %v4150_v63 }
 0x4fe   : > { %4698 = vst [vmem:[#allocation3 + $0x58] sm:$0xff] %v4682_v24 }
 0x501   : > { %v4662_v55 = vpop.f32.mrf.mxu3 }
 0x502   : > { %v4663_v40 = vadd.f32 %v4662_v55, %v4614_v13 }
 0x504   : > { %v4683_v6 = vadd.f32 %v4663_v40, %v4151_v19 }
 0x506   : > { %4699 = vst [vmem:[#allocation3 + $0x48] sm:$0xff] %v4683_v6 }
 0x509   : > { %v4665_v48 = vpop.f32.mrf.mxu3 }
 0x50a   : > { %v4666_v51 = vadd.f32 %v4665_v48, %v4617_v54 }
 0x50c   : > { %v4684_v23 = vadd.f32 %v4666_v51, %v4152_v61 }
 0x50e   : > { %4700 = vst [vmem:[#allocation3 + $0x78] sm:$0xff] %v4684_v23 }
 0x511   : > { %v4667_v0 = vpop.f32.mrf.mxu3 }
 0x512   : > { %v4668_v43 = vadd.f32 %v4667_v0, %v4619_v16  ;;  %4705 = sbr.rel (%p5527_p9) target bundleno = 1495 (0x5d7), region = 76 }
 0x514   : > { %v4685_v27 = vadd.f32 %v4668_v43, %v4153_v60 }
 0x516   : > { %4701 = vst [vmem:[#allocation3 + $0x30] sm:$0xff] %v4685_v27 }
 0x517   : > { %v4737_v30 = vld [vmem:[%s8113_s28 + $0x78] sm:$0xff]  ;;  %v4736_v44 = vld [vmem:[%s8113_s28 + $0x70] sm:$0xff]  ;;  %v4735_v3 = vld [vmem:[%s8113_s28 + $0x68] sm:$0xff]  ;;  %vm4819_vm1 = vcmask 261120  }
 0x518   : > { %5696 = vmatpush.msra.mxu2 %v4737_v30  ;;  %5697 = vmatpush.msra.mxu3 %v4737_v30  ;;  %v4734_v35 = vld [vmem:[%s8113_s28 + $0x60] sm:$0xff]  ;;  %v4733_v8 = vld [vmem:[%s8113_s28 + $0x58] sm:$0xff]  ;;  %v4732_v38 = vld [vmem:[%s8113_s28 + $0x50] sm:$0xff] }
 0x519   : > { %4754 = vmatpush.msra.mxu0 %v4737_v30  ;;  %5695 = vmatpush.msra.mxu1 %v4737_v30  ;;  %v4731_v59 = vld [vmem:[%s8113_s28 + $0x48] sm:$0xff]  ;;  %v4730_v11 = vld [vmem:[%s8113_s28 + $0x40] sm:$0xff]  ;;  %v4729_v18 = vld [vmem:[%s8113_s28 + $0x38] sm:$0xff] }
 0x51a   : > { %5699 = vmatpush.msra.mxu2 %v4736_v44  ;;  %5700 = vmatpush.msra.mxu3 %v4736_v44  ;;  %v4728_v50 = vld [vmem:[%s8113_s28 + $0x30] sm:$0xff]  ;;  %v4727_v41 = vld [vmem:[%s8113_s28 + $0x28] sm:$0xff]  ;;  %v4726_v9 = vld [vmem:[%s8113_s28 + $0x20] sm:$0xff] }
 0x51b   : > { %4755 = vmatpush.msra.mxu0 %v4736_v44  ;;  %5698 = vmatpush.msra.mxu1 %v4736_v44  ;;  %v4725_v26 = vld [vmem:[%s8113_s28 + $0x18] sm:$0xff]  ;;  %v4724_v20 = vld [vmem:[%s8113_s28 + $0x10] sm:$0xff]  ;;  %v4723_v42 = vld [vmem:[%s8113_s28 + $0x8] sm:$0xff] }
 0x51c   : > { %5702 = vmatpush.msra.mxu2 %v4735_v3  ;;  %5703 = vmatpush.msra.mxu3 %v4735_v3  ;;  %v4722_v31 = vld [vmem:[%s8113_s28] sm:$0xff]  ;;  %v4714_v58 = vld [vmem:[#allocation3 + $0x28] sm:$0xff]  ;;  %v4718_v2 = vld [vmem:[#allocation3 + $0x58] sm:$0xff] }
 0x51d   : > { %4756 = vmatpush.msra.mxu0 %v4735_v3  ;;  %5701 = vmatpush.msra.mxu1 %v4735_v3  ;;  %v4706_v45 = vld [vmem:[#allocation3] sm:$0xff]  ;;  %v4710_v15 = vld [vmem:[#allocation3 + $0x68] sm:$0xff]  ;;  %v4707_v56 = vld [vmem:[#allocation3 + $0x18] sm:$0xff] }
 0x51e   : > { %5705 = vmatpush.msra.mxu2 %v4734_v35  ;;  %5706 = vmatpush.msra.mxu3 %v4734_v35  ;;  %v4715_v37 = vld [vmem:[#allocation3 + $0x40] sm:$0xff]  ;;  %v4719_v34 = vld [vmem:[#allocation3 + $0x48] sm:$0xff]  ;;  %v4716_v57 = vld [vmem:[#allocation3 + $0x38] sm:$0xff] }
 0x51f   : > { %4757 = vmatpush.msra.mxu0 %v4734_v35  ;;  %5704 = vmatpush.msra.mxu1 %v4734_v35  ;;  %v4711_v7 = vld [vmem:[#allocation3 + $0x20] sm:$0xff]  ;;  %v4720_v28 = vld [vmem:[#allocation3 + $0x78] sm:$0xff]  ;;  %v4708_v52 = vld [vmem:[#allocation3 + $0x50] sm:$0xff] }
 0x520   : > { %5708 = vmatpush.msra.mxu2 %v4733_v8  ;;  %5709 = vmatpush.msra.mxu3 %v4733_v8  ;;  %v4712_v14 = vld [vmem:[#allocation3 + $0x70] sm:$0xff]  ;;  %v4717_v1 = vld [vmem:[#allocation3 + $0x8] sm:$0xff]  ;;  %v4709_v29 = vld [vmem:[#allocation3 + $0x60] sm:$0xff] }
 0x521   : > { %4758 = vmatpush.msra.mxu0 %v4733_v8  ;;  %5707 = vmatpush.msra.mxu1 %v4733_v8  ;;  %v4721_v47 = vld [vmem:[#allocation3 + $0x30] sm:$0xff]  ;;  %v4738_v21 = vld [vmem:[#allocation4] sm:$0xff]  ;;  %v4739_v13 = vld [vmem:[#allocation4 + $0x8] sm:$0xff] }
 0x522   : > { %5711 = vmatpush.msra.mxu2 %v4732_v38  ;;  %5712 = vmatpush.msra.mxu3 %v4732_v38  ;;  %v4713_v17 = vld [vmem:[#allocation3 + $0x10] sm:$0xff]  ;;  %v4742_v33 = vld [vmem:[#allocation4 + $0x20] sm:$0xff]  ;;  %v4743_v19 = vld [vmem:[#allocation4 + $0x28] sm:$0xff] }
 0x523   : > { %4759 = vmatpush.msra.mxu0 %v4732_v38  ;;  %5710 = vmatpush.msra.mxu1 %v4732_v38  ;;  %v4746_v49 = vld [vmem:[#allocation4 + $0x40] sm:$0xff]  ;;  %v4747_v46 = vld [vmem:[#allocation4 + $0x48] sm:$0xff]  ;;  %v4740_v23 = vld [vmem:[#allocation4 + $0x10] sm:$0xff] }
 0x524   : > { %5714 = vmatpush.msra.mxu2 %v4731_v59  ;;  %5715 = vmatpush.msra.mxu3 %v4731_v59  ;;  %v4750_v22 = vld [vmem:[#allocation4 + $0x60] sm:$0xff]  ;;  %v4751_v54 = vld [vmem:[#allocation4 + $0x68] sm:$0xff]  ;;  %v4744_v4 = vld [vmem:[#allocation4 + $0x30] sm:$0xff] }
 0x525   : > { %4760 = vmatpush.msra.mxu0 %v4731_v59  ;;  %5713 = vmatpush.msra.mxu1 %v4731_v59  ;;  %v4748_v43 = vld [vmem:[#allocation4 + $0x50] sm:$0xff]  ;;  %v4741_v8 = vld [vmem:[#allocation4 + $0x18] sm:$0xff] }
 0x526   : > { %5717 = vmatpush.msra.mxu2 %v4730_v11  ;;  %5718 = vmatpush.msra.mxu3 %v4730_v11  ;;  %v4752_v27 = vld [vmem:[#allocation4 + $0x70] sm:$0xff]  ;;  %v4745_v38 = vld [vmem:[#allocation4 + $0x38] sm:$0xff] }
 0x527   : > { %4761 = vmatpush.msra.mxu0 %v4730_v11  ;;  %5716 = vmatpush.msra.mxu1 %v4730_v11 }
 0x528   : > { %5720 = vmatpush.msra.mxu2 %v4729_v18  ;;  %5721 = vmatpush.msra.mxu3 %v4729_v18 }
 0x529   : > { %4762 = vmatpush.msra.mxu0 %v4729_v18  ;;  %5719 = vmatpush.msra.mxu1 %v4729_v18 }
 0x52a   : > { %5723 = vmatpush.msra.mxu2 %v4728_v50  ;;  %5724 = vmatpush.msra.mxu3 %v4728_v50 }
 0x52b   : > { %4763 = vmatpush.msra.mxu0 %v4728_v50  ;;  %5722 = vmatpush.msra.mxu1 %v4728_v50 }
 0x52c   : > { %5726 = vmatpush.msra.mxu2 %v4727_v41  ;;  %5727 = vmatpush.msra.mxu3 %v4727_v41 }
 0x52d   : > { %4764 = vmatpush.msra.mxu0 %v4727_v41  ;;  %5725 = vmatpush.msra.mxu1 %v4727_v41  ;;  %v4749_v41 = vld [vmem:[#allocation4 + $0x58] sm:$0xff] }
 0x52e   : > { %5729 = vmatpush.msra.mxu2 %v4726_v9  ;;  %5730 = vmatpush.msra.mxu3 %v4726_v9 }
 0x52f   : > { %4765 = vmatpush.msra.mxu0 %v4726_v9  ;;  %5728 = vmatpush.msra.mxu1 %v4726_v9  ;;  %v4753_v9 = vld [vmem:[#allocation4 + $0x78] sm:$0xff] }
 0x530   : > { %5732 = vmatpush.msra.mxu2 %v4725_v26  ;;  %5733 = vmatpush.msra.mxu3 %v4725_v26 }
 0x531   : > { %4766 = vmatpush.msra.mxu0 %v4725_v26  ;;  %5731 = vmatpush.msra.mxu1 %v4725_v26 }
 0x532   : > { %5735 = vmatpush.msra.mxu2 %v4724_v20  ;;  %5736 = vmatpush.msra.mxu3 %v4724_v20 }
 0x533   : > { %4767 = vmatpush.msra.mxu0 %v4724_v20  ;;  %5734 = vmatpush.msra.mxu1 %v4724_v20 }
 0x534   : > { %5738 = vmatpush.msra.mxu2 %v4723_v42  ;;  %5739 = vmatpush.msra.mxu3 %v4723_v42 }
 0x535   : > { %4768 = vmatpush.msra.mxu0 %v4723_v42  ;;  %5737 = vmatpush.msra.mxu1 %v4723_v42 }
 0x536   : > { %5741 = vmatpush.msra.mxu2 %v4722_v31  ;;  %5742 = vmatpush.msra.mxu3 %v4722_v31 }
 0x537   : > { %4794 = vmatmul.f32.vlgmr.msra.gmra.mxu2 %v4714_v58  ;;  %4806 = vmatmul.f32.vlgmr.msra.gmra.mxu3 %v4718_v2 }
 0x538   : > { %4769 = vmatpush.msra.mxu0 %v4722_v31  ;;  %5740 = vmatpush.msra.mxu1 %v4722_v31 }
 0x539   : > { %4770 = vmatmul.f32.vlgmr.msra.gmra.mxu0 %v4706_v45  ;;  %4782 = vmatmul.f32.vlgmr.msra.gmra.mxu1 %v4710_v15 }
 0x53f   : > { %4797 = vmatmul.f32.gmra.mxu2 %v4715_v37  ;;  %4809 = vmatmul.f32.gmra.mxu3 %v4719_v34 }
 0x541   : > { %4773 = vmatmul.f32.gmra.mxu0 %v4707_v56  ;;  %4785 = vmatmul.f32.gmra.mxu1 %v4711_v7 }
 0x547   : > { %4800 = vmatmul.f32.gmra.mxu2 %v4716_v57  ;;  %4812 = vmatmul.f32.gmra.mxu3 %v4720_v28 }
 0x549   : > { %4776 = vmatmul.f32.gmra.mxu0 %v4708_v52  ;;  %4788 = vmatmul.f32.gmra.mxu1 %v4712_v14 }
 0x54f   : > { %4803 = vmatmul.f32.gmra.mxu2 %v4717_v1  ;;  %4815 = vmatmul.f32.gmra.mxu3 %v4721_v47 }
 0x551   : > { %4779 = vmatmul.f32.gmra.mxu0 %v4709_v29  ;;  %4791 = vmatmul.f32.gmra.mxu1 %v4713_v17 }
 0x5b6   : > { %v4771_v62 = vpop.f32.mrf.mxu0  ;;  %v4783_v39 = vpop.f32.mrf.mxu1 }
 0x5b7   : > { %v4772_v53 = vadd.f32 %v4771_v62, %v4738_v21  ;;  %v4784_v63 = vadd.f32 %v4783_v39, %v4742_v33 }
 0x5b9   : > { %4820 = vst.msk [vmem:[%s6294_s17] sm:$0xff] %vm4819_vm1, %v4772_v53 }
 0x5ba   : > { %4824 = vst.msk [vmem:[%s6294_s17 + $0x20] sm:$0xff] %vm4819_vm1, %v4784_v63  ;;  %v4795_v5 = vpop.f32.mrf.mxu2  ;;  %v4807_v24 = vpop.f32.mrf.mxu3 }
 0x5bb   : > { %v4796_v32 = vadd.f32 %v4795_v5, %v4746_v49  ;;  %v4808_v10 = vadd.f32 %v4807_v24, %v4750_v22 }
 0x5bd   : > { %4828 = vst.msk [vmem:[%s6294_s17 + $0x40] sm:$0xff] %vm4819_vm1, %v4796_v32 }
 0x5be   : > { %4832 = vst.msk [vmem:[%s6294_s17 + $0x60] sm:$0xff] %vm4819_vm1, %v4808_v10  ;;  %v4774_v55 = vpop.f32.mrf.mxu0  ;;  %v4786_v40 = vpop.f32.mrf.mxu1 }
 0x5bf   : > { %v4775_v25 = vadd.f32 %v4774_v55, %v4739_v13  ;;  %v4787_v6 = vadd.f32 %v4786_v40, %v4743_v19 }
 0x5c1   : > { %4821 = vst.msk [vmem:[%s6294_s17 + $0x8] sm:$0xff] %vm4819_vm1, %v4775_v25 }
 0x5c2   : > { %4825 = vst.msk [vmem:[%s6294_s17 + $0x28] sm:$0xff] %vm4819_vm1, %v4787_v6  ;;  %v4798_v61 = vpop.f32.mrf.mxu2  ;;  %v4810_v48 = vpop.f32.mrf.mxu3 }
 0x5c3   : > { %v4799_v36 = vadd.f32 %v4798_v61, %v4747_v46  ;;  %v4811_v51 = vadd.f32 %v4810_v48, %v4751_v54 }
 0x5c5   : > { %4829 = vst.msk [vmem:[%s6294_s17 + $0x48] sm:$0xff] %vm4819_vm1, %v4799_v36 }
 0x5c6   : > { %4833 = vst.msk [vmem:[%s6294_s17 + $0x68] sm:$0xff] %vm4819_vm1, %v4811_v51  ;;  %v4777_v12 = vpop.f32.mrf.mxu0  ;;  %v4789_v16 = vpop.f32.mrf.mxu1 }
 0x5c7   : > { %v4778_v60 = vadd.f32 %v4777_v12, %v4740_v23  ;;  %v4790_v0 = vadd.f32 %v4789_v16, %v4744_v4 }
 0x5c9   : > { %4822 = vst.msk [vmem:[%s6294_s17 + $0x10] sm:$0xff] %vm4819_vm1, %v4778_v60 }
 0x5ca   : > { %4826 = vst.msk [vmem:[%s6294_s17 + $0x30] sm:$0xff] %vm4819_vm1, %v4790_v0  ;;  %v4801_v30 = vpop.f32.mrf.mxu2  ;;  %v4813_v44 = vpop.f32.mrf.mxu3 }
 0x5cb   : > { %v4802_v3 = vadd.f32 %v4801_v30, %v4748_v43  ;;  %v4814_v35 = vadd.f32 %v4813_v44, %v4752_v27 }
 0x5cd   : > { %4830 = vst.msk [vmem:[%s6294_s17 + $0x50] sm:$0xff] %vm4819_vm1, %v4802_v3 }
 0x5ce   : > { %4834 = vst.msk [vmem:[%s6294_s17 + $0x70] sm:$0xff] %vm4819_vm1, %v4814_v35  ;;  %v4780_v59 = vpop.f32.mrf.mxu0  ;;  %v4792_v11 = vpop.f32.mrf.mxu1 }
 0x5cf   : > { %v4781_v18 = vadd.f32 %v4780_v59, %v4741_v8  ;;  %v4793_v50 = vadd.f32 %v4792_v11, %v4745_v38 }
 0x5d1   : > { %4823 = vst.msk [vmem:[%s6294_s17 + $0x18] sm:$0xff] %vm4819_vm1, %v4781_v18 }
 0x5d2   : > { %4827 = vst.msk [vmem:[%s6294_s17 + $0x38] sm:$0xff] %vm4819_vm1, %v4793_v50  ;;  %v4804_v26 = vpop.f32.mrf.mxu2  ;;  %v4816_v20 = vpop.f32.mrf.mxu3 }
 0x5d3   : > { %v4805_v42 = vadd.f32 %v4804_v26, %v4749_v41  ;;  %v4817_v31 = vadd.f32 %v4816_v20, %v4753_v9 }
 0x5d5   : > { %4831 = vst.msk [vmem:[%s6294_s17 + $0x58] sm:$0xff] %vm4819_vm1, %v4805_v42 }
 0x5d6   : > { %4835 = vst.msk [vmem:[%s6294_s17 + $0x78] sm:$0xff] %vm4819_vm1, %v4817_v31 }
 0x5d7 PF: > { %s8114_s15 = sld [smem:[#allocation7_spill]] }
 0x5d8   : > { %s8115_s21 = sld [smem:[#allocation5_spill]] }
 0x5d9   : > { %s8116_s22 = sld [smem:[#allocation6_spill]] }
 0x5da   : > { %s8117_s23 = sld [smem:[#allocation8_spill]] }
 0x5db   : > { %s8118_s24 = sld [smem:[#allocation9_spill]] }
 0x5dd   : > { %s22_s25 = sadd.s32 1, %s8114_s15  }
 0x5de   : > { %p19_p10 = scmp.ge.s32.totalorder %s22_s25, 6  }
 0x5e0   :  { %21 = sbr.rel (!%p19_p10) target bundleno = 3 (0x3), region = 115 }

</bundles_post_ra>
